<compile_context>
chip_gen: v5e
topology: v5e:2x2
jax: 0.10.0
libtpu: 0.0.40
codegen_flags: <defaults>
</compile_context>

<pallas_src>
import math
import functools

import jax
import jax.numpy as jnp
from jax.experimental import pallas as pl
from jax.experimental.pallas import tpu as pltpu


# ----------------------------- tiling helper -----------------------------

def _tile(n, pref, unit):
    """Largest tile <= pref that divides n and is a multiple of `unit`;
    falls back to the full extent n (always a legal block size)."""
    pref = min(pref, n)
    if pref == n:
        return n
    t = (pref // unit) * unit
    while t >= unit:
        if n % t == 0:
            return t
        t -= unit
    return n


# ----------------------------- Pallas kernels -----------------------------

def _matmul_kernel(*refs, fuse_residual):
    if fuse_residual:
        x_ref, w_ref, r_ref, o_ref, acc_ref = refs
    else:
        x_ref, w_ref, o_ref, acc_ref = refs
    k = pl.program_id(2)

    @pl.when(k == 0)
    def _():
        if fuse_residual:
            # residual block index is constant over k -> fetched once, read once
            acc_ref[...] = r_ref[...].astype(jnp.float32)
        else:
            acc_ref[...] = jnp.zeros_like(acc_ref)

    # bf16 MXU operands straight from VMEM, f32 accumulation in scratch.
    acc_ref[...] += jnp.dot(x_ref[...], w_ref[...],
                            preferred_element_type=jnp.float32)

    @pl.when(k == pl.num_programs(2) - 1)
    def _():
        o_ref[...] = acc_ref[...].astype(o_ref.dtype)


def matmul(x, w, residual=None, *, out_dtype=jnp.bfloat16, tm=256, tn=256, tk=512):
    """x: (M, K) bf16 @ w: (K, N) bf16 -> (M, N) out_dtype, optionally + residual.

    TODO(synk): per-generation tile retune (bigger tiles + vmem_limit_bytes on
    v6e, 64 MiB-aware budget on v7x, 16 MiB scoped on v5e); current tiles fit
    all three comfortably.
    """
    M, K = x.shape
    Kw, N = w.shape
    assert K == Kw, (K, Kw)
    tm = _tile(M, tm, 8)
    tn = _tile(N, tn, 128)
    tk = _tile(K, tk, 128)
    grid = (M // tm, N // tn, K // tk)

    in_specs = [pl.BlockSpec((tm, tk), lambda i, j, k: (i, k)),
                pl.BlockSpec((tk, tn), lambda i, j, k: (k, j))]
    args = [x, w]
    if residual is not None:
        in_specs.append(pl.BlockSpec((tm, tn), lambda i, j, k: (i, j)))
        args.append(residual)

    return pl.pallas_call(
        functools.partial(_matmul_kernel, fuse_residual=residual is not None),
        out_shape=jax.ShapeDtypeStruct((M, N), out_dtype),
        grid_spec=pltpu.PrefetchScalarGridSpec(
            num_scalar_prefetch=0,
            grid=grid,
            in_specs=in_specs,
            out_specs=pl.BlockSpec((tm, tn), lambda i, j, k: (i, j)),
            scratch_shapes=[pltpu.VMEM((tm, tn), jnp.float32)]),
        compiler_params=pltpu.CompilerParams(
            dimension_semantics=("parallel", "parallel", "arbitrary")),
    )(*args)


def _mlp_swiglu_kernel(x_ref, w1_ref, w2_ref, o_ref, acc1_ref, acc2_ref):
    """Fused fc1 + fc2 + SwiGLU: o = silu(x @ w1) * (x @ w2)."""
    k = pl.program_id(2)

    @pl.when(k == 0)
    def _():
        acc1_ref[...] = jnp.zeros_like(acc1_ref)
        acc2_ref[...] = jnp.zeros_like(acc2_ref)

    x = x_ref[...]
    acc1_ref[...] += jnp.dot(x, w1_ref[...], preferred_element_type=jnp.float32)
    acc2_ref[...] += jnp.dot(x, w2_ref[...], preferred_element_type=jnp.float32)

    @pl.when(k == pl.num_programs(2) - 1)
    def _():
        a = acc1_ref[...]
        o_ref[...] = ((a * jax.nn.sigmoid(a)) * acc2_ref[...]).astype(o_ref.dtype)


def mlp_swiglu(x, w1, w2, *, tm=256, tn=256, tk=512):
    """x: (M, K) bf16, w1/w2: (K, N) bf16 -> silu(x@w1)*(x@w2) : (M, N) bf16."""
    M, K = x.shape
    _, N = w1.shape
    tm = _tile(M, tm, 8)
    tn = _tile(N, tn, 128)
    tk = _tile(K, tk, 128)
    grid = (M // tm, N // tn, K // tk)
    return pl.pallas_call(
        _mlp_swiglu_kernel,
        out_shape=jax.ShapeDtypeStruct((M, N), jnp.bfloat16),
        grid_spec=pltpu.PrefetchScalarGridSpec(
            num_scalar_prefetch=0,
            grid=grid,
            in_specs=[pl.BlockSpec((tm, tk), lambda i, j, k: (i, k)),
                      pl.BlockSpec((tk, tn), lambda i, j, k: (k, j)),
                      pl.BlockSpec((tk, tn), lambda i, j, k: (k, j))],
            out_specs=pl.BlockSpec((tm, tn), lambda i, j, k: (i, j)),
            scratch_shapes=[pltpu.VMEM((tm, tn), jnp.float32),
                            pltpu.VMEM((tm, tn), jnp.float32)]),
        compiler_params=pltpu.CompilerParams(
            dimension_semantics=("parallel", "parallel", "arbitrary")),
    )(x, w1, w2)


def _rmsnorm_kernel(x_ref, s_ref, o_ref, *, eps):
    x = x_ref[...]
    norm = jnp.mean(x * x, axis=-1, keepdims=True)
    o_ref[...] = (s_ref[...] * (x * jax.lax.rsqrt(norm + eps))).astype(o_ref.dtype)


def rmsnorm(x, scale, eps=1e-5, *, tm=256):
    """x: (M, D) f32 residual stream -> (M, D) bf16 (feeds matmul MXU tiles)."""
    M, D = x.shape
    tm = _tile(M, tm, 8)
    return pl.pallas_call(
        functools.partial(_rmsnorm_kernel, eps=eps),
        out_shape=jax.ShapeDtypeStruct((M, D), jnp.bfloat16),
        grid_spec=pltpu.PrefetchScalarGridSpec(
            num_scalar_prefetch=0, grid=(M // tm,),
            in_specs=[pl.BlockSpec((tm, D), lambda i: (i, 0)),
                      pl.BlockSpec((1, D), lambda i: (0, 0))],
            out_specs=pl.BlockSpec((tm, D), lambda i: (i, 0))),
        compiler_params=pltpu.CompilerParams(
            dimension_semantics=("parallel",)),
    )(x, scale.reshape(1, D))


def _attention_kernel(q_ref, k_ref, v_ref, cos_ref, sin_ref, o_ref, *, scale):
    """One (batch, head) per grid step; RoPE fused as a rotate-half prologue
    (valid because attn_w's q/k columns were even/odd permuted at init)."""
    T, hd = q_ref.shape[2], q_ref.shape[3]
    cos = cos_ref[...]                  # (T, hd) f32, [cos | cos]
    sin = sin_ref[...]                  # (T, hd) f32, [-sin | +sin]

    def rope(x):
        xf = x.astype(jnp.float32)
        rolled = pltpu.roll(xf, shift=hd // 2, axis=1)   # rotate-half
        return xf * cos + rolled * sin

    q = rope(q_ref[0, 0]) * scale       # (T, hd) f32, scale folded into q
    kr = rope(k_ref[0, 0])
    v = v_ref[0, 0]                     # (T, hd) bf16

    # contract on hd for both operands -> no transpose/relayout of k
    s = jax.lax.dot_general(q.astype(jnp.bfloat16), kr.astype(jnp.bfloat16),
                            (((1,), (1,)), ((), ())),
                            preferred_element_type=jnp.float32)   # (T, T)
    row = jax.lax.broadcasted_iota(jnp.int32, (T, T), 0)
    col = jax.lax.broadcasted_iota(jnp.int32, (T, T), 1)
    s = jnp.where(row >= col, s, jnp.float32(-1e30))              # causal mask
    m = jnp.max(s, axis=-1, keepdims=True)
    p = jnp.exp(s - m)
    denom = jnp.sum(p, axis=-1, keepdims=True)
    o = jnp.dot(p.astype(jnp.bfloat16), v, preferred_element_type=jnp.float32)
    o = o * pl.reciprocal(denom, approx=True)
    o_ref[0, 0] = o.astype(o_ref.dtype)


def causal_attention(q, k, v, cos, sin):
    """q, k, v: (B, H, T, hd) bf16; cos/sin: (T, hd) f32 -> (B, H, T, hd) bf16."""
    B, H, T, hd = q.shape
    scale = 1.0 / math.sqrt(hd)
    qkv_spec = pl.BlockSpec((1, 1, T, hd), lambda b, h: (b, h, 0, 0))
    tbl_spec = pl.BlockSpec((T, hd), lambda b, h: (0, 0))
    # TODO(synk): for T beyond ~1-2k, replace the (T, T) score materialization
    # with a kv-tiled flash-style online-softmax kernel (sized for 64 MiB VMEM
    # on v7x).
    return pl.pallas_call(
        functools.partial(_attention_kernel, scale=scale),
        out_shape=jax.ShapeDtypeStruct((B, H, T, hd), jnp.bfloat16),
        grid_spec=pltpu.PrefetchScalarGridSpec(
            num_scalar_prefetch=0, grid=(B, H),
            in_specs=[qkv_spec, qkv_spec, qkv_spec, tbl_spec, tbl_spec],
            out_specs=pl.BlockSpec((1, 1, T, hd), lambda b, h: (b, h, 0, 0))),
        compiler_params=pltpu.CompilerParams(
            dimension_semantics=("parallel", "parallel")),
    )(q, k, v, cos, sin)


# --------------------------- RoPE helpers (glue) ---------------------------

def build_rope_tables(seq_len, hd, base=10000):
    """Rotate-half-form tables: cos_full = [cos|cos], sin_full = [-sin|+sin].

    Matches the reference interleaved-pair rotation exactly once the q/k
    feature columns are permuted even-first (see permute_qk_columns)."""
    theta = 1.0 / (base ** (jnp.arange(0, hd, 2, dtype=jnp.float32) / hd))
    ang = jnp.outer(jnp.arange(seq_len, dtype=jnp.float32), theta)   # (S, hd/2)
    cos, sin = jnp.cos(ang), jnp.sin(ang)
    cos_full = jnp.concatenate([cos, cos], axis=-1)                  # (S, hd)
    sin_full = jnp.concatenate([-sin, sin], axis=-1)                 # (S, hd)
    return cos_full, sin_full


def permute_qk_columns(attn_w, n_heads, hd):
    """One-time even/odd feature permutation of the q and k output columns.

    q.k^T is invariant to a shared permutation of q/k features, and the
    interleaved-pair RoPE becomes rotate-half in the permuted basis, so the
    forward output is unchanged."""
    D = n_heads * hd
    perm_d = jnp.concatenate([jnp.arange(0, hd, 2), jnp.arange(1, hd, 2)])
    perm = (jnp.arange(n_heads)[:, None] * hd + perm_d[None, :]).reshape(-1)
    wq = attn_w[:, :D][:, perm]
    wk = attn_w[:, D:2 * D][:, perm]
    wv = attn_w[:, 2 * D:]
    return jnp.concatenate([wq, wk, wv], axis=1)


# ------------------------------ Model (glue) -------------------------------

class Config:
    vocab_size = 256
    n_layers = 2
    n_heads = 4
    n_embed = 128
    max_seq_length = 16
    rms_eps = 1e-5   # RMSNorm default eps (config.eps=1e-7 is never used in the reference)


def find_multiple(n, k):
    return n if n % k == 0 else n + k - (n % k)


def init_params(key, cfg):
    D = cfg.n_embed
    hd = D // cfg.n_heads
    n_hidden = find_multiple(int(2 * (4 * D) / 3), 256)
    std = 0.02 / math.sqrt(2 * cfg.n_layers)
    keys = jax.random.split(key, 2 + 5 * cfg.n_layers)

    # Weights stored pre-transposed as (in_features, out_features) and in bf16
    # so matmul kernels read them natively and feed the MXU bf16 tiles.
    def w(k, shape):
        return (std * jax.random.normal(k, shape, jnp.float32)).astype(jnp.bfloat16)

    params = {
        "embedding": std * jax.random.normal(keys[0], (cfg.vocab_size, D), jnp.float32),
        "lm_head":   w(keys[1], (D, cfg.vocab_size)),
        "ln_f":      jnp.ones((D,), jnp.float32),
        "layers":    [],
    }
    for l in range(cfg.n_layers):
        k0, k1, k2, k3, k4 = keys[2 + 5 * l: 7 + 5 * l]
        attn_w = permute_qk_columns(w(k0, (D, 3 * D)), cfg.n_heads, hd)
        params["layers"].append({
            "rms1":      jnp.ones((D,), jnp.float32),
            "rms2":      jnp.ones((D,), jnp.float32),
            "attn_w":    attn_w,
            "attn_proj": w(k1, (D, D)),
            "fc1":       w(k2, (D, n_hidden)),
            "fc2":       w(k3, (D, n_hidden)),
            "mlp_proj":  w(k4, (n_hidden, D)),
        })
    return params


def llama_forward(params, input_ids, cfg):
    B, T = input_ids.shape
    D = cfg.n_embed
    H = cfg.n_heads
    hd = D // H
    M = B * T

    cos, sin = build_rope_tables(cfg.max_seq_length, hd)
    cos, sin = cos[:T], sin[:T]

    # TODO(synk): embedding gather stays in XLA (no clean Pallas gather here).
    x = params["embedding"][input_ids].reshape(M, D)     # (M, D) f32 residual stream

    def to_heads(t):                                     # (M, D) -> (B, H, T, hd)
        return t.reshape(B, T, H, hd).transpose(0, 2, 1, 3)

    for lp in params["layers"]:
        # ---- attention sub-block ----
        h = rmsnorm(x, lp["rms1"], cfg.rms_eps)          # bf16
        qkv = matmul(h, lp["attn_w"])                    # (M, 3D) bf16
        q, k, v = jnp.split(qkv, 3, axis=-1)
        y = causal_attention(to_heads(q), to_heads(k), to_heads(v), cos, sin)
        y = y.transpose(0, 2, 1, 3).reshape(M, D)        # (M, D) bf16
        x = matmul(y, lp["attn_proj"], residual=x, out_dtype=jnp.float32)

        # ---- MLP sub-block ----
        h2 = rmsnorm(x, lp["rms2"], cfg.rms_eps)         # bf16
        # TODO(synk): reference FeedForward.forward is missing its `return`
        # (returns None, which would crash `x + mlp(...)`); implementing the
        # clearly intended `return self.proj(silu(fc1(x)) * fc2(x))` semantics.
        m = mlp_swiglu(h2, lp["fc1"], lp["fc2"])         # fused fc1 + fc2 + SwiGLU, bf16
        x = matmul(m, lp["mlp_proj"], residual=x, out_dtype=jnp.float32)

    xf = rmsnorm(x, params["ln_f"], cfg.rms_eps)
    logits = matmul(xf, params["lm_head"], out_dtype=jnp.float32)   # (M, vocab) f32
    return logits.reshape(B, T, cfg.vocab_size)


if __name__ == "__main__":
    cfg = Config()
    key = jax.random.PRNGKey(0)
    pkey, dkey = jax.random.split(key)
    params = init_params(pkey, cfg)
    input_ids = jax.random.randint(dkey, (2, 8), 0, cfg.vocab_size, dtype=jnp.int32)

    fwd = jax.jit(functools.partial(llama_forward, cfg=cfg))
    logits = fwd(params, input_ids)
    logits = jax.block_until_ready(logits)

    assert logits.shape == (2, 8, cfg.vocab_size)
    assert logits.dtype == jnp.float32
    assert bool(jnp.all(jnp.isfinite(logits)))
    print("KERNEL_OK")
</pallas_src>

<mosaic_0001>
module attributes {stable_mosaic.version = 11 : i64} {
  func.func @_rmsnorm_kernel(%arg0: i32, %arg1: memref<16x128xf32, #tpu.memory_space<vmem>>, %arg2: memref<1x128xf32, #tpu.memory_space<vmem>>, %arg3: memref<16x128xbf16, #tpu.memory_space<vmem>>) attributes {dimension_semantics = [#tpu.dimension_semantics<parallel>], iteration_bounds = array<i64: 1>, scalar_prefetch = 0 : i64, scratch_operands = 0 : i64, tpu.core_type = #tpu.core_type<tc>, window_params = [{transform_indices = @transform_0, window_bounds = array<i64: 16, 128>}, {pipeline_mode = #tpu.pipeline_mode<synchronous>, transform_indices = @transform_1, window_bounds = array<i64: 1, 128>}, {transform_indices = @transform_2, window_bounds = array<i64: 16, 128>}]} {
    %c0 = arith.constant 0 : index
    %c0_0 = arith.constant 0 : index
    %0 = vector.load %arg1[%c0, %c0_0] : memref<16x128xf32, #tpu.memory_space<vmem>>, vector<16x128xf32>
    %1 = arith.mulf %0, %0 : vector<16x128xf32>
    %cst = arith.constant dense<0.000000e+00> : vector<16xf32>
    %2 = vector.multi_reduction <add>, %1, %cst [1] : vector<16x128xf32> to vector<16xf32>
    %3 = vector.shape_cast %2 : vector<16xf32> to vector<16x1xf32>
    %cst_1 = arith.constant 1.280000e+02 : f32
    %4 = vector.broadcast %cst_1 : f32 to vector<16x1xf32>
    %5 = arith.divf %3, %4 : vector<16x1xf32>
    %c0_2 = arith.constant 0 : index
    %c0_3 = arith.constant 0 : index
    %6 = vector.load %arg2[%c0_2, %c0_3] : memref<1x128xf32, #tpu.memory_space<vmem>>, vector<1x128xf32>
    %cst_4 = arith.constant 9.99999974E-6 : f32
    %7 = vector.broadcast %cst_4 : f32 to vector<16x1xf32>
    %8 = arith.addf %5, %7 : vector<16x1xf32>
    %9 = math.rsqrt %8 : vector<16x1xf32>
    %10 = vector.broadcast %9 : vector<16x1xf32> to vector<16x128xf32>
    %11 = arith.mulf %0, %10 : vector<16x128xf32>
    %12 = vector.broadcast %6 : vector<1x128xf32> to vector<16x128xf32>
    %13 = arith.mulf %12, %11 : vector<16x128xf32>
    %14 = arith.truncf %13 : vector<16x128xf32> to vector<16x128xbf16>
    %c0_5 = arith.constant 0 : index
    %c0_6 = arith.constant 0 : index
    %15 = vector.load %arg3[%c0_5, %c0_6] : memref<16x128xbf16, #tpu.memory_space<vmem>>, vector<16x128xbf16>
    tpu.vector_store %arg3[%c0_5, %c0_6], %14 {strides = array<i32>} : memref<16x128xbf16, #tpu.memory_space<vmem>>, vector<16x128xbf16>,
    return
  }
  func.func @transform_0(%arg0: i32) -> (i32, i32) {
    %c0_i32 = arith.constant 0 : i32
    %c0_i32_0 = arith.constant 0 : i32
    return %arg0, %c0_i32 : i32, i32
  }
  func.func @transform_1(%arg0: i32) -> (i32, i32) {
    %c0_i32 = arith.constant 0 : i32
    %c0_i32_0 = arith.constant 0 : i32
    %c0_i32_1 = arith.constant 0 : i32
    return %c0_i32, %c0_i32_0 : i32, i32
  }
  func.func @transform_2(%arg0: i32) -> (i32, i32) {
    %c0_i32 = arith.constant 0 : i32
    %c0_i32_0 = arith.constant 0 : i32
    return %arg0, %c0_i32 : i32, i32
  }
}

module attributes {stable_mosaic.version = 11 : i64} {
  func.func @_matmul_kernel(%arg0: i32, %arg1: i32, %arg2: i32, %arg3: memref<16x128xbf16, #tpu.memory_space<vmem>>, %arg4: memref<128x128xbf16, #tpu.memory_space<vmem>>, %arg5: memref<16x128xbf16, #tpu.memory_space<vmem>>, %arg6: memref<16x128xf32, #tpu.memory_space<vmem>>) attributes {dimension_semantics = [#tpu.dimension_semantics<parallel>, #tpu.dimension_semantics<parallel>, #tpu.dimension_semantics<arbitrary>], iteration_bounds = array<i64: 1, 3, 1>, scalar_prefetch = 0 : i64, scratch_operands = 1 : i64, tpu.core_type = #tpu.core_type<tc>, window_params = [{transform_indices = @transform_0, window_bounds = array<i64: 16, 128>}, {transform_indices = @transform_1, window_bounds = array<i64: 128, 128>}, {transform_indices = @transform_2, window_bounds = array<i64: 16, 128>}]} {
    %c0_i32 = arith.constant 0 : i32
    %0 = arith.cmpi eq, %arg2, %c0_i32 : i32
    %1 = arith.extui %0 : i1 to i32
    %c0_i32_0 = arith.constant 0 : i32
    %2 = arith.cmpi ne, %1, %c0_i32_0 : i32
    scf.if %2 {
      %cst_10 = arith.constant 0.000000e+00 : f32
      %12 = vector.broadcast %cst_10 : f32 to vector<16x128xf32>
      %c0_11 = arith.constant 0 : index
      %c0_12 = arith.constant 0 : index
      %13 = vector.load %arg6[%c0_11, %c0_12] : memref<16x128xf32, #tpu.memory_space<vmem>>, vector<16x128xf32>
      tpu.vector_store %arg6[%c0_11, %c0_12], %12 {strides = array<i32>} : memref<16x128xf32, #tpu.memory_space<vmem>>, vector<16x128xf32>,
    } else {
    }
    %c0 = arith.constant 0 : index
    %c0_1 = arith.constant 0 : index
    %3 = vector.load %arg6[%c0, %c0_1] : memref<16x128xf32, #tpu.memory_space<vmem>>, vector<16x128xf32>
    %c0_2 = arith.constant 0 : index
    %c0_3 = arith.constant 0 : index
    %4 = vector.load %arg3[%c0_2, %c0_3] : memref<16x128xbf16, #tpu.memory_space<vmem>>, vector<16x128xbf16>
    %c0_4 = arith.constant 0 : index
    %c0_5 = arith.constant 0 : index
    %5 = vector.load %arg4[%c0_4, %c0_5] : memref<128x128xbf16, #tpu.memory_space<vmem>>, vector<128x128xbf16>
    %cst = arith.constant dense<0.000000e+00> : vector<16x128xf32>
    %6 = tpu.matmul %4, %5, %cst {dimension_numbers = #tpu.dot_dimension_numbers<[1], [0], [0], [1], [0, 0, 1, 1], [], []>} : vector<16x128xbf16>, vector<128x128xbf16>, vector<16x128xf32> -> vector<16x128xf32>
    %7 = arith.addf %3, %6 : vector<16x128xf32>
    %c0_6 = arith.constant 0 : index
    %c0_7 = arith.constant 0 : index
    %8 = vector.load %arg6[%c0_6, %c0_7] : memref<16x128xf32, #tpu.memory_space<vmem>>, vector<16x128xf32>
    tpu.vector_store %arg6[%c0_6, %c0_7], %7 {strides = array<i32>} : memref<16x128xf32, #tpu.memory_space<vmem>>, vector<16x128xf32>,
    %c0_i32_8 = arith.constant 0 : i32
    %9 = arith.cmpi eq, %arg2, %c0_i32_8 : i32
    %10 = arith.extui %9 : i1 to i32
    %c0_i32_9 = arith.constant 0 : i32
    %11 = arith.cmpi ne, %10, %c0_i32_9 : i32
    scf.if %11 {
      %c0_10 = arith.constant 0 : index
      %c0_11 = arith.constant 0 : index
      %12 = vector.load %arg6[%c0_10, %c0_11] : memref<16x128xf32, #tpu.memory_space<vmem>>, vector<16x128xf32>
      %13 = arith.truncf %12 : vector<16x128xf32> to vector<16x128xbf16>
      %c0_12 = arith.constant 0 : index
      %c0_13 = arith.constant 0 : index
      %14 = vector.load %arg5[%c0_12, %c0_13] : memref<16x128xbf16, #tpu.memory_space<vmem>>, vector<16x128xbf16>
      tpu.vector_store %arg5[%c0_12, %c0_13], %13 {strides = array<i32>} : memref<16x128xbf16, #tpu.memory_space<vmem>>, vector<16x128xbf16>,
    } else {
    }
    return
  }
  func.func @transform_0(%arg0: i32, %arg1: i32, %arg2: i32) -> (i32, i32) {
    %c0_i32 = arith.constant 0 : i32
    return %arg0, %arg2 : i32, i32
  }
  func.func @transform_1(%arg0: i32, %arg1: i32, %arg2: i32) -> (i32, i32) {
    %c0_i32 = arith.constant 0 : i32
    return %arg2, %arg1 : i32, i32
  }
  func.func @transform_2(%arg0: i32, %arg1: i32, %arg2: i32) -> (i32, i32) {
    %c0_i32 = arith.constant 0 : i32
    return %arg0, %arg1 : i32, i32
  }
}

module attributes {stable_mosaic.version = 11 : i64} {
  func.func @_matmul_kernel(%arg0: i32, %arg1: i32, %arg2: i32, %arg3: memref<16x128xbf16, #tpu.memory_space<vmem>>, %arg4: memref<128x128xbf16, #tpu.memory_space<vmem>>, %arg5: memref<16x128xf32, #tpu.memory_space<vmem>>, %arg6: memref<16x128xf32, #tpu.memory_space<vmem>>, %arg7: memref<16x128xf32, #tpu.memory_space<vmem>>) attributes {dimension_semantics = [#tpu.dimension_semantics<parallel>, #tpu.dimension_semantics<parallel>, #tpu.dimension_semantics<arbitrary>], iteration_bounds = array<i64: 1, 1, 1>, scalar_prefetch = 0 : i64, scratch_operands = 1 : i64, tpu.core_type = #tpu.core_type<tc>, window_params = [{transform_indices = @transform_0, window_bounds = array<i64: 16, 128>}, {transform_indices = @transform_1, window_bounds = array<i64: 128, 128>}, {transform_indices = @transform_2, window_bounds = array<i64: 16, 128>}, {transform_indices = @transform_3, window_bounds = array<i64: 16, 128>}]} {
    %c0_i32 = arith.constant 0 : i32
    %0 = arith.cmpi eq, %arg2, %c0_i32 : i32
    %1 = arith.extui %0 : i1 to i32
    %c0_i32_0 = arith.constant 0 : i32
    %2 = arith.cmpi ne, %1, %c0_i32_0 : i32
    scf.if %2 {
      %c0_10 = arith.constant 0 : index
      %c0_11 = arith.constant 0 : index
      %12 = vector.load %arg5[%c0_10, %c0_11] : memref<16x128xf32, #tpu.memory_space<vmem>>, vector<16x128xf32>
      %c0_12 = arith.constant 0 : index
      %c0_13 = arith.constant 0 : index
      %13 = vector.load %arg7[%c0_12, %c0_13] : memref<16x128xf32, #tpu.memory_space<vmem>>, vector<16x128xf32>
      tpu.vector_store %arg7[%c0_12, %c0_13], %12 {strides = array<i32>} : memref<16x128xf32, #tpu.memory_space<vmem>>, vector<16x128xf32>,
    } else {
    }
    %c0 = arith.constant 0 : index
    %c0_1 = arith.constant 0 : index
    %3 = vector.load %arg7[%c0, %c0_1] : memref<16x128xf32, #tpu.memory_space<vmem>>, vector<16x128xf32>
    %c0_2 = arith.constant 0 : index
    %c0_3 = arith.constant 0 : index
    %4 = vector.load %arg3[%c0_2, %c0_3] : memref<16x128xbf16, #tpu.memory_space<vmem>>, vector<16x128xbf16>
    %c0_4 = arith.constant 0 : index
    %c0_5 = arith.constant 0 : index
    %5 = vector.load %arg4[%c0_4, %c0_5] : memref<128x128xbf16, #tpu.memory_space<vmem>>, vector<128x128xbf16>
    %cst = arith.constant dense<0.000000e+00> : vector<16x128xf32>
    %6 = tpu.matmul %4, %5, %cst {dimension_numbers = #tpu.dot_dimension_numbers<[1], [0], [0], [1], [0, 0, 1, 1], [], []>} : vector<16x128xbf16>, vector<128x128xbf16>, vector<16x128xf32> -> vector<16x128xf32>
    %7 = arith.addf %3, %6 : vector<16x128xf32>
    %c0_6 = arith.constant 0 : index
    %c0_7 = arith.constant 0 : index
    %8 = vector.load %arg7[%c0_6, %c0_7] : memref<16x128xf32, #tpu.memory_space<vmem>>, vector<16x128xf32>
    tpu.vector_store %arg7[%c0_6, %c0_7], %7 {strides = array<i32>} : memref<16x128xf32, #tpu.memory_space<vmem>>, vector<16x128xf32>,
    %c0_i32_8 = arith.constant 0 : i32
    %9 = arith.cmpi eq, %arg2, %c0_i32_8 : i32
    %10 = arith.extui %9 : i1 to i32
    %c0_i32_9 = arith.constant 0 : i32
    %11 = arith.cmpi ne, %10, %c0_i32_9 : i32
    scf.if %11 {
      %c0_10 = arith.constant 0 : index
      %c0_11 = arith.constant 0 : index
      %12 = vector.load %arg7[%c0_10, %c0_11] : memref<16x128xf32, #tpu.memory_space<vmem>>, vector<16x128xf32>
      %c0_12 = arith.constant 0 : index
      %c0_13 = arith.constant 0 : index
      %13 = vector.load %arg6[%c0_12, %c0_13] : memref<16x128xf32, #tpu.memory_space<vmem>>, vector<16x128xf32>
      tpu.vector_store %arg6[%c0_12, %c0_13], %12 {strides = array<i32>} : memref<16x128xf32, #tpu.memory_space<vmem>>, vector<16x128xf32>,
    } else {
    }
    return
  }
  func.func @transform_0(%arg0: i32, %arg1: i32, %arg2: i32) -> (i32, i32) {
    %c0_i32 = arith.constant 0 : i32
    return %arg0, %arg2 : i32, i32
  }
  func.func @transform_1(%arg0: i32, %arg1: i32, %arg2: i32) -> (i32, i32) {
    %c0_i32 = arith.constant 0 : i32
    return %arg2, %arg1 : i32, i32
  }
  func.func @transform_2(%arg0: i32, %arg1: i32, %arg2: i32) -> (i32, i32) {
    %c0_i32 = arith.constant 0 : i32
    return %arg0, %arg1 : i32, i32
  }
  func.func @transform_3(%arg0: i32, %arg1: i32, %arg2: i32) -> (i32, i32) {
    %c0_i32 = arith.constant 0 : i32
    return %arg0, %arg1 : i32, i32
  }
}

module attributes {stable_mosaic.version = 11 : i64} {
  func.func @_attention_kernel(%arg0: i32, %arg1: i32, %arg2: memref<1x1x8x32xbf16, #tpu.memory_space<vmem>>, %arg3: memref<1x1x8x32xbf16, #tpu.memory_space<vmem>>, %arg4: memref<1x1x8x32xbf16, #tpu.memory_space<vmem>>, %arg5: memref<8x32xf32, #tpu.memory_space<vmem>>, %arg6: memref<8x32xf32, #tpu.memory_space<vmem>>, %arg7: memref<1x1x8x32xbf16, #tpu.memory_space<vmem>>) attributes {dimension_semantics = [#tpu.dimension_semantics<parallel>, #tpu.dimension_semantics<parallel>], iteration_bounds = array<i64: 2, 4>, scalar_prefetch = 0 : i64, scratch_operands = 0 : i64, tpu.core_type = #tpu.core_type<tc>, window_params = [{transform_indices = @transform_0, window_bounds = array<i64: 1, 1, 8, 32>}, {transform_indices = @transform_1, window_bounds = array<i64: 1, 1, 8, 32>}, {transform_indices = @transform_2, window_bounds = array<i64: 1, 1, 8, 32>}, {pipeline_mode = #tpu.pipeline_mode<synchronous>, transform_indices = @transform_3, window_bounds = array<i64: 8, 32>}, {pipeline_mode = #tpu.pipeline_mode<synchronous>, transform_indices = @transform_4, window_bounds = array<i64: 8, 32>}, {transform_indices = @transform_5, window_bounds = array<i64: 1, 1, 8, 32>}]} {
    %c0 = arith.constant 0 : index
    %c0_0 = arith.constant 0 : index
    %0 = vector.load %arg5[%c0, %c0_0] : memref<8x32xf32, #tpu.memory_space<vmem>>, vector<8x32xf32>
    %c0_1 = arith.constant 0 : index
    %c0_2 = arith.constant 0 : index
    %1 = vector.load %arg6[%c0_1, %c0_2] : memref<8x32xf32, #tpu.memory_space<vmem>>, vector<8x32xf32>
    %c0_3 = arith.constant 0 : index
    %c0_4 = arith.constant 0 : index
    %c0_5 = arith.constant 0 : index
    %c0_6 = arith.constant 0 : index
    %2 = vector.load %arg2[%c0_3, %c0_4, %c0_5, %c0_6] : memref<1x1x8x32xbf16, #tpu.memory_space<vmem>>, vector<1x1x8x32xbf16>
    %3 = vector.shape_cast %2 : vector<1x1x8x32xbf16> to vector<8x32xbf16>
    %4 = arith.extf %3 : vector<8x32xbf16> to vector<8x32xf32>
    %c16_i32 = arith.constant 16 : i32
    %5 = tpu.dynamic_rotate %4 by %c16_i32 dim 1 : vector<8x32xf32>, i32 -> vector<8x32xf32>
    %6 = arith.mulf %4, %0 : vector<8x32xf32>
    %7 = arith.mulf %5, %1 : vector<8x32xf32>
    %8 = arith.addf %6, %7 : vector<8x32xf32>
    %cst = arith.constant 0.176776692 : f32
    %9 = vector.broadcast %cst : f32 to vector<8x32xf32>
    %10 = arith.mulf %8, %9 : vector<8x32xf32>
    %c0_7 = arith.constant 0 : index
    %c0_8 = arith.constant 0 : index
    %c0_9 = arith.constant 0 : index
    %c0_10 = arith.constant 0 : index
    %11 = vector.load %arg3[%c0_7, %c0_8, %c0_9, %c0_10] : memref<1x1x8x32xbf16, #tpu.memory_space<vmem>>, vector<1x1x8x32xbf16>
    %12 = vector.shape_cast %11 : vector<1x1x8x32xbf16> to vector<8x32xbf16>
    %13 = arith.extf %12 : vector<8x32xbf16> to vector<8x32xf32>
    %c16_i32_11 = arith.constant 16 : i32
    %14 = tpu.dynamic_rotate %13 by %c16_i32_11 dim 1 : vector<8x32xf32>, i32 -> vector<8x32xf32>
    %15 = arith.mulf %13, %0 : vector<8x32xf32>
    %16 = arith.mulf %14, %1 : vector<8x32xf32>
    %17 = arith.addf %15, %16 : vector<8x32xf32>
    %c0_12 = arith.constant 0 : index
    %c0_13 = arith.constant 0 : index
    %c0_14 = arith.constant 0 : index
    %c0_15 = arith.constant 0 : index
    %18 = vector.load %arg4[%c0_12, %c0_13, %c0_14, %c0_15] : memref<1x1x8x32xbf16, #tpu.memory_space<vmem>>, vector<1x1x8x32xbf16>
    %19 = vector.shape_cast %18 : vector<1x1x8x32xbf16> to vector<8x32xbf16>
    %20 = arith.truncf %10 : vector<8x32xf32> to vector<8x32xbf16>
    %21 = arith.truncf %17 : vector<8x32xf32> to vector<8x32xbf16>
    %cst_16 = arith.constant dense<0.000000e+00> : vector<8x8xf32>
    %22 = tpu.matmul %20, %21, %cst_16 {dimension_numbers = #tpu.dot_dimension_numbers<[1], [1], [0], [0], [0, 0, 1, 0], [], []>} : vector<8x32xbf16>, vector<8x32xbf16>, vector<8x8xf32> -> vector<8x8xf32>
    %23 = tpu.iota {dimensions = array<i32: 0>} : vector<8x8xi32>
    %24 = tpu.iota {dimensions = array<i32: 1>} : vector<8x8xi32>
    %25 = arith.cmpi sge, %23, %24 : vector<8x8xi32>
    %cst_17 = arith.constant -1.000000e+30 : f32
    %26 = vector.broadcast %cst_17 : f32 to vector<8x8xf32>
    %27 = arith.select %25, %22, %26 : vector<8x8xi1>, vector<8x8xf32>
    %cst_18 = arith.constant dense<0xFF800000> : vector<8xf32>
    %28 = vector.multi_reduction <maximumf>, %27, %cst_18 [1] : vector<8x8xf32> to vector<8xf32>
    %29 = vector.shape_cast %28 : vector<8xf32> to vector<8x1xf32>
    %30 = vector.broadcast %29 : vector<8x1xf32> to vector<8x8xf32>
    %31 = arith.subf %27, %30 : vector<8x8xf32>
    %32 = math.exp %31 : vector<8x8xf32>
    %cst_19 = arith.constant dense<0.000000e+00> : vector<8xf32>
    %33 = vector.multi_reduction <add>, %32, %cst_19 [1] : vector<8x8xf32> to vector<8xf32>
    %34 = vector.shape_cast %33 : vector<8xf32> to vector<8x1xf32>
    %35 = arith.truncf %32 : vector<8x8xf32> to vector<8x8xbf16>
    %cst_20 = arith.constant dense<0.000000e+00> : vector<8x32xf32>
    %36 = tpu.matmul %35, %19, %cst_20 {dimension_numbers = #tpu.dot_dimension_numbers<[1], [0], [0], [1], [0, 0, 1, 1], [], []>} : vector<8x8xbf16>, vector<8x32xbf16>, vector<8x32xf32> -> vector<8x32xf32>
    %37 = tpu.reciprocal %34 {approx = true} : vector<8x1xf32> -> vector<8x1xf32>
    %38 = vector.broadcast %37 : vector<8x1xf32> to vector<8x32xf32>
    %39 = arith.mulf %36, %38 : vector<8x32xf32>
    %40 = arith.truncf %39 : vector<8x32xf32> to vector<8x32xbf16>
    %c0_21 = arith.constant 0 : index
    %c0_22 = arith.constant 0 : index
    %c0_23 = arith.constant 0 : index
    %c0_24 = arith.constant 0 : index
    %41 = vector.load %arg7[%c0_21, %c0_22, %c0_23, %c0_24] : memref<1x1x8x32xbf16, #tpu.memory_space<vmem>>, vector<1x1x8x32xbf16>
    %42 = vector.shape_cast %41 : vector<1x1x8x32xbf16> to vector<8x32xbf16>
    %43 = vector.shape_cast %40 : vector<8x32xbf16> to vector<1x1x8x32xbf16>
    tpu.vector_store %arg7[%c0_21, %c0_22, %c0_23, %c0_24], %43 {strides = array<i32>} : memref<1x1x8x32xbf16, #tpu.memory_space<vmem>>, vector<1x1x8x32xbf16>,
    return
  }
  func.func @transform_0(%arg0: i32, %arg1: i32) -> (i32, i32, i32, i32) {
    %c0_i32 = arith.constant 0 : i32
    %c0_i32_0 = arith.constant 0 : i32
    %c0_i32_1 = arith.constant 0 : i32
    return %arg0, %arg1, %c0_i32, %c0_i32_0 : i32, i32, i32, i32
  }
  func.func @transform_1(%arg0: i32, %arg1: i32) -> (i32, i32, i32, i32) {
    %c0_i32 = arith.constant 0 : i32
    %c0_i32_0 = arith.constant 0 : i32
    %c0_i32_1 = arith.constant 0 : i32
    return %arg0, %arg1, %c0_i32, %c0_i32_0 : i32, i32, i32, i32
  }
  func.func @transform_2(%arg0: i32, %arg1: i32) -> (i32, i32, i32, i32) {
    %c0_i32 = arith.constant 0 : i32
    %c0_i32_0 = arith.constant 0 : i32
    %c0_i32_1 = arith.constant 0 : i32
    return %arg0, %arg1, %c0_i32, %c0_i32_0 : i32, i32, i32, i32
  }
  func.func @transform_3(%arg0: i32, %arg1: i32) -> (i32, i32) {
    %c0_i32 = arith.constant 0 : i32
    %c0_i32_0 = arith.constant 0 : i32
    %c0_i32_1 = arith.constant 0 : i32
    return %c0_i32, %c0_i32_0 : i32, i32
  }
  func.func @transform_4(%arg0: i32, %arg1: i32) -> (i32, i32) {
    %c0_i32 = arith.constant 0 : i32
    %c0_i32_0 = arith.constant 0 : i32
    %c0_i32_1 = arith.constant 0 : i32
    return %c0_i32, %c0_i32_0 : i32, i32
  }
  func.func @transform_5(%arg0: i32, %arg1: i32) -> (i32, i32, i32, i32) {
    %c0_i32 = arith.constant 0 : i32
    %c0_i32_0 = arith.constant 0 : i32
    %c0_i32_1 = arith.constant 0 : i32
    return %arg0, %arg1, %c0_i32, %c0_i32_0 : i32, i32, i32, i32
  }
}

module attributes {stable_mosaic.version = 11 : i64} {
  func.func @_mlp_swiglu_kernel(%arg0: i32, %arg1: i32, %arg2: i32, %arg3: memref<16x128xbf16, #tpu.memory_space<vmem>>, %arg4: memref<128x256xbf16, #tpu.memory_space<vmem>>, %arg5: memref<128x256xbf16, #tpu.memory_space<vmem>>, %arg6: memref<16x256xbf16, #tpu.memory_space<vmem>>, %arg7: memref<16x256xf32, #tpu.memory_space<vmem>>, %arg8: memref<16x256xf32, #tpu.memory_space<vmem>>) attributes {dimension_semantics = [#tpu.dimension_semantics<parallel>, #tpu.dimension_semantics<parallel>, #tpu.dimension_semantics<arbitrary>], iteration_bounds = array<i64: 1, 2, 1>, scalar_prefetch = 0 : i64, scratch_operands = 2 : i64, tpu.core_type = #tpu.core_type<tc>, window_params = [{transform_indices = @transform_0, window_bounds = array<i64: 16, 128>}, {transform_indices = @transform_1, window_bounds = array<i64: 128, 256>}, {transform_indices = @transform_2, window_bounds = array<i64: 128, 256>}, {transform_indices = @transform_3, window_bounds = array<i64: 16, 256>}]} {
    %c0_i32 = arith.constant 0 : i32
    %0 = arith.cmpi eq, %arg2, %c0_i32 : i32
    %1 = arith.extui %0 : i1 to i32
    %c0_i32_0 = arith.constant 0 : i32
    %2 = arith.cmpi ne, %1, %c0_i32_0 : i32
    scf.if %2 {
      %cst_17 = arith.constant 0.000000e+00 : f32
      %17 = vector.broadcast %cst_17 : f32 to vector<16x256xf32>
      %c0_18 = arith.constant 0 : index
      %c0_19 = arith.constant 0 : index
      %18 = vector.load %arg7[%c0_18, %c0_19] : memref<16x256xf32, #tpu.memory_space<vmem>>, vector<16x256xf32>
      tpu.vector_store %arg7[%c0_18, %c0_19], %17 {strides = array<i32>} : memref<16x256xf32, #tpu.memory_space<vmem>>, vector<16x256xf32>,
      %cst_20 = arith.constant 0.000000e+00 : f32
      %19 = vector.broadcast %cst_20 : f32 to vector<16x256xf32>
      %c0_21 = arith.constant 0 : index
      %c0_22 = arith.constant 0 : index
      %20 = vector.load %arg8[%c0_21, %c0_22] : memref<16x256xf32, #tpu.memory_space<vmem>>, vector<16x256xf32>
      tpu.vector_store %arg8[%c0_21, %c0_22], %19 {strides = array<i32>} : memref<16x256xf32, #tpu.memory_space<vmem>>, vector<16x256xf32>,
    } else {
    }
    %c0 = arith.constant 0 : index
    %c0_1 = arith.constant 0 : index
    %3 = vector.load %arg3[%c0, %c0_1] : memref<16x128xbf16, #tpu.memory_space<vmem>>, vector<16x128xbf16>
    %c0_2 = arith.constant 0 : index
    %c0_3 = arith.constant 0 : index
    %4 = vector.load %arg7[%c0_2, %c0_3] : memref<16x256xf32, #tpu.memory_space<vmem>>, vector<16x256xf32>
    %c0_4 = arith.constant 0 : index
    %c0_5 = arith.constant 0 : index
    %5 = vector.load %arg4[%c0_4, %c0_5] : memref<128x256xbf16, #tpu.memory_space<vmem>>, vector<128x256xbf16>
    %cst = arith.constant dense<0.000000e+00> : vector<16x256xf32>
    %6 = tpu.matmul %3, %5, %cst {dimension_numbers = #tpu.dot_dimension_numbers<[1], [0], [0], [1], [0, 0, 1, 1], [], []>} : vector<16x128xbf16>, vector<128x256xbf16>, vector<16x256xf32> -> vector<16x256xf32>
    %7 = arith.addf %4, %6 : vector<16x256xf32>
    %c0_6 = arith.constant 0 : index
    %c0_7 = arith.constant 0 : index
    %8 = vector.load %arg7[%c0_6, %c0_7] : memref<16x256xf32, #tpu.memory_space<vmem>>, vector<16x256xf32>
    tpu.vector_store %arg7[%c0_6, %c0_7], %7 {strides = array<i32>} : memref<16x256xf32, #tpu.memory_space<vmem>>, vector<16x256xf32>,
    %c0_8 = arith.constant 0 : index
    %c0_9 = arith.constant 0 : index
    %9 = vector.load %arg8[%c0_8, %c0_9] : memref<16x256xf32, #tpu.memory_space<vmem>>, vector<16x256xf32>
    %c0_10 = arith.constant 0 : index
    %c0_11 = arith.constant 0 : index
    %10 = vector.load %arg5[%c0_10, %c0_11] : memref<128x256xbf16, #tpu.memory_space<vmem>>, vector<128x256xbf16>
    %cst_12 = arith.constant dense<0.000000e+00> : vector<16x256xf32>
    %11 = tpu.matmul %3, %10, %cst_12 {dimension_numbers = #tpu.dot_dimension_numbers<[1], [0], [0], [1], [0, 0, 1, 1], [], []>} : vector<16x128xbf16>, vector<128x256xbf16>, vector<16x256xf32> -> vector<16x256xf32>
    %12 = arith.addf %9, %11 : vector<16x256xf32>
    %c0_13 = arith.constant 0 : index
    %c0_14 = arith.constant 0 : index
    %13 = vector.load %arg8[%c0_13, %c0_14] : memref<16x256xf32, #tpu.memory_space<vmem>>, vector<16x256xf32>
    tpu.vector_store %arg8[%c0_13, %c0_14], %12 {strides = array<i32>} : memref<16x256xf32, #tpu.memory_space<vmem>>, vector<16x256xf32>,
    %c0_i32_15 = arith.constant 0 : i32
    %14 = arith.cmpi eq, %arg2, %c0_i32_15 : i32
    %15 = arith.extui %14 : i1 to i32
    %c0_i32_16 = arith.constant 0 : i32
    %16 = arith.cmpi ne, %15, %c0_i32_16 : i32
    scf.if %16 {
      %c0_17 = arith.constant 0 : index
      %c0_18 = arith.constant 0 : index
      %17 = vector.load %arg7[%c0_17, %c0_18] : memref<16x256xf32, #tpu.memory_space<vmem>>, vector<16x256xf32>
      %18 = arith.negf %17 : vector<16x256xf32>
      %19 = math.exp %18 : vector<16x256xf32>
      %cst_19 = arith.constant 1.000000e+00 : f32
      %20 = vector.broadcast %cst_19 : f32 to vector<16x256xf32>
      %21 = arith.addf %20, %19 : vector<16x256xf32>
      %22 = arith.divf %20, %21 : vector<16x256xf32>
      %23 = arith.mulf %17, %22 : vector<16x256xf32>
      %c0_20 = arith.constant 0 : index
      %c0_21 = arith.constant 0 : index
      %24 = vector.load %arg8[%c0_20, %c0_21] : memref<16x256xf32, #tpu.memory_space<vmem>>, vector<16x256xf32>
      %25 = arith.mulf %23, %24 : vector<16x256xf32>
      %26 = arith.truncf %25 : vector<16x256xf32> to vector<16x256xbf16>
      %c0_22 = arith.constant 0 : index
      %c0_23 = arith.constant 0 : index
      %27 = vector.load %arg6[%c0_22, %c0_23] : memref<16x256xbf16, #tpu.memory_space<vmem>>, vector<16x256xbf16>
      tpu.vector_store %arg6[%c0_22, %c0_23], %26 {strides = array<i32>} : memref<16x256xbf16, #tpu.memory_space<vmem>>, vector<16x256xbf16>,
    } else {
    }
    return
  }
  func.func @transform_0(%arg0: i32, %arg1: i32, %arg2: i32) -> (i32, i32) {
    %c0_i32 = arith.constant 0 : i32
    return %arg0, %arg2 : i32, i32
  }
  func.func @transform_1(%arg0: i32, %arg1: i32, %arg2: i32) -> (i32, i32) {
    %c0_i32 = arith.constant 0 : i32
    return %arg2, %arg1 : i32, i32
  }
  func.func @transform_2(%arg0: i32, %arg1: i32, %arg2: i32) -> (i32, i32) {
    %c0_i32 = arith.constant 0 : i32
    return %arg2, %arg1 : i32, i32
  }
  func.func @transform_3(%arg0: i32, %arg1: i32, %arg2: i32) -> (i32, i32) {
    %c0_i32 = arith.constant 0 : i32
    return %arg0, %arg1 : i32, i32
  }
}

module attributes {stable_mosaic.version = 11 : i64} {
  func.func @_matmul_kernel(%arg0: i32, %arg1: i32, %arg2: i32, %arg3: memref<16x512xbf16, #tpu.memory_space<vmem>>, %arg4: memref<512x128xbf16, #tpu.memory_space<vmem>>, %arg5: memref<16x128xf32, #tpu.memory_space<vmem>>, %arg6: memref<16x128xf32, #tpu.memory_space<vmem>>, %arg7: memref<16x128xf32, #tpu.memory_space<vmem>>) attributes {dimension_semantics = [#tpu.dimension_semantics<parallel>, #tpu.dimension_semantics<parallel>, #tpu.dimension_semantics<arbitrary>], iteration_bounds = array<i64: 1, 1, 1>, scalar_prefetch = 0 : i64, scratch_operands = 1 : i64, tpu.core_type = #tpu.core_type<tc>, window_params = [{transform_indices = @transform_0, window_bounds = array<i64: 16, 512>}, {transform_indices = @transform_1, window_bounds = array<i64: 512, 128>}, {transform_indices = @transform_2, window_bounds = array<i64: 16, 128>}, {transform_indices = @transform_3, window_bounds = array<i64: 16, 128>}]} {
    %c0_i32 = arith.constant 0 : i32
    %0 = arith.cmpi eq, %arg2, %c0_i32 : i32
    %1 = arith.extui %0 : i1 to i32
    %c0_i32_0 = arith.constant 0 : i32
    %2 = arith.cmpi ne, %1, %c0_i32_0 : i32
    scf.if %2 {
      %c0_10 = arith.constant 0 : index
      %c0_11 = arith.constant 0 : index
      %12 = vector.load %arg5[%c0_10, %c0_11] : memref<16x128xf32, #tpu.memory_space<vmem>>, vector<16x128xf32>
      %c0_12 = arith.constant 0 : index
      %c0_13 = arith.constant 0 : index
      %13 = vector.load %arg7[%c0_12, %c0_13] : memref<16x128xf32, #tpu.memory_space<vmem>>, vector<16x128xf32>
      tpu.vector_store %arg7[%c0_12, %c0_13], %12 {strides = array<i32>} : memref<16x128xf32, #tpu.memory_space<vmem>>, vector<16x128xf32>,
    } else {
    }
    %c0 = arith.constant 0 : index
    %c0_1 = arith.constant 0 : index
    %3 = vector.load %arg7[%c0, %c0_1] : memref<16x128xf32, #tpu.memory_space<vmem>>, vector<16x128xf32>
    %c0_2 = arith.constant 0 : index
    %c0_3 = arith.constant 0 : index
    %4 = vector.load %arg3[%c0_2, %c0_3] : memref<16x512xbf16, #tpu.memory_space<vmem>>, vector<16x512xbf16>
    %c0_4 = arith.constant 0 : index
    %c0_5 = arith.constant 0 : index
    %5 = vector.load %arg4[%c0_4, %c0_5] : memref<512x128xbf16, #tpu.memory_space<vmem>>, vector<512x128xbf16>
    %cst = arith.constant dense<0.000000e+00> : vector<16x128xf32>
    %6 = tpu.matmul %4, %5, %cst {dimension_numbers = #tpu.dot_dimension_numbers<[1], [0], [0], [1], [0, 0, 1, 1], [], []>} : vector<16x512xbf16>, vector<512x128xbf16>, vector<16x128xf32> -> vector<16x128xf32>
    %7 = arith.addf %3, %6 : vector<16x128xf32>
    %c0_6 = arith.constant 0 : index
    %c0_7 = arith.constant 0 : index
    %8 = vector.load %arg7[%c0_6, %c0_7] : memref<16x128xf32, #tpu.memory_space<vmem>>, vector<16x128xf32>
    tpu.vector_store %arg7[%c0_6, %c0_7], %7 {strides = array<i32>} : memref<16x128xf32, #tpu.memory_space<vmem>>, vector<16x128xf32>,
    %c0_i32_8 = arith.constant 0 : i32
    %9 = arith.cmpi eq, %arg2, %c0_i32_8 : i32
    %10 = arith.extui %9 : i1 to i32
    %c0_i32_9 = arith.constant 0 : i32
    %11 = arith.cmpi ne, %10, %c0_i32_9 : i32
    scf.if %11 {
      %c0_10 = arith.constant 0 : index
      %c0_11 = arith.constant 0 : index
      %12 = vector.load %arg7[%c0_10, %c0_11] : memref<16x128xf32, #tpu.memory_space<vmem>>, vector<16x128xf32>
      %c0_12 = arith.constant 0 : index
      %c0_13 = arith.constant 0 : index
      %13 = vector.load %arg6[%c0_12, %c0_13] : memref<16x128xf32, #tpu.memory_space<vmem>>, vector<16x128xf32>
      tpu.vector_store %arg6[%c0_12, %c0_13], %12 {strides = array<i32>} : memref<16x128xf32, #tpu.memory_space<vmem>>, vector<16x128xf32>,
    } else {
    }
    return
  }
  func.func @transform_0(%arg0: i32, %arg1: i32, %arg2: i32) -> (i32, i32) {
    %c0_i32 = arith.constant 0 : i32
    return %arg0, %arg2 : i32, i32
  }
  func.func @transform_1(%arg0: i32, %arg1: i32, %arg2: i32) -> (i32, i32) {
    %c0_i32 = arith.constant 0 : i32
    return %arg2, %arg1 : i32, i32
  }
  func.func @transform_2(%arg0: i32, %arg1: i32, %arg2: i32) -> (i32, i32) {
    %c0_i32 = arith.constant 0 : i32
    return %arg0, %arg1 : i32, i32
  }
  func.func @transform_3(%arg0: i32, %arg1: i32, %arg2: i32) -> (i32, i32) {
    %c0_i32 = arith.constant 0 : i32
    return %arg0, %arg1 : i32, i32
  }
}

module attributes {stable_mosaic.version = 11 : i64} {
  func.func @_matmul_kernel(%arg0: i32, %arg1: i32, %arg2: i32, %arg3: memref<16x128xbf16, #tpu.memory_space<vmem>>, %arg4: memref<128x128xbf16, #tpu.memory_space<vmem>>, %arg5: memref<16x128xbf16, #tpu.memory_space<vmem>>, %arg6: memref<16x128xf32, #tpu.memory_space<vmem>>) attributes {dimension_semantics = [#tpu.dimension_semantics<parallel>, #tpu.dimension_semantics<parallel>, #tpu.dimension_semantics<arbitrary>], iteration_bounds = array<i64: 1, 3, 1>, scalar_prefetch = 0 : i64, scratch_operands = 1 : i64, tpu.core_type = #tpu.core_type<tc>, window_params = [{transform_indices = @transform_0, window_bounds = array<i64: 16, 128>}, {transform_indices = @transform_1, window_bounds = array<i64: 128, 128>}, {transform_indices = @transform_2, window_bounds = array<i64: 16, 128>}]} {
    %c0_i32 = arith.constant 0 : i32
    %0 = arith.cmpi eq, %arg2, %c0_i32 : i32
    %1 = arith.extui %0 : i1 to i32
    %c0_i32_0 = arith.constant 0 : i32
    %2 = arith.cmpi ne, %1, %c0_i32_0 : i32
    scf.if %2 {
      %cst_10 = arith.constant 0.000000e+00 : f32
      %12 = vector.broadcast %cst_10 : f32 to vector<16x128xf32>
      %c0_11 = arith.constant 0 : index
      %c0_12 = arith.constant 0 : index
      %13 = vector.load %arg6[%c0_11, %c0_12] : memref<16x128xf32, #tpu.memory_space<vmem>>, vector<16x128xf32>
      tpu.vector_store %arg6[%c0_11, %c0_12], %12 {strides = array<i32>} : memref<16x128xf32, #tpu.memory_space<vmem>>, vector<16x128xf32>,
    } else {
    }
    %c0 = arith.constant 0 : index
    %c0_1 = arith.constant 0 : index
    %3 = vector.load %arg6[%c0, %c0_1] : memref<16x128xf32, #tpu.memory_space<vmem>>, vector<16x128xf32>
    %c0_2 = arith.constant 0 : index
    %c0_3 = arith.constant 0 : index
    %4 = vector.load %arg3[%c0_2, %c0_3] : memref<16x128xbf16, #tpu.memory_space<vmem>>, vector<16x128xbf16>
    %c0_4 = arith.constant 0 : index
    %c0_5 = arith.constant 0 : index
    %5 = vector.load %arg4[%c0_4, %c0_5] : memref<128x128xbf16, #tpu.memory_space<vmem>>, vector<128x128xbf16>
    %cst = arith.constant dense<0.000000e+00> : vector<16x128xf32>
    %6 = tpu.matmul %4, %5, %cst {dimension_numbers = #tpu.dot_dimension_numbers<[1], [0], [0], [1], [0, 0, 1, 1], [], []>} : vector<16x128xbf16>, vector<128x128xbf16>, vector<16x128xf32> -> vector<16x128xf32>
    %7 = arith.addf %3, %6 : vector<16x128xf32>
    %c0_6 = arith.constant 0 : index
    %c0_7 = arith.constant 0 : index
    %8 = vector.load %arg6[%c0_6, %c0_7] : memref<16x128xf32, #tpu.memory_space<vmem>>, vector<16x128xf32>
    tpu.vector_store %arg6[%c0_6, %c0_7], %7 {strides = array<i32>} : memref<16x128xf32, #tpu.memory_space<vmem>>, vector<16x128xf32>,
    %c0_i32_8 = arith.constant 0 : i32
    %9 = arith.cmpi eq, %arg2, %c0_i32_8 : i32
    %10 = arith.extui %9 : i1 to i32
    %c0_i32_9 = arith.constant 0 : i32
    %11 = arith.cmpi ne, %10, %c0_i32_9 : i32
    scf.if %11 {
      %c0_10 = arith.constant 0 : index
      %c0_11 = arith.constant 0 : index
      %12 = vector.load %arg6[%c0_10, %c0_11] : memref<16x128xf32, #tpu.memory_space<vmem>>, vector<16x128xf32>
      %13 = arith.truncf %12 : vector<16x128xf32> to vector<16x128xbf16>
      %c0_12 = arith.constant 0 : index
      %c0_13 = arith.constant 0 : index
      %14 = vector.load %arg5[%c0_12, %c0_13] : memref<16x128xbf16, #tpu.memory_space<vmem>>, vector<16x128xbf16>
      tpu.vector_store %arg5[%c0_12, %c0_13], %13 {strides = array<i32>} : memref<16x128xbf16, #tpu.memory_space<vmem>>, vector<16x128xbf16>,
    } else {
    }
    return
  }
  func.func @transform_0(%arg0: i32, %arg1: i32, %arg2: i32) -> (i32, i32) {
    %c0_i32 = arith.constant 0 : i32
    return %arg0, %arg2 : i32, i32
  }
  func.func @transform_1(%arg0: i32, %arg1: i32, %arg2: i32) -> (i32, i32) {
    %c0_i32 = arith.constant 0 : i32
    return %arg2, %arg1 : i32, i32
  }
  func.func @transform_2(%arg0: i32, %arg1: i32, %arg2: i32) -> (i32, i32) {
    %c0_i32 = arith.constant 0 : i32
    return %arg0, %arg1 : i32, i32
  }
}

module attributes {stable_mosaic.version = 11 : i64} {
  func.func @_matmul_kernel(%arg0: i32, %arg1: i32, %arg2: i32, %arg3: memref<16x128xbf16, #tpu.memory_space<vmem>>, %arg4: memref<128x128xbf16, #tpu.memory_space<vmem>>, %arg5: memref<16x128xf32, #tpu.memory_space<vmem>>, %arg6: memref<16x128xf32, #tpu.memory_space<vmem>>, %arg7: memref<16x128xf32, #tpu.memory_space<vmem>>) attributes {dimension_semantics = [#tpu.dimension_semantics<parallel>, #tpu.dimension_semantics<parallel>, #tpu.dimension_semantics<arbitrary>], iteration_bounds = array<i64: 1, 1, 1>, scalar_prefetch = 0 : i64, scratch_operands = 1 : i64, tpu.core_type = #tpu.core_type<tc>, window_params = [{transform_indices = @transform_0, window_bounds = array<i64: 16, 128>}, {transform_indices = @transform_1, window_bounds = array<i64: 128, 128>}, {transform_indices = @transform_2, window_bounds = array<i64: 16, 128>}, {transform_indices = @transform_3, window_bounds = array<i64: 16, 128>}]} {
    %c0_i32 = arith.constant 0 : i32
    %0 = arith.cmpi eq, %arg2, %c0_i32 : i32
    %1 = arith.extui %0 : i1 to i32
    %c0_i32_0 = arith.constant 0 : i32
    %2 = arith.cmpi ne, %1, %c0_i32_0 : i32
    scf.if %2 {
      %c0_10 = arith.constant 0 : index
      %c0_11 = arith.constant 0 : index
      %12 = vector.load %arg5[%c0_10, %c0_11] : memref<16x128xf32, #tpu.memory_space<vmem>>, vector<16x128xf32>
      %c0_12 = arith.constant 0 : index
      %c0_13 = arith.constant 0 : index
      %13 = vector.load %arg7[%c0_12, %c0_13] : memref<16x128xf32, #tpu.memory_space<vmem>>, vector<16x128xf32>
      tpu.vector_store %arg7[%c0_12, %c0_13], %12 {strides = array<i32>} : memref<16x128xf32, #tpu.memory_space<vmem>>, vector<16x128xf32>,
    } else {
    }
    %c0 = arith.constant 0 : index
    %c0_1 = arith.constant 0 : index
    %3 = vector.load %arg7[%c0, %c0_1] : memref<16x128xf32, #tpu.memory_space<vmem>>, vector<16x128xf32>
    %c0_2 = arith.constant 0 : index
    %c0_3 = arith.constant 0 : index
    %4 = vector.load %arg3[%c0_2, %c0_3] : memref<16x128xbf16, #tpu.memory_space<vmem>>, vector<16x128xbf16>
    %c0_4 = arith.constant 0 : index
    %c0_5 = arith.constant 0 : index
    %5 = vector.load %arg4[%c0_4, %c0_5] : memref<128x128xbf16, #tpu.memory_space<vmem>>, vector<128x128xbf16>
    %cst = arith.constant dense<0.000000e+00> : vector<16x128xf32>
    %6 = tpu.matmul %4, %5, %cst {dimension_numbers = #tpu.dot_dimension_numbers<[1], [0], [0], [1], [0, 0, 1, 1], [], []>} : vector<16x128xbf16>, vector<128x128xbf16>, vector<16x128xf32> -> vector<16x128xf32>
    %7 = arith.addf %3, %6 : vector<16x128xf32>
    %c0_6 = arith.constant 0 : index
    %c0_7 = arith.constant 0 : index
    %8 = vector.load %arg7[%c0_6, %c0_7] : memref<16x128xf32, #tpu.memory_space<vmem>>, vector<16x128xf32>
    tpu.vector_store %arg7[%c0_6, %c0_7], %7 {strides = array<i32>} : memref<16x128xf32, #tpu.memory_space<vmem>>, vector<16x128xf32>,
    %c0_i32_8 = arith.constant 0 : i32
    %9 = arith.cmpi eq, %arg2, %c0_i32_8 : i32
    %10 = arith.extui %9 : i1 to i32
    %c0_i32_9 = arith.constant 0 : i32
    %11 = arith.cmpi ne, %10, %c0_i32_9 : i32
    scf.if %11 {
      %c0_10 = arith.constant 0 : index
      %c0_11 = arith.constant 0 : index
      %12 = vector.load %arg7[%c0_10, %c0_11] : memref<16x128xf32, #tpu.memory_space<vmem>>, vector<16x128xf32>
      %c0_12 = arith.constant 0 : index
      %c0_13 = arith.constant 0 : index
      %13 = vector.load %arg6[%c0_12, %c0_13] : memref<16x128xf32, #tpu.memory_space<vmem>>, vector<16x128xf32>
      tpu.vector_store %arg6[%c0_12, %c0_13], %12 {strides = array<i32>} : memref<16x128xf32, #tpu.memory_space<vmem>>, vector<16x128xf32>,
    } else {
    }
    return
  }
  func.func @transform_0(%arg0: i32, %arg1: i32, %arg2: i32) -> (i32, i32) {
    %c0_i32 = arith.constant 0 : i32
    return %arg0, %arg2 : i32, i32
  }
  func.func @transform_1(%arg0: i32, %arg1: i32, %arg2: i32) -> (i32, i32) {
    %c0_i32 = arith.constant 0 : i32
    return %arg2, %arg1 : i32, i32
  }
  func.func @transform_2(%arg0: i32, %arg1: i32, %arg2: i32) -> (i32, i32) {
    %c0_i32 = arith.constant 0 : i32
    return %arg0, %arg1 : i32, i32
  }
  func.func @transform_3(%arg0: i32, %arg1: i32, %arg2: i32) -> (i32, i32) {
    %c0_i32 = arith.constant 0 : i32
    return %arg0, %arg1 : i32, i32
  }
}

module attributes {stable_mosaic.version = 11 : i64} {
  func.func @_mlp_swiglu_kernel(%arg0: i32, %arg1: i32, %arg2: i32, %arg3: memref<16x128xbf16, #tpu.memory_space<vmem>>, %arg4: memref<128x256xbf16, #tpu.memory_space<vmem>>, %arg5: memref<128x256xbf16, #tpu.memory_space<vmem>>, %arg6: memref<16x256xbf16, #tpu.memory_space<vmem>>, %arg7: memref<16x256xf32, #tpu.memory_space<vmem>>, %arg8: memref<16x256xf32, #tpu.memory_space<vmem>>) attributes {dimension_semantics = [#tpu.dimension_semantics<parallel>, #tpu.dimension_semantics<parallel>, #tpu.dimension_semantics<arbitrary>], iteration_bounds = array<i64: 1, 2, 1>, scalar_prefetch = 0 : i64, scratch_operands = 2 : i64, tpu.core_type = #tpu.core_type<tc>, window_params = [{transform_indices = @transform_0, window_bounds = array<i64: 16, 128>}, {transform_indices = @transform_1, window_bounds = array<i64: 128, 256>}, {transform_indices = @transform_2, window_bounds = array<i64: 128, 256>}, {transform_indices = @transform_3, window_bounds = array<i64: 16, 256>}]} {
    %c0_i32 = arith.constant 0 : i32
    %0 = arith.cmpi eq, %arg2, %c0_i32 : i32
    %1 = arith.extui %0 : i1 to i32
    %c0_i32_0 = arith.constant 0 : i32
    %2 = arith.cmpi ne, %1, %c0_i32_0 : i32
    scf.if %2 {
      %cst_17 = arith.constant 0.000000e+00 : f32
      %17 = vector.broadcast %cst_17 : f32 to vector<16x256xf32>
      %c0_18 = arith.constant 0 : index
      %c0_19 = arith.constant 0 : index
      %18 = vector.load %arg7[%c0_18, %c0_19] : memref<16x256xf32, #tpu.memory_space<vmem>>, vector<16x256xf32>
      tpu.vector_store %arg7[%c0_18, %c0_19], %17 {strides = array<i32>} : memref<16x256xf32, #tpu.memory_space<vmem>>, vector<16x256xf32>,
      %cst_20 = arith.constant 0.000000e+00 : f32
      %19 = vector.broadcast %cst_20 : f32 to vector<16x256xf32>
      %c0_21 = arith.constant 0 : index
      %c0_22 = arith.constant 0 : index
      %20 = vector.load %arg8[%c0_21, %c0_22] : memref<16x256xf32, #tpu.memory_space<vmem>>, vector<16x256xf32>
      tpu.vector_store %arg8[%c0_21, %c0_22], %19 {strides = array<i32>} : memref<16x256xf32, #tpu.memory_space<vmem>>, vector<16x256xf32>,
    } else {
    }
    %c0 = arith.constant 0 : index
    %c0_1 = arith.constant 0 : index
    %3 = vector.load %arg3[%c0, %c0_1] : memref<16x128xbf16, #tpu.memory_space<vmem>>, vector<16x128xbf16>
    %c0_2 = arith.constant 0 : index
    %c0_3 = arith.constant 0 : index
    %4 = vector.load %arg7[%c0_2, %c0_3] : memref<16x256xf32, #tpu.memory_space<vmem>>, vector<16x256xf32>
    %c0_4 = arith.constant 0 : index
    %c0_5 = arith.constant 0 : index
    %5 = vector.load %arg4[%c0_4, %c0_5] : memref<128x256xbf16, #tpu.memory_space<vmem>>, vector<128x256xbf16>
    %cst = arith.constant dense<0.000000e+00> : vector<16x256xf32>
    %6 = tpu.matmul %3, %5, %cst {dimension_numbers = #tpu.dot_dimension_numbers<[1], [0], [0], [1], [0, 0, 1, 1], [], []>} : vector<16x128xbf16>, vector<128x256xbf16>, vector<16x256xf32> -> vector<16x256xf32>
    %7 = arith.addf %4, %6 : vector<16x256xf32>
    %c0_6 = arith.constant 0 : index
    %c0_7 = arith.constant 0 : index
    %8 = vector.load %arg7[%c0_6, %c0_7] : memref<16x256xf32, #tpu.memory_space<vmem>>, vector<16x256xf32>
    tpu.vector_store %arg7[%c0_6, %c0_7], %7 {strides = array<i32>} : memref<16x256xf32, #tpu.memory_space<vmem>>, vector<16x256xf32>,
    %c0_8 = arith.constant 0 : index
    %c0_9 = arith.constant 0 : index
    %9 = vector.load %arg8[%c0_8, %c0_9] : memref<16x256xf32, #tpu.memory_space<vmem>>, vector<16x256xf32>
    %c0_10 = arith.constant 0 : index
    %c0_11 = arith.constant 0 : index
    %10 = vector.load %arg5[%c0_10, %c0_11] : memref<128x256xbf16, #tpu.memory_space<vmem>>, vector<128x256xbf16>
    %cst_12 = arith.constant dense<0.000000e+00> : vector<16x256xf32>
    %11 = tpu.matmul %3, %10, %cst_12 {dimension_numbers = #tpu.dot_dimension_numbers<[1], [0], [0], [1], [0, 0, 1, 1], [], []>} : vector<16x128xbf16>, vector<128x256xbf16>, vector<16x256xf32> -> vector<16x256xf32>
    %12 = arith.addf %9, %11 : vector<16x256xf32>
    %c0_13 = arith.constant 0 : index
    %c0_14 = arith.constant 0 : index
    %13 = vector.load %arg8[%c0_13, %c0_14] : memref<16x256xf32, #tpu.memory_space<vmem>>, vector<16x256xf32>
    tpu.vector_store %arg8[%c0_13, %c0_14], %12 {strides = array<i32>} : memref<16x256xf32, #tpu.memory_space<vmem>>, vector<16x256xf32>,
    %c0_i32_15 = arith.constant 0 : i32
    %14 = arith.cmpi eq, %arg2, %c0_i32_15 : i32
    %15 = arith.extui %14 : i1 to i32
    %c0_i32_16 = arith.constant 0 : i32
    %16 = arith.cmpi ne, %15, %c0_i32_16 : i32
    scf.if %16 {
      %c0_17 = arith.constant 0 : index
      %c0_18 = arith.constant 0 : index
      %17 = vector.load %arg7[%c0_17, %c0_18] : memref<16x256xf32, #tpu.memory_space<vmem>>, vector<16x256xf32>
      %18 = arith.negf %17 : vector<16x256xf32>
      %19 = math.exp %18 : vector<16x256xf32>
      %cst_19 = arith.constant 1.000000e+00 : f32
      %20 = vector.broadcast %cst_19 : f32 to vector<16x256xf32>
      %21 = arith.addf %20, %19 : vector<16x256xf32>
      %22 = arith.divf %20, %21 : vector<16x256xf32>
      %23 = arith.mulf %17, %22 : vector<16x256xf32>
      %c0_20 = arith.constant 0 : index
      %c0_21 = arith.constant 0 : index
      %24 = vector.load %arg8[%c0_20, %c0_21] : memref<16x256xf32, #tpu.memory_space<vmem>>, vector<16x256xf32>
      %25 = arith.mulf %23, %24 : vector<16x256xf32>
      %26 = arith.truncf %25 : vector<16x256xf32> to vector<16x256xbf16>
      %c0_22 = arith.constant 0 : index
      %c0_23 = arith.constant 0 : index
      %27 = vector.load %arg6[%c0_22, %c0_23] : memref<16x256xbf16, #tpu.memory_space<vmem>>, vector<16x256xbf16>
      tpu.vector_store %arg6[%c0_22, %c0_23], %26 {strides = array<i32>} : memref<16x256xbf16, #tpu.memory_space<vmem>>, vector<16x256xbf16>,
    } else {
    }
    return
  }
  func.func @transform_0(%arg0: i32, %arg1: i32, %arg2: i32) -> (i32, i32) {
    %c0_i32 = arith.constant 0 : i32
    return %arg0, %arg2 : i32, i32
  }
  func.func @transform_1(%arg0: i32, %arg1: i32, %arg2: i32) -> (i32, i32) {
    %c0_i32 = arith.constant 0 : i32
    return %arg2, %arg1 : i32, i32
  }
  func.func @transform_2(%arg0: i32, %arg1: i32, %arg2: i32) -> (i32, i32) {
    %c0_i32 = arith.constant 0 : i32
    return %arg2, %arg1 : i32, i32
  }
  func.func @transform_3(%arg0: i32, %arg1: i32, %arg2: i32) -> (i32, i32) {
    %c0_i32 = arith.constant 0 : i32
    return %arg0, %arg1 : i32, i32
  }
}

module attributes {stable_mosaic.version = 11 : i64} {
  func.func @_matmul_kernel(%arg0: i32, %arg1: i32, %arg2: i32, %arg3: memref<16x128xbf16, #tpu.memory_space<vmem>>, %arg4: memref<128x256xbf16, #tpu.memory_space<vmem>>, %arg5: memref<16x256xf32, #tpu.memory_space<vmem>>, %arg6: memref<16x256xf32, #tpu.memory_space<vmem>>) attributes {dimension_semantics = [#tpu.dimension_semantics<parallel>, #tpu.dimension_semantics<parallel>, #tpu.dimension_semantics<arbitrary>], iteration_bounds = array<i64: 1, 1, 1>, scalar_prefetch = 0 : i64, scratch_operands = 1 : i64, tpu.core_type = #tpu.core_type<tc>, window_params = [{transform_indices = @transform_0, window_bounds = array<i64: 16, 128>}, {transform_indices = @transform_1, window_bounds = array<i64: 128, 256>}, {transform_indices = @transform_2, window_bounds = array<i64: 16, 256>}]} {
    %c0_i32 = arith.constant 0 : i32
    %0 = arith.cmpi eq, %arg2, %c0_i32 : i32
    %1 = arith.extui %0 : i1 to i32
    %c0_i32_0 = arith.constant 0 : i32
    %2 = arith.cmpi ne, %1, %c0_i32_0 : i32
    scf.if %2 {
      %cst_10 = arith.constant 0.000000e+00 : f32
      %12 = vector.broadcast %cst_10 : f32 to vector<16x256xf32>
      %c0_11 = arith.constant 0 : index
      %c0_12 = arith.constant 0 : index
      %13 = vector.load %arg6[%c0_11, %c0_12] : memref<16x256xf32, #tpu.memory_space<vmem>>, vector<16x256xf32>
      tpu.vector_store %arg6[%c0_11, %c0_12], %12 {strides = array<i32>} : memref<16x256xf32, #tpu.memory_space<vmem>>, vector<16x256xf32>,
    } else {
    }
    %c0 = arith.constant 0 : index
    %c0_1 = arith.constant 0 : index
    %3 = vector.load %arg6[%c0, %c0_1] : memref<16x256xf32, #tpu.memory_space<vmem>>, vector<16x256xf32>
    %c0_2 = arith.constant 0 : index
    %c0_3 = arith.constant 0 : index
    %4 = vector.load %arg3[%c0_2, %c0_3] : memref<16x128xbf16, #tpu.memory_space<vmem>>, vector<16x128xbf16>
    %c0_4 = arith.constant 0 : index
    %c0_5 = arith.constant 0 : index
    %5 = vector.load %arg4[%c0_4, %c0_5] : memref<128x256xbf16, #tpu.memory_space<vmem>>, vector<128x256xbf16>
    %cst = arith.constant dense<0.000000e+00> : vector<16x256xf32>
    %6 = tpu.matmul %4, %5, %cst {dimension_numbers = #tpu.dot_dimension_numbers<[1], [0], [0], [1], [0, 0, 1, 1], [], []>} : vector<16x128xbf16>, vector<128x256xbf16>, vector<16x256xf32> -> vector<16x256xf32>
    %7 = arith.addf %3, %6 : vector<16x256xf32>
    %c0_6 = arith.constant 0 : index
    %c0_7 = arith.constant 0 : index
    %8 = vector.load %arg6[%c0_6, %c0_7] : memref<16x256xf32, #tpu.memory_space<vmem>>, vector<16x256xf32>
    tpu.vector_store %arg6[%c0_6, %c0_7], %7 {strides = array<i32>} : memref<16x256xf32, #tpu.memory_space<vmem>>, vector<16x256xf32>,
    %c0_i32_8 = arith.constant 0 : i32
    %9 = arith.cmpi eq, %arg2, %c0_i32_8 : i32
    %10 = arith.extui %9 : i1 to i32
    %c0_i32_9 = arith.constant 0 : i32
    %11 = arith.cmpi ne, %10, %c0_i32_9 : i32
    scf.if %11 {
      %c0_10 = arith.constant 0 : index
      %c0_11 = arith.constant 0 : index
      %12 = vector.load %arg6[%c0_10, %c0_11] : memref<16x256xf32, #tpu.memory_space<vmem>>, vector<16x256xf32>
      %c0_12 = arith.constant 0 : index
      %c0_13 = arith.constant 0 : index
      %13 = vector.load %arg5[%c0_12, %c0_13] : memref<16x256xf32, #tpu.memory_space<vmem>>, vector<16x256xf32>
      tpu.vector_store %arg5[%c0_12, %c0_13], %12 {strides = array<i32>} : memref<16x256xf32, #tpu.memory_space<vmem>>, vector<16x256xf32>,
    } else {
    }
    return
  }
  func.func @transform_0(%arg0: i32, %arg1: i32, %arg2: i32) -> (i32, i32) {
    %c0_i32 = arith.constant 0 : i32
    return %arg0, %arg2 : i32, i32
  }
  func.func @transform_1(%arg0: i32, %arg1: i32, %arg2: i32) -> (i32, i32) {
    %c0_i32 = arith.constant 0 : i32
    return %arg2, %arg1 : i32, i32
  }
  func.func @transform_2(%arg0: i32, %arg1: i32, %arg2: i32) -> (i32, i32) {
    %c0_i32 = arith.constant 0 : i32
    return %arg0, %arg1 : i32, i32
  }
}

</mosaic_0001>

<bundles_post_ra>
// kernel: llama_forward.16
= control target key start
LH: loop header
LB: loop body
LE: loop exit
PB: predicated region body
PF: predicated region fallthrough
CT: control target
= control target key end

     0   :  { %v79_v4 = vmov 128.0   ;;  %s107_s0 = inlined_call_operand.vmem [shape: f32[16,128], index: 0, kind: input, shape index: {}]   ;;  %s108_s1 = inlined_call_operand.vmem [shape: f32[1,128], index: 1, kind: input, shape index: {}]   ;;  %s109_s2 = inlined_call_operand.vmem [shape: bf16[16,128], index: 2, kind: output, shape index: {}]  }
   0x1   :  { %v11_v0 = vld [vmem:[%s107_s0] sm:$0xff]  ;;  %v12_v2 = vld [vmem:[%s107_s0 + $0x8] sm:$0xff]  ;;  %73 = vrcp.f32 %v79_v4 }
   0x2   :  { %v13_v1 = vmul.f32 %v11_v0, %v11_v0  ;;  %v14_v3 = vmul.f32 %v12_v2, %v12_v2  ;;  %v72_v30 = vld [vmem:[%s108_s1] ss:$0 sm:$0xff] }
   0x4   :  { %15 = vadd.xlane.f32.xlu0 %v13_v1 }
   0x7   :  { %v74_v5 = vpop.eup %73 }
   0x8   :  { %v20_v6 = vmul.f32 128.0, %v74_v5  ;;  %vm24_vm0 = vweird.f32 %v74_v5 }
   0xa   :  { %v21_v7 = vsub.f32 1.0, %v20_v6 }
   0xc   :  { %17 = vadd.xlane.f32.xlu0 %v14_v3  ;;  %v22_v8 = vmul.f32 %v74_v5, %v21_v7 }
   0xe   :  { %v23_v9 = vadd.f32 %v74_v5, %v22_v8 }
  0x10   :  { %v25_v10 = vsel %vm24_vm0, %v74_v5, %v23_v9 }
  0x77   :  { %v16_v11 = vpop.xlane.xlu0 %15 }
  0x78   :  { %v26_v12 = vmul.f32 %v25_v10, %v16_v11 }
  0x7a   :  { %v29_v13 = vadd.f32 1e-05, %v26_v12 }
  0x7c   :  { %75 = vrsqrt.f32 %v29_v13  ;;  %vm37_vm2 = vweird.f32 %v29_v13 }
  0x7f   :  { %v18_v14 = vpop.xlane.xlu0 %17 }
  0x80   :  { %v27_v15 = vmul.f32 %v25_v10, %v18_v14 }
  0x82   :  { %v76_v16 = vpop.eup %75  ;;  %v30_v17 = vadd.f32 1e-05, %v27_v15 }
  0x83   :  { %v32_v18 = vmul.f32 %v76_v16, %v29_v13  ;;  %vm38_vm1 = vweird.f32 %v76_v16 }
  0x84   :  { %77 = vrsqrt.f32 %v30_v17  ;;  %vm39_vm3 = vmor %vm37_vm2, %vm38_vm1  ;;  %vm47_vm5 = vweird.f32 %v30_v17 }
  0x85   :  { %v33_v19 = vmul.f32 %v76_v16, %v32_v18 }
  0x87   :  { %v34_v20 = vmul.f32 0.5, %v33_v19 }
  0x89   :  { %v35_v21 = vsub.f32 1.5, %v34_v20 }
  0x8a   :  { %v78_v22 = vpop.eup %77 }
  0x8b   :  { %v42_v23 = vmul.f32 %v78_v22, %v30_v17  ;;  %v36_v24 = vmul.f32 %v76_v16, %v35_v21  ;;  %vm48_vm4 = vweird.f32 %v78_v22 }
  0x8c   :  { %vm49_vm6 = vmor %vm47_vm5, %vm48_vm4 }
  0x8d   :  { %v43_v25 = vmul.f32 %v78_v22, %v42_v23  ;;  %v40_v27 = vsel %vm39_vm3, %v76_v16, %v36_v24 }
  0x8e   :  { %v51_v31 = vmul.f32 %v40_v27, %v11_v0 }
  0x8f   :  { %v44_v26 = vmul.f32 0.5, %v43_v25 }
  0x90   :  { %v56_v34 = vmul.f32 %v72_v30, %v51_v31 }
  0x91   :  { %v45_v28 = vsub.f32 1.5, %v44_v26 }
  0x93   :  { %v46_v29 = vmul.f32 %v78_v22, %v45_v28 }
  0x95   :  { %v50_v32 = vsel %vm49_vm6, %v78_v22, %v46_v29 }
  0x96   :  { %v52_v33 = vmul.f32 %v50_v32, %v12_v2 }
  0x98   :  { %v57_v35 = vmul.f32 %v72_v30, %v52_v33 }
  0x9a   :  { %v69_v36 = vpack.c.bf16 %v57_v35, %v56_v34 }
  0x9c   :  { %70 = vst [vmem:[%s109_s2] sm:$0xff] %v69_v36  }

// kernel: llama_forward.19
= control target key start
LH: loop header
LB: loop body
LE: loop exit
PB: predicated region body
PF: predicated region fallthrough
CT: control target
= control target key end

     0   :  { %8 = vsyncpa [#allocation4], 0  ;;  %s216_s15 = smov [#allocation3]   ;;  %s217_s17 = smov 64   ;;  %s257_s0 = inlined_call_operand.vmem [shape: bf16[16,128], index: 0, kind: input, shape index: {}]   ;;  %s258_s1 = inlined_call_operand.hbm [shape: bf16[128,128], index: 1, kind: input, shape index: {}]   ;;  %s259_s2 = inlined_call_operand.vmem [shape: f32[16,128], index: 2, kind: input, shape index: {}]   ;;  %s260_s3 = inlined_call_operand.vmem [shape: f32[16,128], index: 3, kind: output, shape index: {}]  }
   0x1   :  { %s15_s14 = sshll.u32 %s258_s1, 4  ;;  %s17_s16 = sshll.u32 %s216_s15, 4  ;;  %s16_s14 = int_to_ptr.hbm [resolvable:$true] %s15_s14  ;;  %s18_s16 = int_to_ptr.vmem [resolvable:$true] %s17_s16 }
   0x2   :  { %s218_s18 = smov 4  }
   0x3   :  { %23 = dma.hbm_to_vmem [thread:$0]  %s16_s14, 1024, %s18_s16, [#allocation4], %s217_s17, %s217_s17, %s218_s18  }
   0x4   :  { %214 = dma.done.wait [#allocation4], 1024  }
   0x5   :  { %215 = vsyncadd [#allocation4], 4294966272  ;;  %v186_v0 = vld [vmem:[#allocation3 + $0x38] sm:$0xff]  ;;  %v185_v1 = vld [vmem:[#allocation3 + $0x30] sm:$0xff] }
   0x6   :  { %112 = vmatpush.bf16.msra.mxu0 %v186_v0  ;;  %v184_v2 = vld [vmem:[#allocation3 + $0x28] sm:$0xff]  ;;  %v183_v3 = vld [vmem:[#allocation3 + $0x20] sm:$0xff]  ;;  %v182_v4 = vld [vmem:[#allocation3 + $0x18] sm:$0xff] }
   0x7   :  { %v181_v5 = vld [vmem:[#allocation3 + $0x10] sm:$0xff]  ;;  %v180_v6 = vld [vmem:[#allocation3 + $0x8] sm:$0xff]  ;;  %v179_v7 = vld [vmem:[#allocation3] sm:$0xff] }
   0x8   :  { %v178_v8 = vld [vmem:[%s257_s0] sm:$0xff]  ;;  %v35_v12 = vld [vmem:[%s259_s2 + $0x8] sm:$0xff] }
   0x9   :  { %v34_v9 = vld [vmem:[%s259_s2] sm:$0xff] }
   0xa   :  { %113 = vmatpush.bf16.msra.mxu0 %v185_v1 }
   0xe   :  { %114 = vmatpush.bf16.msra.mxu0 %v184_v2 }
  0x12   :  { %115 = vmatpush.bf16.msra.mxu0 %v183_v3 }
  0x16   :  { %116 = vmatpush.bf16.msra.mxu0 %v182_v4 }
  0x1a   :  { %117 = vmatpush.bf16.msra.mxu0 %v181_v5 }
  0x1e   :  { %118 = vmatpush.bf16.msra.mxu0 %v180_v6 }
  0x22   :  { %119 = vmatpush.bf16.msra.mxu0 %v179_v7 }
  0x25   :  { %120 = vmatmul.bf16.vlgmr.msra.gmra.mxu0 %v178_v8 }
  0xa2   :  { %v121_v10 = vpop.f32.mrf.mxu0 }
  0xa3   :  { %v126_v11 = vadd.f32 %v121_v10, %v34_v9 }
  0xa5   :  { %135 = vst [vmem:[%s260_s3] sm:$0xff] %v126_v11 }
  0xaa   :  { %v123_v13 = vpop.f32.mrf.mxu0 }
  0xab   :  { %v127_v14 = vadd.f32 %v123_v13, %v35_v12 }
  0xad   :  { %136 = vst [vmem:[%s260_s3 + $0x8] sm:$0xff] %v127_v14 }
  0xae   :  { %141 = vsyncpa [#allocation4], 1 }

// kernel: llama_forward.17
= control target key start
LH: loop header
LB: loop body
LE: loop exit
PB: predicated region body
PF: predicated region fallthrough
CT: control target
= control target key end

     0   :  { %7 = vsyncpa [#allocation4], 0  ;;  %s797_s0 = inlined_call_operand.vmem [shape: bf16[16,128], index: 0, kind: input, shape index: {}]   ;;  %s798_s1 = inlined_call_operand.hbm [shape: bf16[128,384], index: 1, kind: input, shape index: {}]   ;;  %s799_s2 = inlined_call_operand.vmem [shape: bf16[16,384], index: 2, kind: output, shape index: {}]  }
   0x1   :  { %9 = vsyncpa [#allocation4 + $0x1], 0  ;;  %s701_s9 = smov 0   ;;  %s703_s10 = smov 0  }
   0x2   :  { %s705_s11 = smov 0   ;;  %s707_s12 = smov 0  }
   0x3   :  { %s709_s13 = smov 0   ;;  %s711_s14 = smov 0  }
   0x4 LB: > { %s479_s15 = sadd.s32 4294967295, %s681_s14   ;;  %s30_s16 = sadd.s32 1, %s677_s13  ;;  %s681_s14 = sphi %s711_s14, %s15_s14   ;;  %s677_s13 = sphi %s709_s13, %s807_s13   ;;  %s673_s12 = sphi %s707_s12, %s806_s12   ;;  %s669_s11 = sphi %s705_s11, %s805_s11   ;;  %s665_s10 = sphi %s703_s10, %s804_s10   ;;  %s661_s9 = sphi %s701_s9, %s803_s9  }
   0x5   : > { %p32_p0 = scmp.ge.s32.totalorder %s30_s16, 3  ;;  %s71_s17 = sadd.s32 1, %s669_s11 }
   0x6   : > { %p78_p1 = scmp.ne.s32.totalorder %s669_s11, %s665_s10  ;;  %p79_p2 = scmp.eq.s32.totalorder %s681_s14, 0 }
   0x7   : > { %s809_s16 = smov (%p32_p0, %s30_s16), 0  ;;  %p84_p4 = scmp.ne.s32.totalorder %s665_s10, %s661_s9 }
   0x8   : > { %p737_p3 = por %p79_p2, %p78_p1  ;;  %s67_s19 = ssub.s32 %s677_s13, %s809_s16 }
   0x9   : > { %p85_p5 = scmp.eq.s32.totalorder %s479_s15, 0  ;;  %p69_p6 = scmp.eq.s32.totalorder %s67_s19, 0 }
   0xa   : > { %p110_p7 = scmp.eq.s32.totalorder %s479_s15, 2  ;;  %p549_p10 = scmp.lt.s32.totalorder %s681_s14, 3 }
   0xb   : > { %p744_p8 = por %p85_p5, %p84_p4  ;;  %s148_s23 = sand.u32 1, %s669_s11  }
   0xc   : > { %s749_s21 = scalar_select %p69_p6, %s669_s11, %s71_s17  }
   0xd   : > { %p751_p9 = por %p110_p7, %p78_p1  ;;  %s485_s24 = sshll.u32 %s677_s13, 2 }
   0xe   : > { %s484_s25 = sshll.u32 %s148_s23, 6  ;;  %s159_s28 = scalar_lea.hbm %s798_s1, %s485_s24 }
   0xf   : > { %s160_s29 = sshll.u32 %s159_s28, 4  ;;  %s152_s30 = scalar_lea.vmem [#allocation3], %s484_s25  ;;  %s161_s29 = int_to_ptr.hbm [resolvable:$true] %s160_s29 }
  0x10   : > { %s162_s3 = sshll.u32 %s152_s30, 4  ;;  %p546_p11 = pnand %p549_p10, %p737_p3  ;;  %s163_s3 = int_to_ptr.vmem [resolvable:$true] %s162_s3 }
  0x11   : > { %p486_p12 = scmp.ge.s32.totalorder %s681_s14, 1  ;;  %s149_s4 = scalar_lea.sflag [#allocation4], %s148_s23 }
  0x12   : > { %s683_s5 = smov 192   ;;  %s684_s6 = smov 64  }
  0x13   : > { %s685_s7 = smov 4   ;;  %p170_p13 = scmp.lt.s32.totalorder %s681_s14, 4 }
  0x14   : > { %548 = dma.hbm_to_vmem [thread:$0]  (!%p546_p11), %s161_s29, 1024, %s163_s3, %s149_s4, %s683_s5, %s684_s6, %s685_s7  }
  0x15   : > { %p171_p0 = pnand %p486_p12, %p170_p13 }
  0x16   : > { %s176_s8 = sand.u32 (!%p171_p0), 1, %s665_s10  }
  0x17   : > { %174 = sbr.rel (%p171_p0) target bundleno = 207 (0xcf), region = 28  ;;  %s487_s9 = sshll.u32 (!%p171_p0), %s176_s8, 6 }
  0x18   : > { %s177_s15 = scalar_lea.sflag (!%p171_p0), [#allocation4], %s176_s8  ;;  %s180_s17 = scalar_lea.vmem (!%p171_p0), [#allocation3], %s487_s9 }
  0x1c   : > { %656 = dma.done.wait (%p744_p8), %s177_s15, 1024  }
  0x1d   : > { %658 = vsyncadd (%p744_p8), %s177_s15, 4294966272  ;;  %v537_v0 = vld [vmem:[%s180_s17 + $0x38] sm:$0xff]  ;;  %v536_v1 = vld [vmem:[%s180_s17 + $0x30] sm:$0xff]  ;;  %s488_s20 = sshll.u32 %s176_s8, 3  ;;  %s526_s24 = sshll.u32 (%p751_p9), %s673_s12, 2 }
  0x1e   : > { %300 = vmatpush.bf16.msra.mxu0 %v537_v0  ;;  %v535_v2 = vld [vmem:[%s180_s17 + $0x28] sm:$0xff]  ;;  %v534_v3 = vld [vmem:[%s180_s17 + $0x20] sm:$0xff]  ;;  %v533_v4 = vld [vmem:[%s180_s17 + $0x18] sm:$0xff]  ;;  %s208_s23 = scalar_lea.vmem [#allocation5], %s488_s20  ;;  %s338_s27 = scalar_lea.vmem (%p751_p9), %s799_s2, %s526_s24 }
  0x1f   : > { %v532_v5 = vld [vmem:[%s180_s17 + $0x10] sm:$0xff]  ;;  %v531_v6 = vld [vmem:[%s180_s17 + $0x8] sm:$0xff]  ;;  %v530_v7 = vld [vmem:[%s180_s17] sm:$0xff] }
  0x20   : > { %v529_v8 = vld [vmem:[%s797_s0] sm:$0xff] }
  0x22   : > { %301 = vmatpush.bf16.msra.mxu0 %v536_v1 }
  0x26   : > { %302 = vmatpush.bf16.msra.mxu0 %v535_v2 }
  0x2a   : > { %303 = vmatpush.bf16.msra.mxu0 %v534_v3 }
  0x2e   : > { %304 = vmatpush.bf16.msra.mxu0 %v533_v4 }
  0x32   : > { %305 = vmatpush.bf16.msra.mxu0 %v532_v5 }
  0x36   : > { %306 = vmatpush.bf16.msra.mxu0 %v531_v6 }
  0x3a   : > { %307 = vmatpush.bf16.msra.mxu0 %v530_v7 }
  0x3d   : > { %308 = vmatmul.bf16.vlgmr.msra.gmra.mxu0 %v529_v8 }
  0xba   : > { %v309_v9 = vpop.f32.mrf.mxu0 }
  0xc1   : > { %333 = sbr.rel (!%p751_p9) target bundleno = 207 (0xcf), region = 44 }
  0xc2   : > { %v311_v10 = vpop.f32.mrf.mxu0 }
  0xc3   : > { %v541_v11 = vpack.c.bf16 %v311_v10, %v309_v9 }
  0xc5   : > { %542 = vst [vmem:[%s208_s23] sm:$0xff] %v541_v11  }
  0xcc   : > { %v355_v12 = vld [vmem:[%s208_s23] sm:$0xf]  ;;  %v357_v13 = vld [vmem:[%s208_s23 + $0x4] sm:$0xf] }
  0xcd   : > { %356 = vst [vmem:[%s338_s27] sm:$0xf] %v355_v12 }
  0xce   : > { %358 = vst [vmem:[%s338_s27 + $0xc] sm:$0xf] %v357_v13 }
  0xcf PF: > { %s15_s14 = sadd.s32 1, %s681_s14   ;;  %s803_s9 = smov %s665_s10 }
  0xd0   : > { %p12_p1 = scmp.ge.s32.totalorder %s15_s14, 5   ;;  %s804_s10 = smov %s669_s11 }
  0xd1   : > { %s805_s11 = smov %s749_s21  ;;  %s806_s12 = smov %s677_s13 }
  0xd2   : > { %s807_s13 = smov %s809_s16  ;;  %14 = sbr.rel (!%p12_p1) target bundleno = 4 (0x4), region = 120 }
  0xd7   :  { %396 = vsyncpa [#allocation4], 1 }
  0xd8   :  { %398 = vsyncpa [#allocation4 + $0x1], 1 }

// kernel: llama_forward.18
= control target key start
LH: loop header
LB: loop body
LE: loop exit
PB: predicated region body
PF: predicated region fallthrough
CT: control target
= control target key end

     0   :  { %s681_s18 = smov 0   ;;  %s683_s19 = smov 0   ;;  %s753_s0 = inlined_call_operand.vmem [shape: bf16[2,4,8,32], index: 0, kind: input, shape index: {}]   ;;  %s754_s1 = inlined_call_operand.vmem [shape: bf16[2,4,8,32], index: 1, kind: input, shape index: {}]   ;;  %s755_s2 = inlined_call_operand.vmem [shape: bf16[2,4,8,32], index: 2, kind: input, shape index: {}]   ;;  %s756_s3 = inlined_call_operand.vmem [shape: f32[8,32], index: 3, kind: input, shape index: {}]   ;;  %s757_s4 = inlined_call_operand.vmem [shape: f32[8,32], index: 4, kind: input, shape index: {}]   ;;  %s758_s5 = inlined_call_operand.vmem [shape: bf16[2,4,8,32], index: 5, kind: output, shape index: {}]  }
   0x1   :  { %s685_s20 = smov 0   ;;  %s687_s21 = smov 0  }
   0x2   :  { %s689_s22 = smov 0  }
   0x3 LB: > { %s24_s23 = sadd.s32 1, %s638_s20  ;;  %s27_s24 = sadd.s32 1, %s642_s21  ;;  %s646_s22 = sphi %s689_s22, %s15_s22   ;;  %s642_s21 = sphi %s687_s21, %s762_s21   ;;  %s638_s20 = sphi %s685_s20, %s761_s20   ;;  %s634_s19 = sphi %s683_s19, %s760_s19   ;;  %s630_s18 = sphi %s681_s18, %s759_s18  }
   0x4   : > { %p25_p0 = scmp.ge.s32.totalorder %s24_s23, 4  ;;  %p548_p1 = scmp.ge.s32.totalorder %s646_s22, 1 }
   0x5   : > { %p236_p2 = scmp.lt.s32.totalorder %s646_s22, 9 }
   0x6   : > { %s764_s23 = smov (%p25_p0, %s24_s23), 0  ;;  %s766_s24 = smov (!%p25_p0, %s27_s24), %s642_s21 }
   0x7   : > { %p237_p3 = pnand %p548_p1, %p236_p2  ;;  %p29_p4 = scmp.ge.s32.totalorder %s766_s24, 2 }
   0x8   : > { %p286_p5 = scmp.lt.s32.totalorder (!%p237_p3), %s634_s19, 1  ;;  %p288_p6 = scmp.lt.s32.totalorder (!%p237_p3), %s630_s18, 3 }
   0x9   : > { %s768_s24 = smov (%p29_p4, %s766_s24), 0  ;;  %240 = sbr.rel (%p237_p3) target bundleno = 775 (0x307), region = 40 }
   0xa   : > { %s648_s9 = smov (!%p237_p3), 32   ;;  %s649_s12 = smov (!%p237_p3), 16  }
   0xb   : > { %s650_s13 = smov (!%p237_p3), 112  }
   0xe   : > { %s770_s19 = smov (!%p286_p5, %s634_s19), 1  ;;  %s772_s18 = smov (!%p288_p6, %s630_s18), 3  ;;  %vm323_vm0 = vcmask 1047808   ;;  %v320_v6 = vld [vmem:[%s757_s4] sm:$0xff]  ;;  %vm360_vm1 = vcmask 261120   ;;  %v380_v27 = vlaneseq  ;;  %vm386_vm3 = vcmask 64512  }
   0xf   : > { %s549_s25 = sshll.u32 %s770_s19, 2  ;;  %v319_v16 = vld [vmem:[%s756_s3] sm:$0xff]  ;;  %vm400_vm4 = vcmask 1043456   ;;  %vm420_vm5 = vcmask 257024  }
  0x10   : > { %s291_s26 = sadd.s32 %s549_s25, %s772_s18  ;;  %v381_v28 = vshrl.u32 %v380_v27, 7  ;;  %v383_v29 = vand.u32 127, %v380_v27 }
  0x11   : > { %s711_s27 = sshll.u32 %s291_s26, 2 }
  0x12   : > { %s301_s30 = scalar_lea.vmem %s754_s1, %s711_s27  ;;  %s293_s8 = scalar_lea.vmem %s753_s0, %s711_s27  ;;  %vm384_vm2 = vcmp.ge.s32.totalorder %v381_v28, %v383_v29 }
  0x13   : > { %v342_v0 = vld [vmem:[%s301_s30] sm:$0xf]  ;;  %s309_s18 = scalar_lea.vmem %s755_s2, %s711_s27  ;;  %s317_s26 = scalar_lea.vmem %s758_s5, %s711_s27 }
  0x14   : > { %v343_v1 = vunpack.c.l.bf16 %v342_v0  ;;  %v321_v2 = vld [vmem:[%s293_s8] sm:$0xf] }
  0x15   : > { %v322_v3 = vunpack.c.l.bf16 %v321_v2  ;;  %v357_v34 = vld [vmem:[%s309_s18] sm:$0xf] }
  0x16   : > { %344 = vrot.lane.b32.xlu0 %v343_v1, %s648_s9  ;;  %v350_v17 = vmul.f32 %v343_v1, %v319_v16  ;;  %v402_v35 = vsel %vm400_vm4, %v357_v34, 0 }
  0x17   : > { %v330_v22 = vmul.f32 %v322_v3, %v319_v16  ;;  %411 = vmatpush.bf16.msra.mxu1 %v402_v35 }
  0x1e   : > { %324 = vrot.lane.b32.xlu0 %v322_v3, %s648_s9 }
  0x88   : > { %v345_v4 = vpop.permute.xlu0 %344 }
  0x89   : > { %v346_v5 = vsel %vm323_vm0, %v345_v4, %v343_v1 }
  0x8a   : > { %347 = vrot.lane.b32.xlu1 %v346_v5, %s648_s9 }
  0x90   : > { %v325_v7 = vpop.permute.xlu0 %324 }
  0x91   : > { %v326_v8 = vsel %vm323_vm0, %v325_v7, %v322_v3 }
  0x92   : > { %332 = vrot.lane.b32.xlu1 %v320_v6, %s649_s12  ;;  %327 = vrot.lane.b32.xlu2 %v326_v8, %s648_s9 }
  0xec   : > { %v328_v10 = vpop.permute.xlu2 %327 }
  0xed   : > { %v329_v11 = vsel %vm323_vm0, %v328_v10, %v322_v3 }
  0xfc   : > { %v348_v9 = vpop.permute.xlu1 %347 }
  0xfd   : > { %v349_v12 = vsel %vm323_vm0, %v348_v9, %v343_v1 }
 0x104   : > { %v333_v13 = vpop.permute.xlu1 %332 }
 0x105   : > { %v335_v14 = vmul.f32 %v333_v13, %v329_v11  ;;  %v351_v15 = vmul.f32 %v349_v12, %v333_v13 }
 0x107   : > { %353 = vrot.lane.b32.xlu2 %v351_v15, %s650_s13  ;;  %337 = vrot.lane.b32.xlu0 %v335_v14, %s650_s13 }
 0x161   : > { %v354_v18 = vpop.permute.xlu2 %353 }
 0x162   : > { %v356_v19 = vadd.f32 %v354_v18, %v350_v17 }
 0x164   : > { %v359_v20 = vpack.c.bf16 %v356_v19, %v356_v19 }
 0x166   : > { %v365_v21 = vsel %vm360_vm1, %v359_v20, 0 }
 0x167   : > { %374 = vmatpush.bf16.xpose.msra.mxu0 %v365_v21 }
 0x179   : > { %v338_v23 = vpop.permute.xlu0 %337 }
 0x17a   : > { %v340_v24 = vadd.f32 %v338_v23, %v330_v22 }
 0x17c   : > { %v341_v25 = vmul.f32 0.17677669, %v340_v24 }
 0x17e   : > { %v358_v26 = vpack.c.bf16 %v341_v25, %v341_v25 }
 0x180   : > { %557 = vmatmul.msk.bf16.vlgmr.msra.gmra.mxu0 %vm360_vm1, %v358_v26 }
 0x1fd   : > { %v376_v30 = vpop.f32.mrf.mxu0 }
 0x1fe   : > { %v385_v31 = vsel %vm384_vm2, %v376_v30, -1e+30 }
 0x1ff   : > { %v387_v32 = vsel %vm386_vm3, %v385_v31, -inf }
 0x200   : > { %388 = vmax.xlane.f32.xlu1 %v387_v32 }
 0x205   : > { %v378_v33 = vpop.f32.mrf.mxu0 }
 0x273   : > { %v389_v36 = vpop.xlane.xlu1 %388 }
 0x274   : > { %v390_v37 = vsub.f32 %v385_v31, %v389_v36 }
 0x276   : > { %v391_v38 = vmul.f32 1.442695, %v390_v37 }
 0x278   : > { %604 = vpow2.f32 %v391_v38 }
 0x27e   : > { %v605_v39 = vpop.eup %604 }
 0x27f   : > { %v393_v40 = vsel %vm386_vm3, %v605_v39, 0.0  ;;  %v396_v41 = vpack.c.bf16 %v605_v39, %v605_v39 }
 0x280   : > { %394 = vadd.xlane.f32.xlu2 %v393_v40 }
 0x281   : > { %558 = vmatmul.msk.bf16.vlgmr.msra.gmra.mxu1 %vm386_vm3, %v396_v41 }
 0x2f3   : > { %v395_v42 = vpop.xlane.xlu2 %394 }
 0x2f4   : > { %606 = vrcp.f32 %v395_v42 }
 0x2fa   : > { %v607_v43 = vpop.eup %606 }
 0x2fe   : > { %v413_v44 = vpop.f32.mrf.mxu1 }
 0x2ff   : > { %v418_v45 = vmul.f32 %v607_v43, %v413_v44 }
 0x301   : > { %v419_v46 = vpack.c.bf16 %v418_v45, %v418_v45 }
 0x303   : > { %421 = vst.msk [vmem:[%s317_s26] sm:$0xf] %vm420_vm5, %v419_v46 }
 0x306   : > { %v415_v47 = vpop.f32.mrf.mxu1 }
 0x307 PF: > { %s15_s22 = sadd.s32 1, %s646_s22   ;;  %s759_s18 = smov %s638_s20 }
 0x308   : > { %p12_p7 = scmp.ge.s32.totalorder %s15_s22, 10   ;;  %s760_s19 = smov %s642_s21 }
 0x309   : > { %s761_s20 = smov %s764_s23  ;;  %s762_s21 = smov %s768_s24 }
 0x30a   :  { %14 = sbr.rel (!%p12_p7) target bundleno = 3 (0x3), region = 76 }

// kernel: llama_forward.24
= control target key start
LH: loop header
LB: loop body
LE: loop exit
PB: predicated region body
PF: predicated region fallthrough
CT: control target
= control target key end

     0   :  { %s715_s9 = smov 0   ;;  %s717_s10 = smov 0   ;;  %s808_s0 = inlined_call_operand.vmem [shape: bf16[16,128], index: 0, kind: input, shape index: {}]   ;;  %s809_s1 = inlined_call_operand.vmem [shape: bf16[128,384], index: 1, kind: input, shape index: {}]   ;;  %s810_s2 = inlined_call_operand.vmem [shape: bf16[16,384], index: 2, kind: output, shape index: {}]  }
   0x1   :  { %s719_s11 = smov 0   ;;  %s721_s12 = smov 0  }
   0x2   :  { %s723_s13 = smov 0  }
   0x3 LB: > { %s27_s14 = sadd.s32 1, %s694_s12  ;;  %s556_s15 = sadd.s32 4294967295, %s698_s13   ;;  %s698_s13 = sphi %s723_s13, %s12_s13   ;;  %s694_s12 = sphi %s721_s12, %s815_s12   ;;  %s690_s11 = sphi %s719_s11, %s814_s11   ;;  %s686_s10 = sphi %s717_s10, %s813_s10   ;;  %s682_s9 = sphi %s715_s9, %s812_s9  }
   0x4   : > { %p29_p0 = scmp.ge.s32.totalorder %s27_s14, 3  ;;  %p75_p1 = scmp.ne.s32.totalorder %s686_s10, %s682_s9 }
   0x5   : > { %p76_p2 = scmp.eq.s32.totalorder %s698_s13, 0  ;;  %p107_p4 = scmp.eq.s32.totalorder %s556_s15, 2 }
   0x6   : > { %s817_s14 = smov (%p29_p0, %s27_s14), 0  ;;  %s68_s17 = sadd.s32 1, %s686_s10 }
   0x7   : > { %p77_p3 = por %p76_p2, %p75_p1  ;;  %s64_s16 = ssub.s32 %s694_s12, %s817_s14 }
   0x8   : > { %p66_p5 = scmp.eq.s32.totalorder %s64_s16, 0  ;;  %p750_p6 = por %p107_p4, %p75_p1 }
   0x9   : > { %p560_p7 = scmp.ge.s32.totalorder %s698_s13, 3 }
   0xa   : > { %s755_s19 = scalar_select %p66_p5, %s686_s10, %s68_s17  }
   0xb   : > { %141 = sbr.rel (%p560_p7) target bundleno = 36 (0x24), region = 20 }
  0x10   : > { %144 = sbr.rel (!%p77_p3) target bundleno = 36 (0x24), region = 24  ;;  %s146_s20 = sand.u32 (%p77_p3), 1, %s686_s10  }
  0x11   : > { %s562_s21 = sshll.u32 (%p77_p3), %s694_s12, 2  ;;  %s561_s22 = sshll.u32 (%p77_p3), %s146_s20, 6 }
  0x12   : > { %s763_s25 = scalar_lea.vmem (%p77_p3), %s809_s1, %s562_s21  ;;  %s148_s26 = scalar_lea.vmem (%p77_p3), [#allocation3], %s561_s22 }
  0x13   : > { %v170_v0 = vld [vmem:[%s763_s25] sm:$0xf] (%p77_p3)  ;;  %v172_v1 = vld [vmem:[%s763_s25 + $0xc] sm:$0xf] (%p77_p3)  ;;  %v174_v2 = vld [vmem:[%s763_s25 + $0x18] sm:$0xf] (%p77_p3) }
  0x14   : > { %171 = vst [vmem:[%s148_s26] sm:$0xf] (%p77_p3), %v170_v0  ;;  %v176_v3 = vld [vmem:[%s763_s25 + $0x24] sm:$0xf] (%p77_p3)  ;;  %v178_v4 = vld [vmem:[%s763_s25 + $0x30] sm:$0xf] (%p77_p3) }
  0x15   : > { %173 = vst [vmem:[%s148_s26 + $0x4] sm:$0xf] %v172_v1  ;;  %v180_v5 = vld [vmem:[%s763_s25 + $0x3c] sm:$0xf]  ;;  %v182_v6 = vld [vmem:[%s763_s25 + $0x48] sm:$0xf] }
  0x16   : > { %175 = vst [vmem:[%s148_s26 + $0x8] sm:$0xf] %v174_v2  ;;  %v184_v7 = vld [vmem:[%s763_s25 + $0x54] sm:$0xf]  ;;  %v186_v8 = vld [vmem:[%s763_s25 + $0x60] sm:$0xf] }
  0x17   : > { %177 = vst [vmem:[%s148_s26 + $0xc] sm:$0xf] %v176_v3  ;;  %v188_v9 = vld [vmem:[%s763_s25 + $0x6c] sm:$0xf]  ;;  %v190_v10 = vld [vmem:[%s763_s25 + $0x78] sm:$0xf] }
  0x18   : > { %179 = vst [vmem:[%s148_s26 + $0x10] sm:$0xf] %v178_v4  ;;  %v192_v11 = vld [vmem:[%s763_s25 + $0x84] sm:$0xf]  ;;  %v194_v12 = vld [vmem:[%s763_s25 + $0x90] sm:$0xf] }
  0x19   : > { %181 = vst [vmem:[%s148_s26 + $0x14] sm:$0xf] %v180_v5  ;;  %v196_v13 = vld [vmem:[%s763_s25 + $0x9c] sm:$0xf]  ;;  %v198_v14 = vld [vmem:[%s763_s25 + $0xa8] sm:$0xf] }
  0x1a   : > { %183 = vst [vmem:[%s148_s26 + $0x18] sm:$0xf] %v182_v6  ;;  %v200_v15 = vld [vmem:[%s763_s25 + $0xb4] sm:$0xf] }
  0x1b   : > { %185 = vst [vmem:[%s148_s26 + $0x1c] sm:$0xf] %v184_v7 }
  0x1c   : > { %187 = vst [vmem:[%s148_s26 + $0x20] sm:$0xf] %v186_v8 }
  0x1d   : > { %189 = vst [vmem:[%s148_s26 + $0x24] sm:$0xf] %v188_v9 }
  0x1e   : > { %191 = vst [vmem:[%s148_s26 + $0x28] sm:$0xf] %v190_v10 }
  0x1f   : > { %193 = vst [vmem:[%s148_s26 + $0x2c] sm:$0xf] %v192_v11 }
  0x20   : > { %195 = vst [vmem:[%s148_s26 + $0x30] sm:$0xf] %v194_v12 }
  0x21   : > { %197 = vst [vmem:[%s148_s26 + $0x34] sm:$0xf] %v196_v13 }
  0x22   : > { %199 = vst [vmem:[%s148_s26 + $0x38] sm:$0xf] %v198_v14 }
  0x23   : > { %201 = vst [vmem:[%s148_s26 + $0x3c] sm:$0xf] %v200_v15 }
  0x24 PF: > { %p563_p8 = scmp.ge.s32.totalorder %s698_s13, 1  ;;  %p256_p9 = scmp.lt.s32.totalorder %s698_s13, 4 }
  0x26   : > { %p257_p10 = pnand %p563_p8, %p256_p9 }
  0x27   : > { %s263_s27 = sand.u32 (!%p257_p10), 1, %s682_s9  }
  0x28   : > { %260 = sbr.rel (%p257_p10) target bundleno = 223 (0xdf), region = 65  ;;  %s564_s28 = sshll.u32 (!%p257_p10), %s263_s27, 6 }
  0x29   : > { %s265_s29 = scalar_lea.vmem (!%p257_p10), [#allocation3], %s564_s28  ;;  %s565_s4 = sshll.u32 (!%p257_p10), %s263_s27, 3 }
  0x2a   : > { %s290_s5 = scalar_lea.vmem (!%p257_p10), [#allocation4], %s565_s4 }
  0x2d   : > { %v614_v16 = vld [vmem:[%s265_s29 + $0x38] sm:$0xff]  ;;  %v613_v17 = vld [vmem:[%s265_s29 + $0x30] sm:$0xff]  ;;  %v612_v18 = vld [vmem:[%s265_s29 + $0x28] sm:$0xff]  ;;  %s603_s6 = sshll.u32 (%p750_p6), %s690_s11, 2 }
  0x2e   : > { %382 = vmatpush.bf16.msra.mxu0 %v614_v16  ;;  %v611_v19 = vld [vmem:[%s265_s29 + $0x20] sm:$0xff]  ;;  %v610_v20 = vld [vmem:[%s265_s29 + $0x18] sm:$0xff]  ;;  %v609_v21 = vld [vmem:[%s265_s29 + $0x10] sm:$0xff]  ;;  %s420_s9 = scalar_lea.vmem (%p750_p6), %s810_s2, %s603_s6 }
  0x2f   : > { %v608_v22 = vld [vmem:[%s265_s29 + $0x8] sm:$0xff]  ;;  %v607_v23 = vld [vmem:[%s265_s29] sm:$0xff] }
  0x30   : > { %v606_v24 = vld [vmem:[%s808_s0] sm:$0xff] }
  0x32   : > { %383 = vmatpush.bf16.msra.mxu0 %v613_v17 }
  0x36   : > { %384 = vmatpush.bf16.msra.mxu0 %v612_v18 }
  0x3a   : > { %385 = vmatpush.bf16.msra.mxu0 %v611_v19 }
  0x3e   : > { %386 = vmatpush.bf16.msra.mxu0 %v610_v20 }
  0x42   : > { %387 = vmatpush.bf16.msra.mxu0 %v609_v21 }
  0x46   : > { %388 = vmatpush.bf16.msra.mxu0 %v608_v22 }
  0x4a   : > { %389 = vmatpush.bf16.msra.mxu0 %v607_v23 }
  0x4d   : > { %390 = vmatmul.bf16.vlgmr.msra.gmra.mxu0 %v606_v24 }
  0xca   : > { %v391_v25 = vpop.f32.mrf.mxu0 }
  0xd1   : > { %415 = sbr.rel (!%p750_p6) target bundleno = 223 (0xdf), region = 81 }
  0xd2   : > { %v393_v26 = vpop.f32.mrf.mxu0 }
  0xd3   : > { %v618_v27 = vpack.c.bf16 %v393_v26, %v391_v25 }
  0xd5   : > { %619 = vst [vmem:[%s290_s5] sm:$0xff] %v618_v27  }
  0xdc   : > { %v437_v28 = vld [vmem:[%s290_s5] sm:$0xf]  ;;  %v439_v29 = vld [vmem:[%s290_s5 + $0x4] sm:$0xf] }
  0xdd   : > { %438 = vst [vmem:[%s420_s9] sm:$0xf] %v437_v28 }
  0xde   : > { %440 = vst [vmem:[%s420_s9 + $0xc] sm:$0xf] %v439_v29 }
  0xdf PF: > { %s12_s13 = sadd.s32 1, %s698_s13   ;;  %s812_s9 = smov %s686_s10 }
  0xe0   : > { %p9_p11 = scmp.ge.s32.totalorder %s12_s13, 5   ;;  %s813_s10 = smov %s755_s19 }
  0xe1   : > { %s814_s11 = smov %s694_s12  ;;  %s815_s12 = smov %s817_s14 }
  0xe2   :  { %11 = sbr.rel (!%p9_p11) target bundleno = 3 (0x3), region = 156 }

// kernel: llama_forward.21
= control target key start
LH: loop header
LB: loop body
LE: loop exit
PB: predicated region body
PF: predicated region fallthrough
CT: control target
= control target key end

     0   :  { %s1309_s12 = smov 0   ;;  %s1311_s13 = smov 0   ;;  %s1520_s0 = inlined_call_operand.vmem [shape: bf16[16,128], index: 0, kind: input, shape index: {}]   ;;  %s1521_s1 = inlined_call_operand.vmem [shape: bf16[128,512], index: 1, kind: input, shape index: {}]   ;;  %s1522_s2 = inlined_call_operand.vmem [shape: bf16[128,512], index: 2, kind: input, shape index: {}]   ;;  %s1523_s3 = inlined_call_operand.vmem [shape: bf16[16,512], index: 3, kind: output, shape index: {}]  }
   0x1   :  { %s1313_s14 = smov 0   ;;  %s1315_s15 = smov 0  }
   0x2   :  { %s1317_s16 = smov 0  }
   0x3 LB: > { %s28_s17 = sadd.s32 1, %s1283_s15  ;;  %s1001_s18 = sadd.s32 4294967295, %s1287_s16   ;;  %s1287_s16 = sphi %s1317_s16, %s13_s16   ;;  %s1283_s15 = sphi %s1315_s15, %s1529_s15   ;;  %s1279_s14 = sphi %s1313_s14, %s1528_s14   ;;  %s1275_s13 = sphi %s1311_s13, %s1527_s13   ;;  %s1271_s12 = sphi %s1309_s12, %s1526_s12  }
   0x4   : > { %p30_p0 = scmp.ge.s32.totalorder %s28_s17, 2  ;;  %p76_p1 = scmp.ne.s32.totalorder %s1275_s13, %s1271_s12 }
   0x5   : > { %p77_p2 = scmp.eq.s32.totalorder %s1287_s16, 0  ;;  %p136_p4 = scmp.eq.s32.totalorder %s1001_s18, 1 }
   0x6   : > { %s1531_s17 = smov (%p30_p0, %s28_s17), 0  ;;  %s69_s21 = sadd.s32 1, %s1275_s13 }
   0x7   : > { %p1341_p3 = por %p77_p2, %p76_p1  ;;  %s65_s20 = ssub.s32 %s1283_s15, %s1531_s17 }
   0x8   : > { %p67_p5 = scmp.eq.s32.totalorder %s65_s20, 0  ;;  %p1348_p6 = por %p136_p4, %p76_p1 }
   0x9   : > { %p1005_p7 = scmp.ge.s32.totalorder %s1287_s16, 2 }
   0xa   : > { %s1353_s23 = scalar_select %p67_p5, %s1275_s13, %s69_s21  }
   0xb   : > { %170 = sbr.rel (%p1005_p7) target bundleno = 56 (0x38), region = 20 }
  0x10   : > { %173 = sbr.rel (!%p1341_p3) target bundleno = 36 (0x24), region = 24  ;;  %s175_s24 = sand.u32 (%p1341_p3), 1, %s1275_s13  }
  0x11   : > { %s1157_s25 = sshll.u32 (%p1341_p3), %s1283_s15, 3  ;;  %s1006_s26 = sshll.u32 (%p1341_p3), %s175_s24, 7 }
  0x12   : > { %s1363_s29 = scalar_lea.vmem (%p1341_p3), %s1521_s1, %s1157_s25  ;;  %s177_s30 = scalar_lea.vmem (%p1341_p3), [#allocation4], %s1006_s26 }
  0x13   : > { %v242_v0 = vld [vmem:[%s1363_s29] sm:$0xff] (%p1341_p3)  ;;  %v244_v1 = vld [vmem:[%s1363_s29 + $0x10] sm:$0xff] (%p1341_p3) }
  0x14   : > { %v246_v2 = vld [vmem:[%s1363_s29 + $0x20] sm:$0xff] (%p1341_p3)  ;;  %243 = vst [vmem:[%s177_s30] sm:$0xff] (%p1341_p3), %v242_v0  ;;  %v248_v3 = vld [vmem:[%s1363_s29 + $0x30] sm:$0xff] (%p1341_p3) }
  0x15   : > { %245 = vst [vmem:[%s177_s30 + $0x8] sm:$0xff] %v244_v1  ;;  %v250_v4 = vld [vmem:[%s1363_s29 + $0x40] sm:$0xff]  ;;  %v252_v5 = vld [vmem:[%s1363_s29 + $0x50] sm:$0xff] }
  0x16   : > { %247 = vst [vmem:[%s177_s30 + $0x10] sm:$0xff] %v246_v2  ;;  %v254_v6 = vld [vmem:[%s1363_s29 + $0x60] sm:$0xff]  ;;  %v256_v7 = vld [vmem:[%s1363_s29 + $0x70] sm:$0xff] }
  0x17   : > { %249 = vst [vmem:[%s177_s30 + $0x18] sm:$0xff] %v248_v3  ;;  %v258_v8 = vld [vmem:[%s1363_s29 + $0x80] sm:$0xff]  ;;  %v260_v9 = vld [vmem:[%s1363_s29 + $0x90] sm:$0xff] }
  0x18   : > { %251 = vst [vmem:[%s177_s30 + $0x20] sm:$0xff] %v250_v4  ;;  %v262_v10 = vld [vmem:[%s1363_s29 + $0xa0] sm:$0xff]  ;;  %v264_v11 = vld [vmem:[%s1363_s29 + $0xb0] sm:$0xff] }
  0x19   : > { %253 = vst [vmem:[%s177_s30 + $0x28] sm:$0xff] %v252_v5  ;;  %v266_v12 = vld [vmem:[%s1363_s29 + $0xc0] sm:$0xff]  ;;  %v268_v13 = vld [vmem:[%s1363_s29 + $0xd0] sm:$0xff] }
  0x1a   : > { %255 = vst [vmem:[%s177_s30 + $0x30] sm:$0xff] %v254_v6  ;;  %v270_v14 = vld [vmem:[%s1363_s29 + $0xe0] sm:$0xff]  ;;  %v272_v15 = vld [vmem:[%s1363_s29 + $0xf0] sm:$0xff] }
  0x1b   : > { %257 = vst [vmem:[%s177_s30 + $0x38] sm:$0xff] %v256_v7 }
  0x1c   : > { %259 = vst [vmem:[%s177_s30 + $0x40] sm:$0xff] %v258_v8 }
  0x1d   : > { %261 = vst [vmem:[%s177_s30 + $0x48] sm:$0xff] %v260_v9 }
  0x1e   : > { %263 = vst [vmem:[%s177_s30 + $0x50] sm:$0xff] %v262_v10 }
  0x1f   : > { %265 = vst [vmem:[%s177_s30 + $0x58] sm:$0xff] %v264_v11 }
  0x20   : > { %267 = vst [vmem:[%s177_s30 + $0x60] sm:$0xff] %v266_v12 }
  0x21   : > { %269 = vst [vmem:[%s177_s30 + $0x68] sm:$0xff] %v268_v13 }
  0x22   : > { %271 = vst [vmem:[%s177_s30 + $0x70] sm:$0xff] %v270_v14 }
  0x23   : > { %273 = vst [vmem:[%s177_s30 + $0x78] sm:$0xff] %v272_v15 }
  0x24 PF: > { %279 = sbr.rel (!%p1341_p3) target bundleno = 56 (0x38), region = 62  ;;  %s281_s4 = sand.u32 (%p1341_p3), 1, %s1275_s13  }
  0x25   : > { %s1158_s5 = sshll.u32 (%p1341_p3), %s1283_s15, 3  ;;  %s1009_s6 = sshll.u32 (%p1341_p3), %s281_s4, 7 }
  0x26   : > { %s1388_s9 = scalar_lea.vmem (%p1341_p3), %s1522_s2, %s1158_s5  ;;  %s283_s10 = scalar_lea.vmem (%p1341_p3), [#allocation5], %s1009_s6 }
  0x27   : > { %v348_v16 = vld [vmem:[%s1388_s9] sm:$0xff] (%p1341_p3)  ;;  %v350_v17 = vld [vmem:[%s1388_s9 + $0x10] sm:$0xff] (%p1341_p3) }
  0x28   : > { %v352_v18 = vld [vmem:[%s1388_s9 + $0x20] sm:$0xff] (%p1341_p3)  ;;  %349 = vst [vmem:[%s283_s10] sm:$0xff] (%p1341_p3), %v348_v16  ;;  %v354_v19 = vld [vmem:[%s1388_s9 + $0x30] sm:$0xff] (%p1341_p3) }
  0x29   : > { %351 = vst [vmem:[%s283_s10 + $0x8] sm:$0xff] %v350_v17  ;;  %v356_v20 = vld [vmem:[%s1388_s9 + $0x40] sm:$0xff]  ;;  %v358_v21 = vld [vmem:[%s1388_s9 + $0x50] sm:$0xff] }
  0x2a   : > { %353 = vst [vmem:[%s283_s10 + $0x10] sm:$0xff] %v352_v18  ;;  %v360_v22 = vld [vmem:[%s1388_s9 + $0x60] sm:$0xff]  ;;  %v362_v23 = vld [vmem:[%s1388_s9 + $0x70] sm:$0xff] }
  0x2b   : > { %355 = vst [vmem:[%s283_s10 + $0x18] sm:$0xff] %v354_v19  ;;  %v364_v24 = vld [vmem:[%s1388_s9 + $0x80] sm:$0xff]  ;;  %v366_v25 = vld [vmem:[%s1388_s9 + $0x90] sm:$0xff] }
  0x2c   : > { %357 = vst [vmem:[%s283_s10 + $0x20] sm:$0xff] %v356_v20  ;;  %v368_v26 = vld [vmem:[%s1388_s9 + $0xa0] sm:$0xff]  ;;  %v370_v27 = vld [vmem:[%s1388_s9 + $0xb0] sm:$0xff] }
  0x2d   : > { %359 = vst [vmem:[%s283_s10 + $0x28] sm:$0xff] %v358_v21  ;;  %v372_v28 = vld [vmem:[%s1388_s9 + $0xc0] sm:$0xff]  ;;  %v374_v29 = vld [vmem:[%s1388_s9 + $0xd0] sm:$0xff] }
  0x2e   : > { %361 = vst [vmem:[%s283_s10 + $0x30] sm:$0xff] %v360_v22  ;;  %v376_v30 = vld [vmem:[%s1388_s9 + $0xe0] sm:$0xff]  ;;  %v378_v31 = vld [vmem:[%s1388_s9 + $0xf0] sm:$0xff] }
  0x2f   : > { %363 = vst [vmem:[%s283_s10 + $0x38] sm:$0xff] %v362_v23 }
  0x30   : > { %365 = vst [vmem:[%s283_s10 + $0x40] sm:$0xff] %v364_v24 }
  0x31   : > { %367 = vst [vmem:[%s283_s10 + $0x48] sm:$0xff] %v366_v25 }
  0x32   : > { %369 = vst [vmem:[%s283_s10 + $0x50] sm:$0xff] %v368_v26 }
  0x33   : > { %371 = vst [vmem:[%s283_s10 + $0x58] sm:$0xff] %v370_v27 }
  0x34   : > { %373 = vst [vmem:[%s283_s10 + $0x60] sm:$0xff] %v372_v28 }
  0x35   : > { %375 = vst [vmem:[%s283_s10 + $0x68] sm:$0xff] %v374_v29 }
  0x36   : > { %377 = vst [vmem:[%s283_s10 + $0x70] sm:$0xff] %v376_v30 }
  0x37   : > { %379 = vst [vmem:[%s283_s10 + $0x78] sm:$0xff] %v378_v31 }
  0x38 PF: > { %p1012_p8 = scmp.ge.s32.totalorder %s1287_s16, 1  ;;  %p384_p9 = scmp.lt.s32.totalorder %s1287_s16, 3 }
  0x3a   : > { %p385_p10 = pnand %p1012_p8, %p384_p9 }
  0x3b   : > { %s391_s11 = sand.u32 (!%p385_p10), 1, %s1271_s12  }
  0x3c   : > { %388 = sbr.rel (%p385_p10) target bundleno = 279 (0x117), region = 100  ;;  %s1013_s18 = sshll.u32 (!%p385_p10), %s391_s11, 7 }
  0x3d   : > { %s1411_s19 = scalar_lea.vmem (!%p385_p10), [#allocation4], %s1013_s18  ;;  %s1425_s20 = scalar_lea.vmem (!%p385_p10), [#allocation5], %s1013_s18 }
  0x3e   : > { %s1015_s25 = sshll.u32 (!%p385_p10), %s391_s11, 4 }
  0x3f   : > { %s431_s12 = scalar_lea.vmem (!%p385_p10), [#allocation6], %s1015_s25 }
  0x41   : > { %v1078_v32 = vld [vmem:[%s1411_s19 + $0x70] sm:$0xf]  ;;  %v1175_v33 = vld [vmem:[%s1411_s19 + $0x74] sm:$0xf0]  ;;  %v1174_v34 = vld [vmem:[%s1411_s19 + $0x74] sm:$0xf] }
  0x42   : > { %v1079_v35 = vor.u32 %v1175_v33, %v1078_v32  ;;  %v1080_v36 = vld [vmem:[%s1411_s19 + $0x78] sm:$0xf0]  ;;  %v1070_v37 = vld [vmem:[%s1411_s19 + $0x60] sm:$0xf]  ;;  %v1173_v38 = vld [vmem:[%s1411_s19 + $0x64] sm:$0xf0] }
  0x43   : > { %v1083_v39 = vor.u32 %v1174_v34, %v1080_v36  ;;  %v1172_v40 = vld [vmem:[%s1411_s19 + $0x64] sm:$0xf]  ;;  %v1072_v41 = vld [vmem:[%s1411_s19 + $0x68] sm:$0xf0]  ;;  %v1071_v42 = vor.u32 %v1173_v38, %v1070_v37  ;;  %v1062_v44 = vld [vmem:[%s1411_s19 + $0x50] sm:$0xf] }
  0x44   : > { %567 = vmatpush.bf16.msra.mxu0 %v1079_v35  ;;  %v1075_v43 = vor.u32 %v1172_v40, %v1072_v41  ;;  %v1171_v45 = vld [vmem:[%s1411_s19 + $0x54] sm:$0xf0]  ;;  %v1170_v46 = vld [vmem:[%s1411_s19 + $0x54] sm:$0xf]  ;;  %v1064_v47 = vld [vmem:[%s1411_s19 + $0x58] sm:$0xf0] }
  0x45   : > { %581 = vmatpush.bf16.msra.mxu1 %v1083_v39  ;;  %v1142_v48 = vld [vmem:[%s1425_s20 + $0x70] sm:$0xf]  ;;  %v1063_v49 = vor.u32 %v1171_v45, %v1062_v44  ;;  %v1191_v50 = vld [vmem:[%s1425_s20 + $0x74] sm:$0xf0]  ;;  %v1190_v51 = vld [vmem:[%s1425_s20 + $0x74] sm:$0xf]  ;;  %v1067_v53 = vor.u32 %v1170_v46, %v1064_v47 }
  0x46   : > { %v1144_v52 = vld [vmem:[%s1425_s20 + $0x78] sm:$0xf0]  ;;  %v1054_v54 = vld [vmem:[%s1411_s19 + $0x40] sm:$0xf]  ;;  %v1169_v55 = vld [vmem:[%s1411_s19 + $0x44] sm:$0xf0]  ;;  %v1143_v57 = vor.u32 %v1191_v50, %v1142_v48 }
  0x47   : > { %v1168_v56 = vld [vmem:[%s1411_s19 + $0x44] sm:$0xf]  ;;  %v1147_v58 = vor.u32 %v1190_v51, %v1144_v52  ;;  %v1056_v59 = vld [vmem:[%s1411_s19 + $0x48] sm:$0xf0]  ;;  %v1134_v60 = vld [vmem:[%s1425_s20 + $0x60] sm:$0xf]  ;;  %v1055_v1 = vor.u32 %v1169_v55, %v1054_v54 }
  0x48   : > { %568 = vmatpush.bf16.msra.mxu0 %v1071_v42  ;;  %v1189_v61 = vld [vmem:[%s1425_s20 + $0x64] sm:$0xf0]  ;;  %703 = vmatpush.bf16.msra.mxu2 %v1143_v57  ;;  %v1188_v63 = vld [vmem:[%s1425_s20 + $0x64] sm:$0xf]  ;;  %v1136_v0 = vld [vmem:[%s1425_s20 + $0x68] sm:$0xf0]  ;;  %v1059_v5 = vor.u32 %v1168_v56, %v1056_v59 }
  0x49   : > { %582 = vmatpush.bf16.msra.mxu1 %v1075_v43  ;;  %717 = vmatpush.bf16.msra.mxu3 %v1147_v58  ;;  %v1135_v62 = vor.u32 %v1189_v61, %v1134_v60  ;;  %v1046_v2 = vld [vmem:[%s1411_s19 + $0x30] sm:$0xf]  ;;  %v1167_v3 = vld [vmem:[%s1411_s19 + $0x34] sm:$0xf0]  ;;  %v1139_v4 = vor.u32 %v1188_v63, %v1136_v0  ;;  %v1186_v8 = vld [vmem:[%s1425_s20 + $0x54] sm:$0xf] }
  0x4a   : > { %v1126_v6 = vld [vmem:[%s1425_s20 + $0x50] sm:$0xf]  ;;  %v1187_v7 = vld [vmem:[%s1425_s20 + $0x54] sm:$0xf0]  ;;  %v1166_v9 = vld [vmem:[%s1411_s19 + $0x34] sm:$0xf]  ;;  %v1047_v15 = vor.u32 %v1167_v3, %v1046_v2 }
  0x4b   : > { %v1048_v10 = vld [vmem:[%s1411_s19 + $0x38] sm:$0xf0]  ;;  %v1127_v12 = vor.u32 %v1187_v7, %v1126_v6  ;;  %v1118_v14 = vld [vmem:[%s1425_s20 + $0x40] sm:$0xf]  ;;  %v1185_v16 = vld [vmem:[%s1425_s20 + $0x44] sm:$0xf0] }
  0x4c   : > { %569 = vmatpush.bf16.msra.mxu0 %v1063_v49  ;;  %v1128_v11 = vld [vmem:[%s1425_s20 + $0x58] sm:$0xf0]  ;;  %704 = vmatpush.bf16.msra.mxu2 %v1135_v62  ;;  %v1184_v17 = vld [vmem:[%s1425_s20 + $0x44] sm:$0xf]  ;;  %v1120_v18 = vld [vmem:[%s1425_s20 + $0x48] sm:$0xf0]  ;;  %v1051_v19 = vor.u32 %v1166_v9, %v1048_v10  ;;  %v1119_v24 = vor.u32 %v1185_v16, %v1118_v14 }
  0x4d   : > { %583 = vmatpush.bf16.msra.mxu1 %v1067_v53  ;;  %718 = vmatpush.bf16.msra.mxu3 %v1139_v4  ;;  %v1131_v13 = vor.u32 %v1186_v8, %v1128_v11  ;;  %v1038_v20 = vld [vmem:[%s1411_s19 + $0x20] sm:$0xf]  ;;  %v1165_v21 = vld [vmem:[%s1411_s19 + $0x24] sm:$0xf0]  ;;  %v1164_v22 = vld [vmem:[%s1411_s19 + $0x24] sm:$0xf]  ;;  %v1123_v25 = vor.u32 %v1184_v17, %v1120_v18 }
  0x4e   : > { %v1040_v23 = vld [vmem:[%s1411_s19 + $0x28] sm:$0xf0]  ;;  %v1110_v26 = vld [vmem:[%s1425_s20 + $0x30] sm:$0xf]  ;;  %v1039_v27 = vor.u32 %v1165_v21, %v1038_v20  ;;  %v1183_v28 = vld [vmem:[%s1425_s20 + $0x34] sm:$0xf0] }
  0x4f   : > { %v1182_v29 = vld [vmem:[%s1425_s20 + $0x34] sm:$0xf]  ;;  %v1112_v30 = vld [vmem:[%s1425_s20 + $0x38] sm:$0xf0]  ;;  %v1043_v31 = vor.u32 %v1164_v22, %v1040_v23  ;;  %v1030_v32 = vld [vmem:[%s1411_s19 + $0x10] sm:$0xf]  ;;  %v1111_v36 = vor.u32 %v1183_v28, %v1110_v26 }
  0x50   : > { %570 = vmatpush.bf16.msra.mxu0 %v1055_v1  ;;  %705 = vmatpush.bf16.msra.mxu2 %v1127_v12  ;;  %v1163_v33 = vld [vmem:[%s1411_s19 + $0x14] sm:$0xf0]  ;;  %v1162_v34 = vld [vmem:[%s1411_s19 + $0x14] sm:$0xf]  ;;  %v1032_v35 = vld [vmem:[%s1411_s19 + $0x18] sm:$0xf0]  ;;  %v1115_v37 = vor.u32 %v1182_v29, %v1112_v30 }
  0x51   : > { %584 = vmatpush.bf16.msra.mxu1 %v1059_v5  ;;  %719 = vmatpush.bf16.msra.mxu3 %v1131_v13  ;;  %v1102_v38 = vld [vmem:[%s1425_s20 + $0x20] sm:$0xf]  ;;  %v1031_v39 = vor.u32 %v1163_v33, %v1030_v32  ;;  %v1181_v40 = vld [vmem:[%s1425_s20 + $0x24] sm:$0xf0]  ;;  %v1180_v41 = vld [vmem:[%s1425_s20 + $0x24] sm:$0xf]  ;;  %v1035_v43 = vor.u32 %v1162_v34, %v1032_v35 }
  0x52   : > { %v1104_v42 = vld [vmem:[%s1425_s20 + $0x28] sm:$0xf0]  ;;  %v1022_v44 = vld [vmem:[%s1411_s19] sm:$0xf]  ;;  %v1161_v45 = vld [vmem:[%s1411_s19 + $0x4] sm:$0xf0]  ;;  %v1103_v48 = vor.u32 %v1181_v40, %v1102_v38 }
  0x53   : > { %v1160_v46 = vld [vmem:[%s1411_s19 + $0x4] sm:$0xf]  ;;  %v1024_v47 = vld [vmem:[%s1411_s19 + $0x8] sm:$0xf0]  ;;  %v1107_v49 = vor.u32 %v1180_v41, %v1104_v42  ;;  %v1023_v50 = vor.u32 %v1161_v45, %v1022_v44  ;;  %v1094_v51 = vld [vmem:[%s1425_s20 + $0x10] sm:$0xf] }
  0x54   : > { %571 = vmatpush.bf16.msra.mxu0 %v1047_v15  ;;  %706 = vmatpush.bf16.msra.mxu2 %v1119_v24  ;;  %v1179_v52 = vld [vmem:[%s1425_s20 + $0x14] sm:$0xf0]  ;;  %v1027_v53 = vor.u32 %v1160_v46, %v1024_v47  ;;  %v1178_v54 = vld [vmem:[%s1425_s20 + $0x14] sm:$0xf]  ;;  %v1096_v55 = vld [vmem:[%s1425_s20 + $0x18] sm:$0xf0] }
  0x55   : > { %585 = vmatpush.bf16.msra.mxu1 %v1051_v19  ;;  %720 = vmatpush.bf16.msra.mxu3 %v1123_v25  ;;  %v1159_v56 = vld [vmem:[%s1520_s0] sm:$0xff]  ;;  %v1095_v57 = vor.u32 %v1179_v52, %v1094_v51  ;;  %v1099_v58 = vor.u32 %v1178_v54, %v1096_v55  ;;  %v1177_v60 = vld [vmem:[%s1425_s20 + $0x4] sm:$0xf0]  ;;  %v1088_v62 = vld [vmem:[%s1425_s20 + $0x8] sm:$0xf0]  ;;  %s1192_s26 = sshll.u32 (%p1348_p6), %s1279_s14, 3 }
  0x56   : > { %v1086_v59 = vld [vmem:[%s1425_s20] sm:$0xf]  ;;  %v1176_v61 = vld [vmem:[%s1425_s20 + $0x4] sm:$0xf]  ;;  %s850_s29 = scalar_lea.vmem (%p1348_p6), %s1523_s3, %s1192_s26 }
  0x57   : > { %v1087_v63 = vor.u32 %v1177_v60, %v1086_v59  ;;  %v1091_v0 = vor.u32 %v1176_v61, %v1088_v62 }
  0x58   : > { %572 = vmatpush.bf16.msra.mxu0 %v1039_v27  ;;  %707 = vmatpush.bf16.msra.mxu2 %v1111_v36 }
  0x59   : > { %586 = vmatpush.bf16.msra.mxu1 %v1043_v31  ;;  %721 = vmatpush.bf16.msra.mxu3 %v1115_v37 }
  0x5c   : > { %573 = vmatpush.bf16.msra.mxu0 %v1031_v39  ;;  %708 = vmatpush.bf16.msra.mxu2 %v1103_v48 }
  0x5d   : > { %587 = vmatpush.bf16.msra.mxu1 %v1035_v43  ;;  %722 = vmatpush.bf16.msra.mxu3 %v1107_v49 }
  0x60   : > { %574 = vmatpush.bf16.msra.mxu0 %v1023_v50  ;;  %709 = vmatpush.bf16.msra.mxu2 %v1095_v57 }
  0x61   : > { %588 = vmatpush.bf16.msra.mxu1 %v1027_v53  ;;  %723 = vmatpush.bf16.msra.mxu3 %v1099_v58 }
  0x63   : > { %575 = vmatmul.bf16.vlgmr.msra.gmra.mxu0 %v1159_v56 }
  0x64   : > { %589 = vmatmul.bf16.vlgmr.msra.gmra.mxu1 %v1159_v56  ;;  %710 = vmatpush.bf16.msra.mxu2 %v1087_v63 }
  0x65   : > { %724 = vmatpush.bf16.msra.mxu3 %v1091_v0 }
  0x67   : > { %711 = vmatmul.bf16.vlgmr.msra.gmra.mxu2 %v1159_v56 }
  0x68   : > { %725 = vmatmul.bf16.vlgmr.msra.gmra.mxu3 %v1159_v56 }
  0xe0   : > { %v576_v1 = vpop.f32.mrf.mxu0 }
  0xe1   : > { %v1148_v2 = vmul.f32 -1.442695, %v576_v1  ;;  %v590_v3 = vpop.f32.mrf.mxu1 }
  0xe2   : > { %v1149_v4 = vmul.f32 -1.442695, %v590_v3 }
  0xe3   : > { %1233 = vpow2.f32 %v1148_v2 }
  0xe4   : > { %1235 = vpow2.f32 %v1149_v4 }
  0xe8   : > { %v1482_v5 = vpop.f32.mrf.mxu0 }
  0xe9   : > { %v1234_v6 = vpop.eup %1233  ;;  %v1150_v7 = vmul.f32 -1.442695, %v1482_v5  ;;  %v1485_v8 = vpop.f32.mrf.mxu1 }
  0xea   : > { %v1236_v9 = vpop.eup %1235  ;;  %v758_v10 = vadd.f32 1.0, %v1234_v6  ;;  %v1151_v11 = vmul.f32 -1.442695, %v1485_v8  ;;  %v712_v43 = vpop.f32.mrf.mxu2 }
  0xeb   : > { %v759_v12 = vadd.f32 1.0, %v1236_v9  ;;  %1237 = vpow2.f32 %v1150_v7  ;;  %v726_v49 = vpop.f32.mrf.mxu3 }
  0xec   : > { %1239 = vrcp.f32 %v758_v10  ;;  %v771_v22 = vand.u32 2147483647, %v758_v10  ;;  %v773_v23 = vand.u32 2147483648, %v758_v10  ;;  %vm767_vm2 = vweird.f32 %v758_v10 }
  0xed   : > { %1241 = vrcp.f32 %v759_v12  ;;  %v788_v26 = vand.u32 2147483648, %v759_v12  ;;  %v786_v28 = vand.u32 2147483647, %v759_v12  ;;  %vm782_vm4 = vweird.f32 %v759_v12 }
  0xee   : > { %1243 = vpow2.f32 %v1151_v11  ;;  %v774_v31 = vor.u32 1.1754944e-38, %v773_v23  ;;  %vm772_vm5 = vcmp.eq.f32.partialorder %v771_v22, 8.507059e+37 }
  0xef   : > { %v789_v34 = vor.u32 1.1754944e-38, %v788_v26  ;;  %vm787_vm7 = vcmp.eq.f32.partialorder %v786_v28, 8.507059e+37 }
  0xf1   : > { %v1238_v13 = vpop.eup %1237 }
  0xf2   : > { %v1240_v14 = vpop.eup %1239  ;;  %v760_v15 = vadd.f32 1.0, %v1238_v13 }
  0xf3   : > { %v1242_v16 = vpop.eup %1241  ;;  %v763_v17 = vmul.f32 %v1240_v14, %v758_v10  ;;  %vm768_vm0 = vweird.f32 %v1240_v14  ;;  %v728_v4 = vpop.f32.mrf.mxu3 }
  0xf4   : > { %v1244_v18 = vpop.eup %1243  ;;  %v778_v19 = vmul.f32 %v1242_v16, %v759_v12  ;;  %1245 = vrcp.f32 %v760_v15  ;;  %vm783_vm1 = vweird.f32 %v1242_v16  ;;  %vm769_vm3 = vmor %vm767_vm2, %vm768_vm0  ;;  %v803_v42 = vand.u32 2147483648, %v760_v15 }
  0xf5   : > { %v764_v20 = vsub.f32 1.0, %v763_v17  ;;  %v1488_v21 = vadd.f32 1.0, %v1244_v18  ;;  %vm784_vm6 = vmor %vm782_vm4, %vm783_vm1  ;;  %v801_v47 = vand.u32 2147483647, %v760_v15  ;;  %vm797_vm9 = vweird.f32 %v760_v15 }
  0xf6   : > { %v779_v24 = vsub.f32 1.0, %v778_v19  ;;  %v804_v53 = vor.u32 1.1754944e-38, %v803_v42 }
  0xf7   : > { %v765_v25 = vmul.f32 %v1240_v14, %v764_v20  ;;  %1247 = vrcp.f32 %v1488_v21  ;;  %v818_v54 = vand.u32 2147483648, %v1488_v21  ;;  %v816_v56 = vand.u32 2147483647, %v1488_v21 }
  0xf8   : > { %v780_v27 = vmul.f32 %v1242_v16, %v779_v24  ;;  %vm802_vm12 = vcmp.eq.f32.partialorder %v801_v47, 8.507059e+37  ;;  %vm812_vm13 = vweird.f32 %v1488_v21 }
  0xf9   : > { %v766_v29 = vadd.f32 %v1240_v14, %v765_v25  ;;  %v819_v62 = vor.u32 1.1754944e-38, %v818_v54  ;;  %vm817_vm15 = vcmp.eq.f32.partialorder %v816_v56, 8.507059e+37 }
  0xfa   : > { %v1246_v30 = vpop.eup %1245  ;;  %v781_v32 = vadd.f32 %v1242_v16, %v780_v27 }
  0xfb   : > { %v770_v33 = vsel %vm769_vm3, %v1240_v14, %v766_v29  ;;  %v793_v35 = vmul.f32 %v1246_v30, %v760_v15  ;;  %vm798_vm8 = vweird.f32 %v1246_v30 }
  0xfc   : > { %v775_v36 = vsel %vm772_vm5, %v774_v31, %v770_v33  ;;  %v785_v37 = vsel %vm784_vm6, %v1242_v16, %v781_v32  ;;  %vm799_vm10 = vmor %vm797_vm9, %vm798_vm8 }
  0xfd   : > { %v1248_v38 = vpop.eup %1247  ;;  %v822_v39 = vmul.f32 %v775_v36, %v576_v1  ;;  %v790_v40 = vsel %vm787_vm7, %v789_v34, %v785_v37  ;;  %v794_v41 = vsub.f32 1.0, %v793_v35  ;;  %v714_v1 = vpop.f32.mrf.mxu2 }
  0xfe   : > { %v823_v44 = vmul.f32 %v790_v40, %v590_v3  ;;  %v808_v45 = vmul.f32 %v1248_v38, %v1488_v21  ;;  %vm813_vm11 = vweird.f32 %v1248_v38 }
  0xff   : > { %v795_v46 = vmul.f32 %v1246_v30, %v794_v41  ;;  %v830_v48 = vmul.f32 %v822_v39, %v712_v43  ;;  %vm814_vm14 = vmor %vm812_vm13, %vm813_vm11 }
 0x100   : > { %v809_v50 = vsub.f32 1.0, %v808_v45  ;;  %v831_v51 = vmul.f32 %v823_v44, %v726_v49 }
 0x101   : > { %v796_v52 = vadd.f32 %v1246_v30, %v795_v46 }
 0x102   : > { %v810_v55 = vmul.f32 %v1248_v38, %v809_v50  ;;  %v834_v57 = vpack.c.bf16 %v831_v51, %v830_v48 }
 0x103   : > { %v800_v58 = vsel %vm799_vm10, %v1246_v30, %v796_v52 }
 0x104   : > { %v805_v59 = vsel %vm802_vm12, %v804_v53, %v800_v58  ;;  %v811_v60 = vadd.f32 %v1248_v38, %v810_v55  ;;  %836 = vst [vmem:[%s431_s12] sm:$0xff] %v834_v57 }
 0x105   : > { %v824_v61 = vmul.f32 %v805_v59, %v1482_v5 }
 0x106   : > { %v815_v63 = vsel %vm814_vm14, %v1248_v38, %v811_v60 }
 0x107   : > { %v820_v0 = vsel %vm817_vm15, %v819_v62, %v815_v63  ;;  %v832_v3 = vmul.f32 %v824_v61, %v714_v1 }
 0x108   : > { %v825_v2 = vmul.f32 %v820_v0, %v1485_v8 }
 0x10a   : > { %v833_v6 = vmul.f32 %v825_v2, %v728_v4  ;;  %844 = sbr.rel (!%p1348_p6) target bundleno = 279 (0x117), region = 120 }
 0x10b   : > { %v881_v9 = vld [vmem:[%s431_s12] sm:$0xff] (%p1348_p6) }
 0x10c   : > { %v835_v7 = vpack.c.bf16 %v833_v6, %v832_v3  ;;  %882 = vst [vmem:[%s850_s29] sm:$0xff] (%p1348_p6), %v881_v9 }
 0x10e   : > { %837 = vst [vmem:[%s431_s12 + $0x8] sm:$0xff] %v835_v7 }
 0x115   : > { %v883_v5 = vld [vmem:[%s431_s12 + $0x8] sm:$0xff] }
 0x116   : > { %884 = vst [vmem:[%s850_s29 + $0x10] sm:$0xff] %v883_v5 }
 0x117 PF: > { %s13_s16 = sadd.s32 1, %s1287_s16   ;;  %s1526_s12 = smov %s1275_s13 }
 0x118   : > { %p10_p11 = scmp.ge.s32.totalorder %s13_s16, 4   ;;  %s1527_s13 = smov %s1353_s23 }
 0x119   : > { %s1528_s14 = smov %s1283_s15  ;;  %s1529_s15 = smov %s1531_s17 }
 0x11a   :  { %12 = sbr.rel (!%p10_p11) target bundleno = 3 (0x3), region = 200 }

// kernel: llama_forward.22
= control target key start
LH: loop header
LB: loop body
LE: loop exit
PB: predicated region body
PF: predicated region fallthrough
CT: control target
= control target key end

     0   :  { %8 = vsyncpa [#allocation4], 0  ;;  %s601_s15 = smov [#allocation3]   ;;  %s602_s17 = smov 64   ;;  %s663_s0 = inlined_call_operand.vmem [shape: bf16[16,512], index: 0, kind: input, shape index: {}]   ;;  %s664_s1 = inlined_call_operand.hbm [shape: bf16[512,128], index: 1, kind: input, shape index: {}]   ;;  %s665_s2 = inlined_call_operand.vmem [shape: f32[16,128], index: 2, kind: input, shape index: {}]   ;;  %s666_s3 = inlined_call_operand.vmem [shape: f32[16,128], index: 3, kind: output, shape index: {}]  }
   0x1   :  { %s15_s14 = sshll.u32 %s664_s1, 4  ;;  %s17_s16 = sshll.u32 %s601_s15, 4  ;;  %s16_s14 = int_to_ptr.hbm [resolvable:$true] %s15_s14  ;;  %s18_s16 = int_to_ptr.vmem [resolvable:$true] %s17_s16 }
   0x2   :  { %s603_s18 = smov 4  }
   0x3   :  { %23 = dma.hbm_to_vmem [thread:$0]  %s16_s14, 4096, %s18_s16, [#allocation4], %s602_s17, %s602_s17, %s603_s18  }
   0x4   :  { %599 = dma.done.wait [#allocation4], 4096  }
   0x5   :  { %600 = vsyncadd [#allocation4], 4294963200  ;;  %v547_v0 = vld [vmem:[#allocation3 + $0x38] sm:$0xff]  ;;  %v546_v4 = vld [vmem:[#allocation3 + $0x30] sm:$0xff] }
   0x6   :  { %v555_v1 = vld [vmem:[#allocation3 + $0x78] sm:$0xff]  ;;  %320 = vmatpush.bf16.msra.mxu0 %v547_v0  ;;  %v554_v5 = vld [vmem:[#allocation3 + $0x70] sm:$0xff]  ;;  %v545_v8 = vld [vmem:[#allocation3 + $0x28] sm:$0xff] }
   0x7   :  { %v563_v2 = vld [vmem:[#allocation3 + $0xb8] sm:$0xff]  ;;  %334 = vmatpush.bf16.msra.mxu1 %v555_v1  ;;  %v562_v6 = vld [vmem:[#allocation3 + $0xb0] sm:$0xff]  ;;  %v553_v9 = vld [vmem:[#allocation3 + $0x68] sm:$0xff] }
   0x8   :  { %v571_v3 = vld [vmem:[#allocation3 + $0xf8] sm:$0xff]  ;;  %348 = vmatpush.bf16.msra.mxu2 %v563_v2  ;;  %v570_v7 = vld [vmem:[#allocation3 + $0xf0] sm:$0xff]  ;;  %v561_v10 = vld [vmem:[#allocation3 + $0xa8] sm:$0xff] }
   0x9   :  { %362 = vmatpush.bf16.msra.mxu3 %v571_v3  ;;  %v569_v11 = vld [vmem:[#allocation3 + $0xe8] sm:$0xff]  ;;  %v544_v12 = vld [vmem:[#allocation3 + $0x20] sm:$0xff]  ;;  %v543_v16 = vld [vmem:[#allocation3 + $0x18] sm:$0xff] }
   0xa   :  { %321 = vmatpush.bf16.msra.mxu0 %v546_v4  ;;  %v552_v13 = vld [vmem:[#allocation3 + $0x60] sm:$0xff]  ;;  %v551_v17 = vld [vmem:[#allocation3 + $0x58] sm:$0xff]  ;;  %v542_v20 = vld [vmem:[#allocation3 + $0x10] sm:$0xff] }
   0xb   :  { %335 = vmatpush.bf16.msra.mxu1 %v554_v5  ;;  %v560_v14 = vld [vmem:[#allocation3 + $0xa0] sm:$0xff]  ;;  %v559_v18 = vld [vmem:[#allocation3 + $0x98] sm:$0xff]  ;;  %v550_v21 = vld [vmem:[#allocation3 + $0x50] sm:$0xff] }
   0xc   :  { %349 = vmatpush.bf16.msra.mxu2 %v562_v6  ;;  %v568_v15 = vld [vmem:[#allocation3 + $0xe0] sm:$0xff]  ;;  %v567_v19 = vld [vmem:[#allocation3 + $0xd8] sm:$0xff]  ;;  %v558_v22 = vld [vmem:[#allocation3 + $0x90] sm:$0xff] }
   0xd   :  { %363 = vmatpush.bf16.msra.mxu3 %v570_v7  ;;  %v566_v23 = vld [vmem:[#allocation3 + $0xd0] sm:$0xff]  ;;  %v541_v24 = vld [vmem:[#allocation3 + $0x8] sm:$0xff]  ;;  %v540_v28 = vld [vmem:[#allocation3] sm:$0xff] }
   0xe   :  { %322 = vmatpush.bf16.msra.mxu0 %v545_v8  ;;  %v549_v25 = vld [vmem:[#allocation3 + $0x48] sm:$0xff]  ;;  %v548_v29 = vld [vmem:[#allocation3 + $0x40] sm:$0xff]  ;;  %v538_v33 = vld [vmem:[%s663_s0 + $0xc] sm:$0xf0] }
   0xf   :  { %336 = vmatpush.bf16.msra.mxu1 %v553_v9  ;;  %v557_v26 = vld [vmem:[#allocation3 + $0x88] sm:$0xff]  ;;  %v556_v30 = vld [vmem:[#allocation3 + $0x80] sm:$0xff]  ;;  %v396_v35 = vld [vmem:[%s663_s0 + $0x10] sm:$0xf0] }
  0x10   :  { %350 = vmatpush.bf16.msra.mxu2 %v561_v10  ;;  %v565_v27 = vld [vmem:[#allocation3 + $0xc8] sm:$0xff]  ;;  %v564_v31 = vld [vmem:[#allocation3 + $0xc0] sm:$0xff]  ;;  %v539_v37 = vld [vmem:[%s663_s0 + $0x14] sm:$0xf0] }
  0x11   :  { %364 = vmatpush.bf16.msra.mxu3 %v569_v11  ;;  %v394_v32 = vld [vmem:[%s663_s0] sm:$0xf]  ;;  %v536_v34 = vld [vmem:[%s663_s0 + $0x4] sm:$0xf]  ;;  %v402_v36 = vld [vmem:[%s663_s0 + $0x8] sm:$0xf] }
  0x12   :  { %323 = vmatpush.bf16.msra.mxu0 %v544_v12  ;;  %v537_v38 = vld [vmem:[%s663_s0 + $0xc] sm:$0xf]  ;;  %v404_v39 = vld [vmem:[%s663_s0 + $0x18] sm:$0xf0]  ;;  %v395_v40 = vor.u32 %v538_v33, %v394_v32  ;;  %v399_v41 = vor.u32 %v536_v34, %v396_v35  ;;  %v403_v42 = vor.u32 %v539_v37, %v402_v36  ;;  %v34_v50 = vld [vmem:[%s665_s2] sm:$0xff] }
  0x13   :  { %337 = vmatpush.bf16.msra.mxu1 %v552_v13  ;;  %v407_v43 = vor.u32 %v537_v38, %v404_v39  ;;  %v35_v58 = vld [vmem:[%s665_s2 + $0x8] sm:$0xff] }
  0x14   :  { %351 = vmatpush.bf16.msra.mxu2 %v560_v14 }
  0x15   :  { %365 = vmatpush.bf16.msra.mxu3 %v568_v15 }
  0x16   :  { %324 = vmatpush.bf16.msra.mxu0 %v543_v16 }
  0x17   :  { %338 = vmatpush.bf16.msra.mxu1 %v551_v17 }
  0x18   :  { %352 = vmatpush.bf16.msra.mxu2 %v559_v18 }
  0x19   :  { %366 = vmatpush.bf16.msra.mxu3 %v567_v19 }
  0x1a   :  { %325 = vmatpush.bf16.msra.mxu0 %v542_v20 }
  0x1b   :  { %339 = vmatpush.bf16.msra.mxu1 %v550_v21 }
  0x1c   :  { %353 = vmatpush.bf16.msra.mxu2 %v558_v22 }
  0x1d   :  { %367 = vmatpush.bf16.msra.mxu3 %v566_v23 }
  0x1e   :  { %326 = vmatpush.bf16.msra.mxu0 %v541_v24 }
  0x1f   :  { %340 = vmatpush.bf16.msra.mxu1 %v549_v25 }
  0x20   :  { %354 = vmatpush.bf16.msra.mxu2 %v557_v26 }
  0x21   :  { %368 = vmatpush.bf16.msra.mxu3 %v565_v27 }
  0x22   :  { %327 = vmatpush.bf16.msra.mxu0 %v540_v28 }
  0x23   :  { %341 = vmatpush.bf16.msra.mxu1 %v548_v29 }
  0x24   :  { %355 = vmatpush.bf16.msra.mxu2 %v556_v30 }
  0x25   :  { %369 = vmatpush.bf16.msra.mxu3 %v564_v31  ;;  %328 = vmatmul.bf16.vlgmr.msra.gmra.mxu0 %v395_v40 }
  0x26   :  { %342 = vmatmul.bf16.vlgmr.msra.gmra.mxu1 %v399_v41 }
  0x27   :  { %356 = vmatmul.bf16.vlgmr.msra.gmra.mxu2 %v403_v42 }
  0x28   :  { %370 = vmatmul.bf16.vlgmr.msra.gmra.mxu3 %v407_v43 }
  0xa2   :  { %v329_v44 = vpop.f32.mrf.mxu0 }
  0xa3   :  { %v343_v45 = vpop.f32.mrf.mxu1 }
  0xa4   :  { %v344_v46 = vadd.f32 %v343_v45, %v329_v44 }
  0xaa   :  { %v357_v47 = vpop.f32.mrf.mxu2  ;;  %v331_v52 = vpop.f32.mrf.mxu0 }
  0xab   :  { %v371_v48 = vpop.f32.mrf.mxu3  ;;  %v358_v49 = vadd.f32 %v357_v47, %v344_v46  ;;  %v345_v53 = vpop.f32.mrf.mxu1 }
  0xac   :  { %v346_v55 = vadd.f32 %v345_v53, %v331_v52 }
  0xad   :  { %v372_v51 = vadd.f32 %v371_v48, %v358_v49 }
  0xaf   :  { %v376_v54 = vadd.f32 %v372_v51, %v34_v50 }
  0xb1   :  { %385 = vst [vmem:[%s666_s3] sm:$0xff] %v376_v54 }
  0xb2   :  { %v359_v56 = vpop.f32.mrf.mxu2 }
  0xb3   :  { %v360_v57 = vadd.f32 %v359_v56, %v346_v55  ;;  %v373_v59 = vpop.f32.mrf.mxu3 }
  0xb5   :  { %v374_v60 = vadd.f32 %v373_v59, %v360_v57 }
  0xb7   :  { %v377_v61 = vadd.f32 %v374_v60, %v35_v58 }
  0xb9   :  { %386 = vst [vmem:[%s666_s3 + $0x8] sm:$0xff] %v377_v61 }
  0xba   :  { %391 = vsyncpa [#allocation4], 1 }

// kernel: llama_forward.26
= control target key start
LH: loop header
LB: loop body
LE: loop exit
PB: predicated region body
PF: predicated region fallthrough
CT: control target
= control target key end

     0   :  { %s229_s1 = inlined_call_operand.vmem [shape: bf16[128,128], index: 1, kind: input, shape index: {}]   ;;  %s230_s0 = inlined_call_operand.vmem [shape: bf16[16,128], index: 0, kind: input, shape index: {}]   ;;  %s231_s2 = inlined_call_operand.vmem [shape: f32[16,128], index: 2, kind: input, shape index: {}]   ;;  %s232_s3 = inlined_call_operand.vmem [shape: f32[16,128], index: 3, kind: output, shape index: {}]  }
   0x1   :  { %v169_v0 = vld [vmem:[%s229_s1 + $0x38] sm:$0xff]  ;;  %v168_v1 = vld [vmem:[%s229_s1 + $0x30] sm:$0xff]  ;;  %v167_v2 = vld [vmem:[%s229_s1 + $0x28] sm:$0xff] }
   0x2   :  { %96 = vmatpush.bf16.msra.mxu0 %v169_v0  ;;  %v166_v3 = vld [vmem:[%s229_s1 + $0x20] sm:$0xff]  ;;  %v165_v4 = vld [vmem:[%s229_s1 + $0x18] sm:$0xff]  ;;  %v164_v5 = vld [vmem:[%s229_s1 + $0x10] sm:$0xff] }
   0x3   :  { %v163_v6 = vld [vmem:[%s229_s1 + $0x8] sm:$0xff]  ;;  %v162_v7 = vld [vmem:[%s229_s1] sm:$0xff] }
   0x4   :  { %v161_v8 = vld [vmem:[%s230_s0] sm:$0xff]  ;;  %v19_v12 = vld [vmem:[%s231_s2 + $0x8] sm:$0xff] }
   0x5   :  { %v18_v9 = vld [vmem:[%s231_s2] sm:$0xff] }
   0x6   :  { %97 = vmatpush.bf16.msra.mxu0 %v168_v1 }
   0xa   :  { %98 = vmatpush.bf16.msra.mxu0 %v167_v2 }
   0xe   :  { %99 = vmatpush.bf16.msra.mxu0 %v166_v3 }
  0x12   :  { %100 = vmatpush.bf16.msra.mxu0 %v165_v4 }
  0x16   :  { %101 = vmatpush.bf16.msra.mxu0 %v164_v5 }
  0x1a   :  { %102 = vmatpush.bf16.msra.mxu0 %v163_v6 }
  0x1e   :  { %103 = vmatpush.bf16.msra.mxu0 %v162_v7 }
  0x21   :  { %104 = vmatmul.bf16.vlgmr.msra.gmra.mxu0 %v161_v8 }
  0x9e   :  { %v105_v10 = vpop.f32.mrf.mxu0 }
  0x9f   :  { %v110_v11 = vadd.f32 %v105_v10, %v18_v9 }
  0xa1   :  { %119 = vst [vmem:[%s232_s3] sm:$0xff] %v110_v11 }
  0xa6   :  { %v107_v13 = vpop.f32.mrf.mxu0 }
  0xa7   :  { %v111_v14 = vadd.f32 %v107_v13, %v19_v12 }
  0xa9   :  { %120 = vst [vmem:[%s232_s3 + $0x8] sm:$0xff] %v111_v14 }

// kernel: llama_forward.31
= control target key start
LH: loop header
LB: loop body
LE: loop exit
PB: predicated region body
PF: predicated region fallthrough
CT: control target
= control target key end

     0   :  { %s427_s0 = inlined_call_operand.vmem [shape: bf16[16,128], index: 0, kind: input, shape index: {}]   ;;  %s428_s1 = inlined_call_operand.vmem [shape: bf16[128,256], index: 1, kind: input, shape index: {}]   ;;  %s429_s2 = inlined_call_operand.hbm [shape: f32[16,256], index: 2, kind: output, shape index: {}]  }
   0x1   :  { %v255_v0 = vld [vmem:[%s428_s1 + $0x70] sm:$0xf]  ;;  %v277_v1 = vld [vmem:[%s428_s1 + $0x74] sm:$0xf0]  ;;  %v276_v2 = vld [vmem:[%s428_s1 + $0x74] sm:$0xf] }
   0x2   :  { %v256_v3 = vor.u32 %v277_v1, %v255_v0  ;;  %v257_v4 = vld [vmem:[%s428_s1 + $0x78] sm:$0xf0]  ;;  %v247_v5 = vld [vmem:[%s428_s1 + $0x60] sm:$0xf]  ;;  %v275_v6 = vld [vmem:[%s428_s1 + $0x64] sm:$0xf0] }
   0x3   :  { %v260_v7 = vor.u32 %v276_v2, %v257_v4  ;;  %v274_v8 = vld [vmem:[%s428_s1 + $0x64] sm:$0xf]  ;;  %v249_v9 = vld [vmem:[%s428_s1 + $0x68] sm:$0xf0]  ;;  %v248_v10 = vor.u32 %v275_v6, %v247_v5  ;;  %v239_v12 = vld [vmem:[%s428_s1 + $0x50] sm:$0xf] }
   0x4   :  { %128 = vmatpush.bf16.msra.mxu0 %v256_v3  ;;  %v252_v11 = vor.u32 %v274_v8, %v249_v9  ;;  %v273_v13 = vld [vmem:[%s428_s1 + $0x54] sm:$0xf0]  ;;  %v272_v14 = vld [vmem:[%s428_s1 + $0x54] sm:$0xf]  ;;  %v241_v15 = vld [vmem:[%s428_s1 + $0x58] sm:$0xf0] }
   0x5   :  { %142 = vmatpush.bf16.msra.mxu1 %v260_v7  ;;  %v240_v16 = vor.u32 %v273_v13, %v239_v12  ;;  %v244_v17 = vor.u32 %v272_v14, %v241_v15  ;;  %v231_v18 = vld [vmem:[%s428_s1 + $0x40] sm:$0xf]  ;;  %v271_v19 = vld [vmem:[%s428_s1 + $0x44] sm:$0xf0]  ;;  %v270_v20 = vld [vmem:[%s428_s1 + $0x44] sm:$0xf] }
   0x6   :  { %v233_v21 = vld [vmem:[%s428_s1 + $0x48] sm:$0xf0]  ;;  %v232_v22 = vor.u32 %v271_v19, %v231_v18 }
   0x8   :  { %129 = vmatpush.bf16.msra.mxu0 %v248_v10 }
   0x9   :  { %143 = vmatpush.bf16.msra.mxu1 %v252_v11 }
   0xc   :  { %130 = vmatpush.bf16.msra.mxu0 %v240_v16 }
   0xd   :  { %7 = vsyncpa [#allocation4], 0  ;;  %144 = vmatpush.bf16.msra.mxu1 %v244_v17  ;;  %v236_v23 = vor.u32 %v270_v20, %v233_v21  ;;  %v223_v24 = vld [vmem:[%s428_s1 + $0x30] sm:$0xf]  ;;  %v269_v25 = vld [vmem:[%s428_s1 + $0x34] sm:$0xf0] }
   0xe   :  { %v268_v26 = vld [vmem:[%s428_s1 + $0x34] sm:$0xf]  ;;  %v225_v27 = vld [vmem:[%s428_s1 + $0x38] sm:$0xf0]  ;;  %v224_v28 = vor.u32 %v269_v25, %v223_v24  ;;  %v215_v30 = vld [vmem:[%s428_s1 + $0x20] sm:$0xf] }
   0xf   :  { %v228_v29 = vor.u32 %v268_v26, %v225_v27  ;;  %v267_v31 = vld [vmem:[%s428_s1 + $0x24] sm:$0xf0]  ;;  %v266_v32 = vld [vmem:[%s428_s1 + $0x24] sm:$0xf]  ;;  %v217_v33 = vld [vmem:[%s428_s1 + $0x28] sm:$0xf0] }
  0x10   :  { %131 = vmatpush.bf16.msra.mxu0 %v232_v22  ;;  %v216_v34 = vor.u32 %v267_v31, %v215_v30  ;;  %v220_v35 = vor.u32 %v266_v32, %v217_v33  ;;  %v207_v36 = vld [vmem:[%s428_s1 + $0x10] sm:$0xf]  ;;  %v265_v37 = vld [vmem:[%s428_s1 + $0x14] sm:$0xf0]  ;;  %v264_v38 = vld [vmem:[%s428_s1 + $0x14] sm:$0xf] }
  0x11   :  { %145 = vmatpush.bf16.msra.mxu1 %v236_v23  ;;  %v209_v39 = vld [vmem:[%s428_s1 + $0x18] sm:$0xf0]  ;;  %v208_v40 = vor.u32 %v265_v37, %v207_v36  ;;  %v199_v42 = vld [vmem:[%s428_s1] sm:$0xf]  ;;  %v263_v43 = vld [vmem:[%s428_s1 + $0x4] sm:$0xf0] }
  0x12   :  { %v212_v41 = vor.u32 %v264_v38, %v209_v39  ;;  %v262_v44 = vld [vmem:[%s428_s1 + $0x4] sm:$0xf]  ;;  %v201_v45 = vld [vmem:[%s428_s1 + $0x8] sm:$0xf0]  ;;  %v200_v46 = vor.u32 %v263_v43, %v199_v42  ;;  %s307_s19 = smov [#allocation3]   ;;  %s181_s22 = sshll.u32 %s429_s2, 4  ;;  %s182_s22 = int_to_ptr.hbm [resolvable:$true] %s181_s22 }
  0x13   :  { %v204_v47 = vor.u32 %v262_v44, %v201_v45  ;;  %v261_v48 = vld [vmem:[%s427_s0] sm:$0xff]  ;;  %s179_s20 = sshll.u32 %s307_s19, 4  ;;  %s308_s0 = smov 256   ;;  %s180_s20 = int_to_ptr.vmem [resolvable:$true] %s179_s20 }
  0x14   :  { %132 = vmatpush.bf16.msra.mxu0 %v224_v28  ;;  %s309_s23 = smov 16  }
  0x15   :  { %146 = vmatpush.bf16.msra.mxu1 %v228_v29 }
  0x18   :  { %133 = vmatpush.bf16.msra.mxu0 %v216_v34 }
  0x19   :  { %147 = vmatpush.bf16.msra.mxu1 %v220_v35 }
  0x1c   :  { %134 = vmatpush.bf16.msra.mxu0 %v208_v40 }
  0x1d   :  { %148 = vmatpush.bf16.msra.mxu1 %v212_v41 }
  0x20   :  { %135 = vmatpush.bf16.msra.mxu0 %v200_v46 }
  0x21   :  { %149 = vmatpush.bf16.msra.mxu1 %v204_v47 }
  0x23   :  { %136 = vmatmul.bf16.vlgmr.msra.gmra.mxu0 %v261_v48 }
  0x24   :  { %150 = vmatmul.bf16.vlgmr.msra.gmra.mxu1 %v261_v48 }
  0xa0   :  { %v137_v49 = vpop.f32.mrf.mxu0 }
  0xa1   :  { %171 = vst [vmem:[#allocation3] sm:$0xff] %v137_v49  ;;  %v151_v50 = vpop.f32.mrf.mxu1 }
  0xa2   :  { %172 = vst [vmem:[#allocation3 + $0x8] sm:$0xff] %v151_v50 }
  0xa8   :  { %v139_v51 = vpop.f32.mrf.mxu0 }
  0xa9   :  { %173 = vst [vmem:[#allocation3 + $0x10] sm:$0xff] %v139_v51  ;;  %v153_v52 = vpop.f32.mrf.mxu1 }
  0xaa   :  { %174 = vst [vmem:[#allocation3 + $0x18] sm:$0xff] %v153_v52 }
  0xab   :  { %187 = dma.vmem_to_hbm [thread:$0]  %s180_s20, 512, %s182_s22, [#allocation4], %s308_s0, %s308_s0, %s309_s23  }
  0xac   :  { %305 = dma.done.wait [#allocation4], 512  }
  0xad   :  { %306 = vsyncadd [#allocation4], 4294966784 }
  0xae   :  { %192 = vsyncpa [#allocation4], 1 }

// kernel: llama_forward.28
= control target key start
LH: loop header
LB: loop body
LE: loop exit
PB: predicated region body
PF: predicated region fallthrough
CT: control target
= control target key end

     0   :  { %8 = vsyncpa [#allocation6], 0  ;;  %s1505_s0 = inlined_call_operand.vmem [shape: bf16[16,128], index: 0, kind: input, shape index: {}]   ;;  %s1506_s1 = inlined_call_operand.vmem [shape: bf16[128,512], index: 1, kind: input, shape index: {}]   ;;  %s1507_s2 = inlined_call_operand.hbm [shape: bf16[128,512], index: 2, kind: input, shape index: {}]   ;;  %s1508_s3 = inlined_call_operand.vmem [shape: bf16[16,512], index: 3, kind: output, shape index: {}]  }
   0x1   :  { %10 = vsyncpa [#allocation6 + $0x1], 0  ;;  %s1296_s12 = smov 0   ;;  %s1298_s13 = smov 0  }
   0x2   :  { %s1300_s14 = smov 0   ;;  %s1302_s15 = smov 0  }
   0x3   :  { %s1304_s16 = smov 0   ;;  %s1306_s17 = smov 0  }
   0x4 LB: > { %s932_s18 = sadd.s32 4294967295, %s1271_s17   ;;  %s31_s19 = sadd.s32 1, %s1267_s16  ;;  %s1271_s17 = sphi %s1306_s17, %s16_s17   ;;  %s1267_s16 = sphi %s1304_s16, %s1516_s16   ;;  %s1263_s15 = sphi %s1302_s15, %s1515_s15   ;;  %s1259_s14 = sphi %s1300_s14, %s1514_s14   ;;  %s1255_s13 = sphi %s1298_s13, %s1513_s13   ;;  %s1251_s12 = sphi %s1296_s12, %s1512_s12  }
   0x5   : > { %p33_p0 = scmp.ge.s32.totalorder %s31_s19, 2  ;;  %s72_s20 = sadd.s32 1, %s1259_s14 }
   0x6   : > { %p79_p1 = scmp.ne.s32.totalorder %s1259_s14, %s1255_s13  ;;  %p80_p2 = scmp.eq.s32.totalorder %s1271_s17, 0 }
   0x7   : > { %s1518_s19 = smov (%p33_p0, %s31_s19), 0  ;;  %p113_p4 = scmp.ne.s32.totalorder %s1255_s13, %s1251_s12 }
   0x8   : > { %p1332_p3 = por %p80_p2, %p79_p1  ;;  %s68_s22 = ssub.s32 %s1267_s16, %s1518_s19 }
   0x9   : > { %p114_p5 = scmp.eq.s32.totalorder %s932_s18, 0  ;;  %p70_p6 = scmp.eq.s32.totalorder %s68_s22, 0 }
   0xa   : > { %p139_p7 = scmp.eq.s32.totalorder %s932_s18, 1  ;;  %p936_p10 = scmp.ge.s32.totalorder %s1271_s17, 2 }
   0xb   : > { %p1339_p8 = por %p114_p5, %p113_p4 }
   0xc   : > { %s1344_s24 = scalar_select %p70_p6, %s1259_s14, %s72_s20  }
   0xd   : > { %p1346_p9 = por %p139_p7, %p79_p1  ;;  %173 = sbr.rel (%p936_p10) target bundleno = 45 (0x2d), region = 20 }
  0x12   : > { %176 = sbr.rel (!%p1332_p3) target bundleno = 38 (0x26), region = 24  ;;  %s178_s26 = sand.u32 (%p1332_p3), 1, %s1259_s14  }
  0x13   : > { %s1088_s27 = sshll.u32 (%p1332_p3), %s1267_s16, 3  ;;  %s937_s28 = sshll.u32 (%p1332_p3), %s178_s26, 7 }
  0x14   : > { %s1358_s4 = scalar_lea.vmem (%p1332_p3), %s1506_s1, %s1088_s27  ;;  %s180_s5 = scalar_lea.vmem (%p1332_p3), [#allocation4], %s937_s28 }
  0x15   : > { %v245_v0 = vld [vmem:[%s1358_s4] sm:$0xff] (%p1332_p3)  ;;  %v247_v1 = vld [vmem:[%s1358_s4 + $0x10] sm:$0xff] (%p1332_p3) }
  0x16   : > { %v249_v2 = vld [vmem:[%s1358_s4 + $0x20] sm:$0xff] (%p1332_p3)  ;;  %246 = vst [vmem:[%s180_s5] sm:$0xff] (%p1332_p3), %v245_v0  ;;  %v251_v3 = vld [vmem:[%s1358_s4 + $0x30] sm:$0xff] (%p1332_p3) }
  0x17   : > { %248 = vst [vmem:[%s180_s5 + $0x8] sm:$0xff] %v247_v1  ;;  %v253_v4 = vld [vmem:[%s1358_s4 + $0x40] sm:$0xff]  ;;  %v255_v5 = vld [vmem:[%s1358_s4 + $0x50] sm:$0xff] }
  0x18   : > { %250 = vst [vmem:[%s180_s5 + $0x10] sm:$0xff] %v249_v2  ;;  %v257_v6 = vld [vmem:[%s1358_s4 + $0x60] sm:$0xff]  ;;  %v259_v7 = vld [vmem:[%s1358_s4 + $0x70] sm:$0xff] }
  0x19   : > { %252 = vst [vmem:[%s180_s5 + $0x18] sm:$0xff] %v251_v3  ;;  %v261_v8 = vld [vmem:[%s1358_s4 + $0x80] sm:$0xff]  ;;  %v263_v9 = vld [vmem:[%s1358_s4 + $0x90] sm:$0xff] }
  0x1a   : > { %254 = vst [vmem:[%s180_s5 + $0x20] sm:$0xff] %v253_v4  ;;  %v265_v10 = vld [vmem:[%s1358_s4 + $0xa0] sm:$0xff]  ;;  %v267_v11 = vld [vmem:[%s1358_s4 + $0xb0] sm:$0xff] }
  0x1b   : > { %256 = vst [vmem:[%s180_s5 + $0x28] sm:$0xff] %v255_v5  ;;  %v269_v12 = vld [vmem:[%s1358_s4 + $0xc0] sm:$0xff]  ;;  %v271_v13 = vld [vmem:[%s1358_s4 + $0xd0] sm:$0xff] }
  0x1c   : > { %258 = vst [vmem:[%s180_s5 + $0x30] sm:$0xff] %v257_v6  ;;  %v273_v14 = vld [vmem:[%s1358_s4 + $0xe0] sm:$0xff]  ;;  %v275_v15 = vld [vmem:[%s1358_s4 + $0xf0] sm:$0xff] }
  0x1d   : > { %260 = vst [vmem:[%s180_s5 + $0x38] sm:$0xff] %v259_v7 }
  0x1e   : > { %262 = vst [vmem:[%s180_s5 + $0x40] sm:$0xff] %v261_v8 }
  0x1f   : > { %264 = vst [vmem:[%s180_s5 + $0x48] sm:$0xff] %v263_v9 }
  0x20   : > { %266 = vst [vmem:[%s180_s5 + $0x50] sm:$0xff] %v265_v10 }
  0x21   : > { %268 = vst [vmem:[%s180_s5 + $0x58] sm:$0xff] %v267_v11 }
  0x22   : > { %270 = vst [vmem:[%s180_s5 + $0x60] sm:$0xff] %v269_v12 }
  0x23   : > { %272 = vst [vmem:[%s180_s5 + $0x68] sm:$0xff] %v271_v13 }
  0x24   : > { %274 = vst [vmem:[%s180_s5 + $0x70] sm:$0xff] %v273_v14 }
  0x25   : > { %276 = vst [vmem:[%s180_s5 + $0x78] sm:$0xff] %v275_v15 }
  0x26 PF: > { %s283_s6 = sand.u32 1, %s1259_s14   ;;  %s1089_s7 = sshll.u32 %s1267_s16, 3 }
  0x27   : > { %s940_s8 = sshll.u32 %s283_s6, 7  ;;  %s295_s11 = scalar_lea.hbm %s1507_s2, %s1089_s7 }
  0x28   : > { %s296_s12 = sshll.u32 %s295_s11, 4  ;;  %s287_s18 = scalar_lea.vmem [#allocation5], %s940_s8  ;;  %s297_s12 = int_to_ptr.hbm [resolvable:$true] %s296_s12 }
  0x29   : > { %s298_s20 = sshll.u32 %s287_s18, 4  ;;  %s284_s22 = scalar_lea.sflag [#allocation6], %s283_s6  ;;  %s299_s20 = int_to_ptr.vmem [resolvable:$true] %s298_s20 }
  0x2a   : > { %s1273_s26 = smov 256   ;;  %s1274_s27 = smov 128  }
  0x2b   : > { %s1275_s28 = smov 8  }
  0x2c   : > { %1124 = dma.hbm_to_vmem [thread:$0]  (%p1332_p3), %s297_s12, 2048, %s299_s20, %s284_s22, %s1273_s26, %s1274_s27, %s1275_s28  }
  0x2d PF: > { %p943_p11 = scmp.ge.s32.totalorder %s1271_s17, 1  ;;  %p306_p12 = scmp.lt.s32.totalorder %s1271_s17, 3 }
  0x2f   : > { %p307_p13 = pnand %p943_p11, %p306_p12 }
  0x30   : > { %s1386_s29 = sand.u32 (!%p307_p13), 1, %s1255_s13  }
  0x31   : > { %310 = sbr.rel (%p307_p13) target bundleno = 269 (0x10d), region = 66  ;;  %s944_s30 = sshll.u32 (!%p307_p13), %s1386_s29, 7 }
  0x32   : > { %s1389_s4 = scalar_lea.vmem (!%p307_p13), [#allocation4], %s944_s30  ;;  %s320_s5 = scalar_lea.sflag (!%p307_p13), [#allocation6], %s1386_s29 }
  0x33   : > { %s1392_s6 = scalar_lea.vmem (!%p307_p13), [#allocation5], %s944_s30 }
  0x36   : > { %1246 = dma.done.wait (%p1339_p8), %s320_s5, 2048  }
  0x37   : > { %1248 = vsyncadd (%p1339_p8), %s320_s5, 4294965248  ;;  %v1009_v16 = vld [vmem:[%s1389_s4 + $0x70] sm:$0xf]  ;;  %v1106_v17 = vld [vmem:[%s1389_s4 + $0x74] sm:$0xf0]  ;;  %s946_s7 = sshll.u32 %s1386_s29, 4 }
  0x38   : > { %v1105_v18 = vld [vmem:[%s1389_s4 + $0x74] sm:$0xf]  ;;  %v1010_v19 = vor.u32 %v1106_v17, %v1009_v16  ;;  %v1011_v20 = vld [vmem:[%s1389_s4 + $0x78] sm:$0xf0]  ;;  %v1001_v21 = vld [vmem:[%s1389_s4 + $0x60] sm:$0xf] }
  0x39   : > { %v1104_v22 = vld [vmem:[%s1389_s4 + $0x64] sm:$0xf0]  ;;  %v1014_v23 = vor.u32 %v1105_v18, %v1011_v20  ;;  %v1103_v24 = vld [vmem:[%s1389_s4 + $0x64] sm:$0xf]  ;;  %v1003_v25 = vld [vmem:[%s1389_s4 + $0x68] sm:$0xf0] }
  0x3a   : > { %493 = vmatpush.bf16.msra.mxu0 %v1010_v19  ;;  %v1002_v26 = vor.u32 %v1104_v22, %v1001_v21  ;;  %v1006_v27 = vor.u32 %v1103_v24, %v1003_v25  ;;  %v993_v28 = vld [vmem:[%s1389_s4 + $0x50] sm:$0xf]  ;;  %v1102_v29 = vld [vmem:[%s1389_s4 + $0x54] sm:$0xf0]  ;;  %v1101_v30 = vld [vmem:[%s1389_s4 + $0x54] sm:$0xf] }
  0x3b   : > { %507 = vmatpush.bf16.msra.mxu1 %v1014_v23  ;;  %v995_v31 = vld [vmem:[%s1389_s4 + $0x58] sm:$0xf0]  ;;  %v1073_v32 = vld [vmem:[%s1392_s6 + $0x70] sm:$0xf]  ;;  %v994_v33 = vor.u32 %v1102_v29, %v993_v28  ;;  %v1122_v34 = vld [vmem:[%s1392_s6 + $0x74] sm:$0xf0] }
  0x3c   : > { %v1121_v35 = vld [vmem:[%s1392_s6 + $0x74] sm:$0xf]  ;;  %v1075_v36 = vld [vmem:[%s1392_s6 + $0x78] sm:$0xf0]  ;;  %v998_v37 = vor.u32 %v1101_v30, %v995_v31  ;;  %v985_v38 = vld [vmem:[%s1389_s4 + $0x40] sm:$0xf]  ;;  %v1074_v41 = vor.u32 %v1122_v34, %v1073_v32 }
  0x3d   : > { %v1100_v39 = vld [vmem:[%s1389_s4 + $0x44] sm:$0xf0]  ;;  %v1099_v40 = vld [vmem:[%s1389_s4 + $0x44] sm:$0xf]  ;;  %v1078_v42 = vor.u32 %v1121_v35, %v1075_v36  ;;  %v987_v43 = vld [vmem:[%s1389_s4 + $0x48] sm:$0xf0] }
  0x3e   : > { %494 = vmatpush.bf16.msra.mxu0 %v1002_v26  ;;  %v1065_v44 = vld [vmem:[%s1392_s6 + $0x60] sm:$0xf]  ;;  %v1120_v45 = vld [vmem:[%s1392_s6 + $0x64] sm:$0xf0]  ;;  %629 = vmatpush.bf16.msra.mxu2 %v1074_v41  ;;  %v1119_v47 = vld [vmem:[%s1392_s6 + $0x64] sm:$0xf]  ;;  %v986_v49 = vor.u32 %v1100_v39, %v985_v38  ;;  %v990_v53 = vor.u32 %v1099_v40, %v987_v43 }
  0x3f   : > { %508 = vmatpush.bf16.msra.mxu1 %v1006_v27  ;;  %643 = vmatpush.bf16.msra.mxu3 %v1078_v42  ;;  %v1066_v46 = vor.u32 %v1120_v45, %v1065_v44  ;;  %v1067_v48 = vld [vmem:[%s1392_s6 + $0x68] sm:$0xf0]  ;;  %v977_v50 = vld [vmem:[%s1389_s4 + $0x30] sm:$0xf]  ;;  %v1098_v51 = vld [vmem:[%s1389_s4 + $0x34] sm:$0xf0] }
  0x40   : > { %v1070_v52 = vor.u32 %v1119_v47, %v1067_v48  ;;  %v1057_v54 = vld [vmem:[%s1392_s6 + $0x50] sm:$0xf]  ;;  %v1118_v55 = vld [vmem:[%s1392_s6 + $0x54] sm:$0xf0]  ;;  %v1117_v56 = vld [vmem:[%s1392_s6 + $0x54] sm:$0xf]  ;;  %v978_v63 = vor.u32 %v1098_v51, %v977_v50 }
  0x41   : > { %v1097_v57 = vld [vmem:[%s1389_s4 + $0x34] sm:$0xf]  ;;  %v979_v58 = vld [vmem:[%s1389_s4 + $0x38] sm:$0xf0]  ;;  %v1058_v60 = vor.u32 %v1118_v55, %v1057_v54  ;;  %v1049_v62 = vld [vmem:[%s1392_s6 + $0x40] sm:$0xf] }
  0x42   : > { %495 = vmatpush.bf16.msra.mxu0 %v994_v33  ;;  %v1059_v59 = vld [vmem:[%s1392_s6 + $0x58] sm:$0xf0]  ;;  %630 = vmatpush.bf16.msra.mxu2 %v1066_v46  ;;  %v1116_v0 = vld [vmem:[%s1392_s6 + $0x44] sm:$0xf0]  ;;  %v1115_v1 = vld [vmem:[%s1392_s6 + $0x44] sm:$0xf]  ;;  %v982_v3 = vor.u32 %v1097_v57, %v979_v58 }
  0x43   : > { %509 = vmatpush.bf16.msra.mxu1 %v998_v37  ;;  %644 = vmatpush.bf16.msra.mxu3 %v1070_v52  ;;  %v1062_v61 = vor.u32 %v1117_v56, %v1059_v59  ;;  %v1051_v2 = vld [vmem:[%s1392_s6 + $0x48] sm:$0xf0]  ;;  %v969_v4 = vld [vmem:[%s1389_s4 + $0x20] sm:$0xf]  ;;  %v1096_v5 = vld [vmem:[%s1389_s4 + $0x24] sm:$0xf0]  ;;  %v1050_v8 = vor.u32 %v1116_v0, %v1049_v62 }
  0x44   : > { %v1095_v6 = vld [vmem:[%s1389_s4 + $0x24] sm:$0xf]  ;;  %v971_v7 = vld [vmem:[%s1389_s4 + $0x28] sm:$0xf0]  ;;  %v1054_v9 = vor.u32 %v1115_v1, %v1051_v2  ;;  %v1041_v10 = vld [vmem:[%s1392_s6 + $0x30] sm:$0xf]  ;;  %v970_v11 = vor.u32 %v1096_v5, %v969_v4 }
  0x45   : > { %v1114_v12 = vld [vmem:[%s1392_s6 + $0x34] sm:$0xf0]  ;;  %v1113_v13 = vld [vmem:[%s1392_s6 + $0x34] sm:$0xf]  ;;  %v1043_v14 = vld [vmem:[%s1392_s6 + $0x38] sm:$0xf0]  ;;  %v974_v15 = vor.u32 %v1095_v6, %v971_v7 }
  0x46   : > { %496 = vmatpush.bf16.msra.mxu0 %v986_v49  ;;  %631 = vmatpush.bf16.msra.mxu2 %v1058_v60  ;;  %v961_v16 = vld [vmem:[%s1389_s4 + $0x10] sm:$0xf]  ;;  %v1094_v17 = vld [vmem:[%s1389_s4 + $0x14] sm:$0xf0]  ;;  %v1093_v18 = vld [vmem:[%s1389_s4 + $0x14] sm:$0xf]  ;;  %v1042_v20 = vor.u32 %v1114_v12, %v1041_v10  ;;  %v1046_v21 = vor.u32 %v1113_v13, %v1043_v14 }
  0x47   : > { %510 = vmatpush.bf16.msra.mxu1 %v990_v53  ;;  %645 = vmatpush.bf16.msra.mxu3 %v1062_v61  ;;  %v963_v19 = vld [vmem:[%s1389_s4 + $0x18] sm:$0xf0]  ;;  %v1033_v22 = vld [vmem:[%s1392_s6 + $0x20] sm:$0xf]  ;;  %v962_v23 = vor.u32 %v1094_v17, %v961_v16  ;;  %v1112_v24 = vld [vmem:[%s1392_s6 + $0x24] sm:$0xf0] }
  0x48   : > { %v1111_v25 = vld [vmem:[%s1392_s6 + $0x24] sm:$0xf]  ;;  %v1035_v26 = vld [vmem:[%s1392_s6 + $0x28] sm:$0xf0]  ;;  %v966_v27 = vor.u32 %v1093_v18, %v963_v19  ;;  %v953_v28 = vld [vmem:[%s1389_s4] sm:$0xf]  ;;  %v1034_v32 = vor.u32 %v1112_v24, %v1033_v22 }
  0x49   : > { %v1092_v29 = vld [vmem:[%s1389_s4 + $0x4] sm:$0xf0]  ;;  %v1091_v30 = vld [vmem:[%s1389_s4 + $0x4] sm:$0xf]  ;;  %v955_v31 = vld [vmem:[%s1389_s4 + $0x8] sm:$0xf0]  ;;  %v1038_v33 = vor.u32 %v1111_v25, %v1035_v26 }
  0x4a   : > { %497 = vmatpush.bf16.msra.mxu0 %v978_v63  ;;  %632 = vmatpush.bf16.msra.mxu2 %v1050_v8  ;;  %v954_v34 = vor.u32 %v1092_v29, %v953_v28  ;;  %v1025_v35 = vld [vmem:[%s1392_s6 + $0x10] sm:$0xf]  ;;  %v1110_v36 = vld [vmem:[%s1392_s6 + $0x14] sm:$0xf0]  ;;  %v958_v37 = vor.u32 %v1091_v30, %v955_v31  ;;  %v1109_v38 = vld [vmem:[%s1392_s6 + $0x14] sm:$0xf] }
  0x4b   : > { %511 = vmatpush.bf16.msra.mxu1 %v982_v3  ;;  %646 = vmatpush.bf16.msra.mxu3 %v1054_v9  ;;  %v1027_v39 = vld [vmem:[%s1392_s6 + $0x18] sm:$0xf0]  ;;  %v1090_v40 = vld [vmem:[%s1505_s0] sm:$0xff]  ;;  %v1026_v41 = vor.u32 %v1110_v36, %v1025_v35  ;;  %v1108_v44 = vld [vmem:[%s1392_s6 + $0x4] sm:$0xf0]  ;;  %s357_s8 = scalar_lea.vmem [#allocation7], %s946_s7 }
  0x4c   : > { %v1030_v42 = vor.u32 %v1109_v38, %v1027_v39  ;;  %v1017_v43 = vld [vmem:[%s1392_s6] sm:$0xf]  ;;  %v1107_v45 = vld [vmem:[%s1392_s6 + $0x4] sm:$0xf]  ;;  %v1019_v46 = vld [vmem:[%s1392_s6 + $0x8] sm:$0xf0] }
  0x4d   : > { %v1018_v47 = vor.u32 %v1108_v44, %v1017_v43  ;;  %v1022_v48 = vor.u32 %v1107_v45, %v1019_v46  ;;  %s1123_s9 = sshll.u32 (%p1346_p9), %s1263_s15, 3 }
  0x4e   : > { %498 = vmatpush.bf16.msra.mxu0 %v970_v11  ;;  %633 = vmatpush.bf16.msra.mxu2 %v1042_v20  ;;  %s776_s12 = scalar_lea.vmem (%p1346_p9), %s1508_s3, %s1123_s9 }
  0x4f   : > { %512 = vmatpush.bf16.msra.mxu1 %v974_v15  ;;  %647 = vmatpush.bf16.msra.mxu3 %v1046_v21 }
  0x52   : > { %499 = vmatpush.bf16.msra.mxu0 %v962_v23  ;;  %634 = vmatpush.bf16.msra.mxu2 %v1034_v32 }
  0x53   : > { %513 = vmatpush.bf16.msra.mxu1 %v966_v27  ;;  %648 = vmatpush.bf16.msra.mxu3 %v1038_v33 }
  0x56   : > { %500 = vmatpush.bf16.msra.mxu0 %v954_v34  ;;  %635 = vmatpush.bf16.msra.mxu2 %v1026_v41 }
  0x57   : > { %514 = vmatpush.bf16.msra.mxu1 %v958_v37  ;;  %649 = vmatpush.bf16.msra.mxu3 %v1030_v42 }
  0x59   : > { %501 = vmatmul.bf16.vlgmr.msra.gmra.mxu0 %v1090_v40 }
  0x5a   : > { %515 = vmatmul.bf16.vlgmr.msra.gmra.mxu1 %v1090_v40  ;;  %636 = vmatpush.bf16.msra.mxu2 %v1018_v47 }
  0x5b   : > { %650 = vmatpush.bf16.msra.mxu3 %v1022_v48 }
  0x5d   : > { %637 = vmatmul.bf16.vlgmr.msra.gmra.mxu2 %v1090_v40 }
  0x5e   : > { %651 = vmatmul.bf16.vlgmr.msra.gmra.mxu3 %v1090_v40 }
  0xd6   : > { %v502_v49 = vpop.f32.mrf.mxu0 }
  0xd7   : > { %v1079_v50 = vmul.f32 -1.442695, %v502_v49  ;;  %v516_v51 = vpop.f32.mrf.mxu1 }
  0xd8   : > { %v1080_v52 = vmul.f32 -1.442695, %v516_v51 }
  0xd9   : > { %1177 = vpow2.f32 %v1079_v50 }
  0xda   : > { %1179 = vpow2.f32 %v1080_v52 }
  0xde   : > { %v1465_v53 = vpop.f32.mrf.mxu0 }
  0xdf   : > { %v1178_v54 = vpop.eup %1177  ;;  %v1081_v55 = vmul.f32 -1.442695, %v1465_v53  ;;  %v1468_v56 = vpop.f32.mrf.mxu1 }
  0xe0   : > { %v1180_v57 = vpop.eup %1179  ;;  %v684_v58 = vadd.f32 1.0, %v1178_v54  ;;  %v1082_v59 = vmul.f32 -1.442695, %v1468_v56  ;;  %v638_v27 = vpop.f32.mrf.mxu2 }
  0xe1   : > { %v685_v60 = vadd.f32 1.0, %v1180_v57  ;;  %1181 = vpow2.f32 %v1081_v55  ;;  %v652_v33 = vpop.f32.mrf.mxu3 }
  0xe2   : > { %1183 = vrcp.f32 %v684_v58  ;;  %v697_v6 = vand.u32 2147483647, %v684_v58  ;;  %v699_v7 = vand.u32 2147483648, %v684_v58  ;;  %vm693_vm2 = vweird.f32 %v684_v58 }
  0xe3   : > { %1185 = vrcp.f32 %v685_v60  ;;  %v714_v10 = vand.u32 2147483648, %v685_v60  ;;  %v712_v12 = vand.u32 2147483647, %v685_v60  ;;  %vm708_vm4 = vweird.f32 %v685_v60 }
  0xe4   : > { %1187 = vpow2.f32 %v1082_v59  ;;  %v700_v15 = vor.u32 1.1754944e-38, %v699_v7  ;;  %vm698_vm5 = vcmp.eq.f32.partialorder %v697_v6, 8.507059e+37 }
  0xe5   : > { %v715_v18 = vor.u32 1.1754944e-38, %v714_v10  ;;  %vm713_vm7 = vcmp.eq.f32.partialorder %v712_v12, 8.507059e+37 }
  0xe7   : > { %v1182_v61 = vpop.eup %1181 }
  0xe8   : > { %v1184_v62 = vpop.eup %1183  ;;  %v686_v63 = vadd.f32 1.0, %v1182_v61 }
  0xe9   : > { %v1186_v0 = vpop.eup %1185  ;;  %v689_v1 = vmul.f32 %v1184_v62, %v684_v58  ;;  %vm694_vm0 = vweird.f32 %v1184_v62  ;;  %v654_v52 = vpop.f32.mrf.mxu3 }
  0xea   : > { %v1188_v2 = vpop.eup %1187  ;;  %v704_v3 = vmul.f32 %v1186_v0, %v685_v60  ;;  %1189 = vrcp.f32 %v686_v63  ;;  %vm709_vm1 = vweird.f32 %v1186_v0  ;;  %vm695_vm3 = vmor %vm693_vm2, %vm694_vm0  ;;  %v729_v26 = vand.u32 2147483648, %v686_v63 }
  0xeb   : > { %v690_v4 = vsub.f32 1.0, %v689_v1  ;;  %v1471_v5 = vadd.f32 1.0, %v1188_v2  ;;  %vm710_vm6 = vmor %vm708_vm4, %vm709_vm1  ;;  %v727_v31 = vand.u32 2147483647, %v686_v63  ;;  %vm723_vm9 = vweird.f32 %v686_v63 }
  0xec   : > { %v705_v8 = vsub.f32 1.0, %v704_v3  ;;  %v730_v37 = vor.u32 1.1754944e-38, %v729_v26 }
  0xed   : > { %v691_v9 = vmul.f32 %v1184_v62, %v690_v4  ;;  %1191 = vrcp.f32 %v1471_v5  ;;  %v744_v38 = vand.u32 2147483648, %v1471_v5  ;;  %v742_v40 = vand.u32 2147483647, %v1471_v5 }
  0xee   : > { %v706_v11 = vmul.f32 %v1186_v0, %v705_v8  ;;  %vm728_vm12 = vcmp.eq.f32.partialorder %v727_v31, 8.507059e+37  ;;  %vm738_vm13 = vweird.f32 %v1471_v5 }
  0xef   : > { %v692_v13 = vadd.f32 %v1184_v62, %v691_v9  ;;  %v745_v46 = vor.u32 1.1754944e-38, %v744_v38  ;;  %vm743_vm15 = vcmp.eq.f32.partialorder %v742_v40, 8.507059e+37 }
  0xf0   : > { %v1190_v14 = vpop.eup %1189  ;;  %v707_v16 = vadd.f32 %v1186_v0, %v706_v11 }
  0xf1   : > { %v696_v17 = vsel %vm695_vm3, %v1184_v62, %v692_v13  ;;  %v719_v19 = vmul.f32 %v1190_v14, %v686_v63  ;;  %vm724_vm8 = vweird.f32 %v1190_v14 }
  0xf2   : > { %v701_v20 = vsel %vm698_vm5, %v700_v15, %v696_v17  ;;  %v711_v21 = vsel %vm710_vm6, %v1186_v0, %v707_v16  ;;  %vm725_vm10 = vmor %vm723_vm9, %vm724_vm8 }
  0xf3   : > { %v1192_v22 = vpop.eup %1191  ;;  %v748_v23 = vmul.f32 %v701_v20, %v502_v49  ;;  %v716_v24 = vsel %vm713_vm7, %v715_v18, %v711_v21  ;;  %v720_v25 = vsub.f32 1.0, %v719_v19  ;;  %v640_v49 = vpop.f32.mrf.mxu2 }
  0xf4   : > { %v749_v28 = vmul.f32 %v716_v24, %v516_v51  ;;  %v734_v29 = vmul.f32 %v1192_v22, %v1471_v5  ;;  %vm739_vm11 = vweird.f32 %v1192_v22 }
  0xf5   : > { %v721_v30 = vmul.f32 %v1190_v14, %v720_v25  ;;  %v756_v32 = vmul.f32 %v748_v23, %v638_v27  ;;  %vm740_vm14 = vmor %vm738_vm13, %vm739_vm11 }
  0xf6   : > { %v735_v34 = vsub.f32 1.0, %v734_v29  ;;  %v757_v35 = vmul.f32 %v749_v28, %v652_v33 }
  0xf7   : > { %v722_v36 = vadd.f32 %v1190_v14, %v721_v30 }
  0xf8   : > { %v736_v39 = vmul.f32 %v1192_v22, %v735_v34  ;;  %v760_v41 = vpack.c.bf16 %v757_v35, %v756_v32 }
  0xf9   : > { %v726_v42 = vsel %vm725_vm10, %v1190_v14, %v722_v36 }
  0xfa   : > { %v731_v43 = vsel %vm728_vm12, %v730_v37, %v726_v42  ;;  %v737_v44 = vadd.f32 %v1192_v22, %v736_v39  ;;  %762 = vst [vmem:[%s357_s8] sm:$0xff] %v760_v41 }
  0xfb   : > { %v750_v45 = vmul.f32 %v731_v43, %v1465_v53 }
  0xfc   : > { %v741_v47 = vsel %vm740_vm14, %v1192_v22, %v737_v44 }
  0xfd   : > { %v746_v48 = vsel %vm743_vm15, %v745_v46, %v741_v47  ;;  %v758_v51 = vmul.f32 %v750_v45, %v640_v49 }
  0xfe   : > { %v751_v50 = vmul.f32 %v746_v48, %v1468_v56 }
 0x100   : > { %v759_v54 = vmul.f32 %v751_v50, %v654_v52  ;;  %770 = sbr.rel (!%p1346_p9) target bundleno = 269 (0x10d), region = 86 }
 0x101   : > { %v807_v57 = vld [vmem:[%s357_s8] sm:$0xff] (%p1346_p9) }
 0x102   : > { %v761_v55 = vpack.c.bf16 %v759_v54, %v758_v51  ;;  %808 = vst [vmem:[%s776_s12] sm:$0xff] (%p1346_p9), %v807_v57 }
 0x104   : > { %763 = vst [vmem:[%s357_s8 + $0x8] sm:$0xff] %v761_v55 }
 0x10b   : > { %v809_v53 = vld [vmem:[%s357_s8 + $0x8] sm:$0xff] }
 0x10c   : > { %810 = vst [vmem:[%s776_s12 + $0x10] sm:$0xff] %v809_v53 }
 0x10d PF: > { %s16_s17 = sadd.s32 1, %s1271_s17   ;;  %s1512_s12 = smov %s1255_s13 }
 0x10e   : > { %p13_p0 = scmp.ge.s32.totalorder %s16_s17, 4   ;;  %s1513_s13 = smov %s1259_s14 }
 0x10f   : > { %s1514_s14 = smov %s1344_s24  ;;  %s1515_s15 = smov %s1267_s16 }
 0x110   : > { %s1516_s16 = smov %s1518_s19  ;;  %15 = sbr.rel (!%p13_p0) target bundleno = 4 (0x4), region = 167 }
 0x115   :  { %826 = vsyncpa [#allocation6], 1 }
 0x116   :  { %828 = vsyncpa [#allocation6 + $0x1], 1 }

</bundles_post_ra>
